<compile_context>
chip_gen: v6e
topology: v6e:2x2x1
jax: 0.10.0
libtpu: 0.0.40
codegen_flags: <defaults>
</compile_context>

<pallas_src>
import jax
import jax.numpy as jnp
from jax import lax
from jax.experimental import pallas as pl
from jax.experimental.pallas import tpu as pltpu

LANE = 128  # TPU lane width; channel dim is padded to a multiple of this.


def _round_up(x, m):
    return (x + m - 1) // m * m


# ---------------------------------------------------------------------------
# Fused Pallas kernel
# ---------------------------------------------------------------------------
def _basic_block_kernel(x_ref, w1_ref, b1_ref, w2_ref, b2_ref, out_ref,
                        shift_scr):
    """Fused BasicBlock forward for one batch tile.

    x_ref     : (bt, H, W, C)       bf16 input tile, C lane-padded (mult of 128)
    w*_ref    : (3, 3*C, C)         bf16 conv weights with BN scale folded in;
                                    K index = kw*C + cin
    b*_ref    : (1, C)              f32 folded BN bias
    out_ref   : (bt, H, W, C)       f32 output tile
    shift_scr : (bt, H+2, W, 3*C)   bf16 scratch; slot kw holds the padded
                                    activation shifted by kw in W, so each kh
                                    matmul reads one contiguous slab (K = 3*C).
                                    Reused for conv1's input and conv2's input
                                    (the intermediate never touches HBM).
    """
    bt, H, W, C = x_ref.shape
    C3 = 3 * C
    M = bt * H * W
    zdt = shift_scr.dtype

    # Zero only the halo border (cells never written by the interior writes).
    # Done every step: under megacore "parallel" sharding each core has its own
    # scratch whose first program_id != 0, so a pid==0 gate would be unsafe.
    shift_scr[:, 0:1, :, :] = jnp.zeros((bt, 1, W, C3), zdt)
    shift_scr[:, H + 1:H + 2, :, :] = jnp.zeros((bt, 1, W, C3), zdt)
    shift_scr[:, 1:H + 1, 0:1, 0:C] = jnp.zeros((bt, H, 1, C), zdt)
    shift_scr[:, 1:H + 1, W - 1:W, 2 * C:C3] = jnp.zeros((bt, H, 1, C), zdt)

    def write_shifted(act):
        # act: (bt, H, W, C) bf16.  slot kw <- x_pad[:, :, w+kw, :]; the zero
        # border supplies the 'same' padding for both convs.
        shift_scr[:, 1:H + 1, 1:W, 0:C] = act[:, :, 0:W - 1, :]
        shift_scr[:, 1:H + 1, :, C:2 * C] = act
        shift_scr[:, 1:H + 1, 0:W - 1, 2 * C:C3] = act[:, :, 1:W, :]

    def conv3x3(w_ref):
        # 3 MXU matmuls (one per kh); kw folded into the contraction (K = 3*C).
        acc = jnp.dot(shift_scr[:, 0:H, :, :].reshape(M, C3), w_ref[0],
                      preferred_element_type=jnp.float32)
        for kh in (1, 2):
            acc = acc + jnp.dot(shift_scr[:, kh:kh + H, :, :].reshape(M, C3),
                                w_ref[kh],
                                preferred_element_type=jnp.float32)
        return acc

    x = x_ref[...]  # bf16

    # conv1 (BN1 scale folded into weights) + bias + ReLU; stays in VMEM.
    write_shifted(x)
    a1 = jnp.maximum(conv3x3(w1_ref) + b1_ref[...], 0.0)

    # conv2 (BN2 scale folded) + bias + residual add + ReLU.
    write_shifted(a1.reshape(bt, H, W, C).astype(zdt))
    a2 = conv3x3(w2_ref) + b2_ref[...]
    a2 = a2 + x.reshape(M, C).astype(jnp.float32)
    out_ref[...] = jnp.maximum(a2, 0.0).reshape(bt, H, W, C).astype(out_ref.dtype)


# ---------------------------------------------------------------------------
# pallas_call wrapper
# ---------------------------------------------------------------------------
def _basic_block_pallas(xp, w1, b1, w2, b2, *, batch_tile):
    N, H, W, C = xp.shape
    bt = batch_tile
    assert N % bt == 0
    assert W % 8 == 0, "W must be a multiple of 8 for layout-free reshapes"
    assert C % LANE == 0, "channel dim must be lane-padded"

    img_spec = pl.BlockSpec((bt, H, W, C), lambda n: (n, 0, 0, 0))
    w_spec = pl.BlockSpec((3, 3 * C, C), lambda n: (0, 0, 0))
    v_spec = pl.BlockSpec((1, C), lambda n: (0, 0))

    flops = 2 * (2 * N * H * W * 9 * C * C)          # 2 convs, 2 flops/MAC
    bytes_accessed = (N * H * W * C * 2              # bf16 input
                      + N * H * W * C * 4            # f32 output
                      + 2 * 3 * 3 * C * C * 2        # bf16 weights
                      + 2 * C * 4)                   # f32 biases

    return pl.pallas_call(
        _basic_block_kernel,
        out_shape=jax.ShapeDtypeStruct((N, H, W, C), jnp.float32),
        grid_spec=pltpu.PrefetchScalarGridSpec(
            num_scalar_prefetch=0,
            grid=(N // bt,),
            in_specs=[img_spec, w_spec, v_spec, w_spec, v_spec],
            out_specs=pl.BlockSpec((bt, H, W, C), lambda n: (n, 0, 0, 0)),
            scratch_shapes=[pltpu.VMEM((bt, H + 2, W, 3 * C), jnp.bfloat16)],
        ),
        compiler_params=pltpu.CompilerParams(
            dimension_semantics=("parallel",),
            vmem_limit_bytes=48 * 1024 * 1024),
        cost_estimate=pl.CostEstimate(flops=flops, transcendentals=0,
                                      bytes_accessed=bytes_accessed),
    )(xp, w1, b1, w2, b2)


def _pick_batch_tile(n, h, w, max_rows=2048):
    """Largest divisor of n with bt*H*W <= max_rows while keeping >= 2 grid
    steps (v7x dual TensorCores / pipeline overlap)."""
    min_steps = 2 if n >= 2 else 1
    best = 1
    for cand in range(1, n + 1):
        if n % cand == 0 and cand * h * w <= max_rows and n // cand >= min_steps:
            best = cand
    return best


# ---------------------------------------------------------------------------
# Parameters and forward
# ---------------------------------------------------------------------------
def init_basic_block_params(key, inplanes, planes, eps=1e-5):
    """Deterministic synthetic parameters (shapes match the PyTorch module)."""
    assert inplanes == planes, "stride=1 / downsample=None BasicBlock"
    k = jax.random.split(key, 10)
    # conv weights: PyTorch layout (Cout, Cin, 3, 3) -> HWIO.
    w1 = 0.1 * jax.random.normal(k[0], (planes, inplanes, 3, 3), jnp.float32)
    w2 = 0.1 * jax.random.normal(k[1], (planes, planes, 3, 3), jnp.float32)
    w1_hwio = jnp.transpose(w1, (2, 3, 1, 0))
    w2_hwio = jnp.transpose(w2, (2, 3, 1, 0))

    def bn_fold(kg, kb, km, kv):
        gamma = 1.0 + 0.1 * jax.random.normal(kg, (planes,), jnp.float32)
        beta = 0.1 * jax.random.normal(kb, (planes,), jnp.float32)
        mean = 0.1 * jax.random.normal(km, (planes,), jnp.float32)
        var = jnp.abs(1.0 + 0.1 * jax.random.normal(kv, (planes,), jnp.float32))
        scale = gamma / jnp.sqrt(var + eps)
        bias = beta - mean * scale
        return scale, bias

    s1, b1 = bn_fold(k[2], k[3], k[4], k[5])
    s2, b2 = bn_fold(k[6], k[7], k[8], k[9])

    # Fold the BN scale into the conv weights (inference), then cast to bf16.
    w1s_bf16 = (w1_hwio * s1[None, None, None, :]).astype(jnp.bfloat16)
    w2s_bf16 = (w2_hwio * s2[None, None, None, :]).astype(jnp.bfloat16)

    cp = _round_up(planes, LANE)  # lane-padded channel count

    def fold_weight(w_bf16):
        cin, cout = w_bf16.shape[2], w_bf16.shape[3]
        wp = jnp.pad(w_bf16, ((0, 0), (0, 0), (0, cp - cin), (0, cp - cout)))
        # (3, 3, Cp, Cp) -> (3, 3*Cp, Cp); K index = kw*Cp + cin, matching the
        # kernel's kw-shifted scratch slots.
        return wp.reshape(3, 3 * cp, cp)

    def pad_vec(v):
        return jnp.pad(v, (0, cp - v.shape[0])).reshape(1, cp)

    return dict(
        # kernel-side (lane-padded, BN-scale-folded, bf16 weights / f32 bias)
        w1_k=fold_weight(w1s_bf16), w2_k=fold_weight(w2s_bf16),
        b1_k=pad_vec(b1), b2_k=pad_vec(b2),
        cpad=cp,
        # reference-side (unpadded)
        w1s_bf16_hwio=w1s_bf16, w2s_bf16_hwio=w2s_bf16, b1=b1, b2=b2,
    )


def basic_block_forward(x_nchw, params):
    """BasicBlock with stride=1, downsample=None (the module's defaults)."""
    # TODO(synk): in a full network keep activations NHWC, lane-padded and bf16
    # end-to-end; these boundary ops only exist to match the NCHW f32 interface.
    x = jnp.transpose(x_nchw, (0, 2, 3, 1))                     # NCHW -> NHWC
    N, H, W, C = x.shape
    cp = params["cpad"]
    if cp != C:
        x = jnp.pad(x, ((0, 0), (0, 0), (0, 0), (0, cp - C)))
    xp = x.astype(jnp.bfloat16)
    bt = _pick_batch_tile(N, H, W)
    out = _basic_block_pallas(xp,
                              params["w1_k"], params["b1_k"],
                              params["w2_k"], params["b2_k"],
                              batch_tile=bt)
    if cp != C:
        out = out[..., :C]
    return jnp.transpose(out, (0, 3, 1, 2))                     # NHWC -> NCHW


# ---------------------------------------------------------------------------
# Pure-JAX reference (verification only; mirrors the kernel's bf16 cast points)
# ---------------------------------------------------------------------------
def _reference_forward(x_nchw, params):
    f32 = jnp.float32

    def conv(a, w_bf16):
        return lax.conv_general_dilated(
            a, w_bf16.astype(f32), window_strides=(1, 1),
            padding=((1, 1), (1, 1)),
            dimension_numbers=("NHWC", "HWIO", "NHWC"))

    x = jnp.transpose(x_nchw, (0, 2, 3, 1)).astype(jnp.bfloat16).astype(f32)
    out = conv(x, params["w1s_bf16_hwio"]) + params["b1"]
    out = jnp.maximum(out, 0.0).astype(jnp.bfloat16).astype(f32)
    out = conv(out, params["w2s_bf16_hwio"]) + params["b2"]
    out = jnp.maximum(out + x, 0.0)
    return jnp.transpose(out, (0, 3, 1, 2))


if __name__ == "__main__":
    key = jax.random.PRNGKey(0)
    kx, kp = jax.random.split(key)

    N, C, H, W = 2, 4, 16, 16          # inplanes = planes = 4, stride = 1
    x = jax.random.normal(kx, (N, C, H, W), jnp.float32)
    params = init_basic_block_params(kp, inplanes=C, planes=C)

    out = jax.block_until_ready(basic_block_forward(x, params))

    ref = _reference_forward(x, params)
    assert out.shape == (N, C, H, W)
    max_err = float(jnp.max(jnp.abs(out - ref)))
    assert jnp.allclose(out, ref, atol=1e-2, rtol=1e-2), (
        f"mismatch vs reference (max abs err {max_err})")

    print("KERNEL_OK")
</pallas_src>

<mosaic_0001>
module attributes {stable_mosaic.version = 11 : i64} {
  func.func @_basic_block_kernel(%arg0: i32, %arg1: memref<1x16x16x128xbf16, #tpu.memory_space<vmem>>, %arg2: memref<3x384x128xbf16, #tpu.memory_space<vmem>>, %arg3: memref<1x128xf32, #tpu.memory_space<vmem>>, %arg4: memref<3x384x128xbf16, #tpu.memory_space<vmem>>, %arg5: memref<1x128xf32, #tpu.memory_space<vmem>>, %arg6: memref<1x16x16x128xf32, #tpu.memory_space<vmem>>, %arg7: memref<1x18x16x384xbf16, #tpu.memory_space<vmem>>) attributes {dimension_semantics = [#tpu.dimension_semantics<parallel>], iteration_bounds = array<i64: 2>, scalar_prefetch = 0 : i64, scratch_operands = 1 : i64, tpu.core_type = #tpu.core_type<tc>, window_params = [{transform_indices = @transform_0, window_bounds = array<i64: 1, 16, 16, 128>}, {pipeline_mode = #tpu.pipeline_mode<synchronous>, transform_indices = @transform_1, window_bounds = array<i64: 3, 384, 128>}, {pipeline_mode = #tpu.pipeline_mode<synchronous>, transform_indices = @transform_2, window_bounds = array<i64: 1, 128>}, {pipeline_mode = #tpu.pipeline_mode<synchronous>, transform_indices = @transform_3, window_bounds = array<i64: 3, 384, 128>}, {pipeline_mode = #tpu.pipeline_mode<synchronous>, transform_indices = @transform_4, window_bounds = array<i64: 1, 128>}, {transform_indices = @transform_5, window_bounds = array<i64: 1, 16, 16, 128>}]} {
    %cst = arith.constant 0.000000e+00 : bf16
    %0 = vector.broadcast %cst : bf16 to vector<1x1x16x384xbf16>
    %c0 = arith.constant 0 : index
    %c0_0 = arith.constant 0 : index
    %c0_1 = arith.constant 0 : index
    %c0_2 = arith.constant 0 : index
    %1 = vector.load %arg7[%c0, %c0_0, %c0_1, %c0_2] : memref<1x18x16x384xbf16, #tpu.memory_space<vmem>>, vector<1x1x16x384xbf16>
    tpu.vector_store %arg7[%c0, %c0_0, %c0_1, %c0_2], %0 {strides = array<i32>} : memref<1x18x16x384xbf16, #tpu.memory_space<vmem>>, vector<1x1x16x384xbf16>,
    %cst_3 = arith.constant 0.000000e+00 : bf16
    %2 = vector.broadcast %cst_3 : bf16 to vector<1x1x16x384xbf16>
    %c0_4 = arith.constant 0 : index
    %c17 = arith.constant 17 : index
    %c0_5 = arith.constant 0 : index
    %c0_6 = arith.constant 0 : index
    %3 = vector.load %arg7[%c0_4, %c17, %c0_5, %c0_6] : memref<1x18x16x384xbf16, #tpu.memory_space<vmem>>, vector<1x1x16x384xbf16>
    tpu.vector_store %arg7[%c0_4, %c17, %c0_5, %c0_6], %2 {strides = array<i32>} : memref<1x18x16x384xbf16, #tpu.memory_space<vmem>>, vector<1x1x16x384xbf16>,
    %cst_7 = arith.constant 0.000000e+00 : bf16
    %4 = vector.broadcast %cst_7 : bf16 to vector<1x16x1x128xbf16>
    %c0_8 = arith.constant 0 : index
    %c1 = arith.constant 1 : index
    %c0_9 = arith.constant 0 : index
    %c0_10 = arith.constant 0 : index
    %5 = vector.load %arg7[%c0_8, %c1, %c0_9, %c0_10] : memref<1x18x16x384xbf16, #tpu.memory_space<vmem>>, vector<1x16x1x128xbf16>
    tpu.vector_store %arg7[%c0_8, %c1, %c0_9, %c0_10], %4 {strides = array<i32>} : memref<1x18x16x384xbf16, #tpu.memory_space<vmem>>, vector<1x16x1x128xbf16>,
    %cst_11 = arith.constant 0.000000e+00 : bf16
    %6 = vector.broadcast %cst_11 : bf16 to vector<1x16x1x128xbf16>
    %c0_12 = arith.constant 0 : index
    %c1_13 = arith.constant 1 : index
    %c15 = arith.constant 15 : index
    %c256 = arith.constant 256 : index
    %7 = vector.load %arg7[%c0_12, %c1_13, %c15, %c256] : memref<1x18x16x384xbf16, #tpu.memory_space<vmem>>, vector<1x16x1x128xbf16>
    tpu.vector_store %arg7[%c0_12, %c1_13, %c15, %c256], %6 {strides = array<i32>} : memref<1x18x16x384xbf16, #tpu.memory_space<vmem>>, vector<1x16x1x128xbf16>,
    %c0_14 = arith.constant 0 : index
    %c0_15 = arith.constant 0 : index
    %c0_16 = arith.constant 0 : index
    %c0_17 = arith.constant 0 : index
    %8 = vector.load %arg1[%c0_14, %c0_15, %c0_16, %c0_17] : memref<1x16x16x128xbf16, #tpu.memory_space<vmem>>, vector<1x16x16x128xbf16>
    %9 = vector.extract_strided_slice %8 {offsets = [0, 0, 0, 0], sizes = [1, 16, 15, 128], strides = [1, 1, 1, 1]} : vector<1x16x16x128xbf16> to vector<1x16x15x128xbf16>
    %c0_18 = arith.constant 0 : index
    %c1_19 = arith.constant 1 : index
    %c1_20 = arith.constant 1 : index
    %c0_21 = arith.constant 0 : index
    %10 = vector.load %arg7[%c0_18, %c1_19, %c1_20, %c0_21] : memref<1x18x16x384xbf16, #tpu.memory_space<vmem>>, vector<1x16x15x128xbf16>
    tpu.vector_store %arg7[%c0_18, %c1_19, %c1_20, %c0_21], %9 {strides = array<i32>} : memref<1x18x16x384xbf16, #tpu.memory_space<vmem>>, vector<1x16x15x128xbf16>,
    %c0_22 = arith.constant 0 : index
    %c1_23 = arith.constant 1 : index
    %c0_24 = arith.constant 0 : index
    %c128 = arith.constant 128 : index
    %11 = vector.load %arg7[%c0_22, %c1_23, %c0_24, %c128] : memref<1x18x16x384xbf16, #tpu.memory_space<vmem>>, vector<1x16x16x128xbf16>
    tpu.vector_store %arg7[%c0_22, %c1_23, %c0_24, %c128], %8 {strides = array<i32>} : memref<1x18x16x384xbf16, #tpu.memory_space<vmem>>, vector<1x16x16x128xbf16>,
    %12 = vector.extract_strided_slice %8 {offsets = [0, 0, 1, 0], sizes = [1, 16, 15, 128], strides = [1, 1, 1, 1]} : vector<1x16x16x128xbf16> to vector<1x16x15x128xbf16>
    %c0_25 = arith.constant 0 : index
    %c1_26 = arith.constant 1 : index
    %c0_27 = arith.constant 0 : index
    %c256_28 = arith.constant 256 : index
    %13 = vector.load %arg7[%c0_25, %c1_26, %c0_27, %c256_28] : memref<1x18x16x384xbf16, #tpu.memory_space<vmem>>, vector<1x16x15x128xbf16>
    tpu.vector_store %arg7[%c0_25, %c1_26, %c0_27, %c256_28], %12 {strides = array<i32>} : memref<1x18x16x384xbf16, #tpu.memory_space<vmem>>, vector<1x16x15x128xbf16>,
    %c0_29 = arith.constant 0 : index
    %c0_30 = arith.constant 0 : index
    %c0_31 = arith.constant 0 : index
    %c0_32 = arith.constant 0 : index
    %14 = vector.load %arg7[%c0_29, %c0_30, %c0_31, %c0_32] : memref<1x18x16x384xbf16, #tpu.memory_space<vmem>>, vector<1x16x16x384xbf16>
    %15 = vector.shape_cast %14 : vector<1x16x16x384xbf16> to vector<256x384xbf16>
    %c0_33 = arith.constant 0 : index
    %c0_34 = arith.constant 0 : index
    %c0_35 = arith.constant 0 : index
    %16 = vector.load %arg2[%c0_33, %c0_34, %c0_35] : memref<3x384x128xbf16, #tpu.memory_space<vmem>>, vector<1x384x128xbf16>
    %17 = vector.shape_cast %16 : vector<1x384x128xbf16> to vector<384x128xbf16>
    %cst_36 = arith.constant dense<0.000000e+00> : vector<256x128xf32>
    %18 = tpu.matmul %15, %17, %cst_36 {dimension_numbers = #tpu.dot_dimension_numbers<[1], [0], [0], [1], [0, 0, 1, 1], [], []>} : vector<256x384xbf16>, vector<384x128xbf16>, vector<256x128xf32> -> vector<256x128xf32>
    %c0_37 = arith.constant 0 : index
    %c1_38 = arith.constant 1 : index
    %c0_39 = arith.constant 0 : index
    %c0_40 = arith.constant 0 : index
    %19 = vector.load %arg7[%c0_37, %c1_38, %c0_39, %c0_40] : memref<1x18x16x384xbf16, #tpu.memory_space<vmem>>, vector<1x16x16x384xbf16>
    %20 = vector.shape_cast %19 : vector<1x16x16x384xbf16> to vector<256x384xbf16>
    %c1_41 = arith.constant 1 : index
    %c0_42 = arith.constant 0 : index
    %c0_43 = arith.constant 0 : index
    %21 = vector.load %arg2[%c1_41, %c0_42, %c0_43] : memref<3x384x128xbf16, #tpu.memory_space<vmem>>, vector<1x384x128xbf16>
    %22 = vector.shape_cast %21 : vector<1x384x128xbf16> to vector<384x128xbf16>
    %cst_44 = arith.constant dense<0.000000e+00> : vector<256x128xf32>
    %23 = tpu.matmul %20, %22, %cst_44 {dimension_numbers = #tpu.dot_dimension_numbers<[1], [0], [0], [1], [0, 0, 1, 1], [], []>} : vector<256x384xbf16>, vector<384x128xbf16>, vector<256x128xf32> -> vector<256x128xf32>
    %24 = arith.addf %18, %23 : vector<256x128xf32>
    %c0_45 = arith.constant 0 : index
    %c2 = arith.constant 2 : index
    %c0_46 = arith.constant 0 : index
    %c0_47 = arith.constant 0 : index
    %25 = vector.load %arg7[%c0_45, %c2, %c0_46, %c0_47] : memref<1x18x16x384xbf16, #tpu.memory_space<vmem>>, vector<1x16x16x384xbf16>
    %26 = vector.shape_cast %25 : vector<1x16x16x384xbf16> to vector<256x384xbf16>
    %c2_48 = arith.constant 2 : index
    %c0_49 = arith.constant 0 : index
    %c0_50 = arith.constant 0 : index
    %27 = vector.load %arg2[%c2_48, %c0_49, %c0_50] : memref<3x384x128xbf16, #tpu.memory_space<vmem>>, vector<1x384x128xbf16>
    %28 = vector.shape_cast %27 : vector<1x384x128xbf16> to vector<384x128xbf16>
    %cst_51 = arith.constant dense<0.000000e+00> : vector<256x128xf32>
    %29 = tpu.matmul %26, %28, %cst_51 {dimension_numbers = #tpu.dot_dimension_numbers<[1], [0], [0], [1], [0, 0, 1, 1], [], []>} : vector<256x384xbf16>, vector<384x128xbf16>, vector<256x128xf32> -> vector<256x128xf32>
    %30 = arith.addf %24, %29 : vector<256x128xf32>
    %c0_52 = arith.constant 0 : index
    %c0_53 = arith.constant 0 : index
    %31 = vector.load %arg3[%c0_52, %c0_53] : memref<1x128xf32, #tpu.memory_space<vmem>>, vector<1x128xf32>
    %32 = vector.broadcast %31 : vector<1x128xf32> to vector<256x128xf32>
    %33 = arith.addf %30, %32 : vector<256x128xf32>
    %cst_54 = arith.constant 0.000000e+00 : f32
    %34 = vector.broadcast %cst_54 : f32 to vector<256x128xf32>
    %35 = arith.maximumf %33, %34 : vector<256x128xf32>
    %36 = vector.shape_cast %35 : vector<256x128xf32> to vector<1x16x16x128xf32>
    %37 = arith.truncf %36 : vector<1x16x16x128xf32> to vector<1x16x16x128xbf16>
    %38 = vector.extract_strided_slice %37 {offsets = [0, 0, 0, 0], sizes = [1, 16, 15, 128], strides = [1, 1, 1, 1]} : vector<1x16x16x128xbf16> to vector<1x16x15x128xbf16>
    %c0_55 = arith.constant 0 : index
    %c1_56 = arith.constant 1 : index
    %c1_57 = arith.constant 1 : index
    %c0_58 = arith.constant 0 : index
    %39 = vector.load %arg7[%c0_55, %c1_56, %c1_57, %c0_58] : memref<1x18x16x384xbf16, #tpu.memory_space<vmem>>, vector<1x16x15x128xbf16>
    tpu.vector_store %arg7[%c0_55, %c1_56, %c1_57, %c0_58], %38 {strides = array<i32>} : memref<1x18x16x384xbf16, #tpu.memory_space<vmem>>, vector<1x16x15x128xbf16>,
    %c0_59 = arith.constant 0 : index
    %c1_60 = arith.constant 1 : index
    %c0_61 = arith.constant 0 : index
    %c128_62 = arith.constant 128 : index
    %40 = vector.load %arg7[%c0_59, %c1_60, %c0_61, %c128_62] : memref<1x18x16x384xbf16, #tpu.memory_space<vmem>>, vector<1x16x16x128xbf16>
    tpu.vector_store %arg7[%c0_59, %c1_60, %c0_61, %c128_62], %37 {strides = array<i32>} : memref<1x18x16x384xbf16, #tpu.memory_space<vmem>>, vector<1x16x16x128xbf16>,
    %41 = vector.extract_strided_slice %37 {offsets = [0, 0, 1, 0], sizes = [1, 16, 15, 128], strides = [1, 1, 1, 1]} : vector<1x16x16x128xbf16> to vector<1x16x15x128xbf16>
    %c0_63 = arith.constant 0 : index
    %c1_64 = arith.constant 1 : index
    %c0_65 = arith.constant 0 : index
    %c256_66 = arith.constant 256 : index
    %42 = vector.load %arg7[%c0_63, %c1_64, %c0_65, %c256_66] : memref<1x18x16x384xbf16, #tpu.memory_space<vmem>>, vector<1x16x15x128xbf16>
    tpu.vector_store %arg7[%c0_63, %c1_64, %c0_65, %c256_66], %41 {strides = array<i32>} : memref<1x18x16x384xbf16, #tpu.memory_space<vmem>>, vector<1x16x15x128xbf16>,
    %c0_67 = arith.constant 0 : index
    %c0_68 = arith.constant 0 : index
    %c0_69 = arith.constant 0 : index
    %c0_70 = arith.constant 0 : index
    %43 = vector.load %arg7[%c0_67, %c0_68, %c0_69, %c0_70] : memref<1x18x16x384xbf16, #tpu.memory_space<vmem>>, vector<1x16x16x384xbf16>
    %44 = vector.shape_cast %43 : vector<1x16x16x384xbf16> to vector<256x384xbf16>
    %c0_71 = arith.constant 0 : index
    %c0_72 = arith.constant 0 : index
    %c0_73 = arith.constant 0 : index
    %45 = vector.load %arg4[%c0_71, %c0_72, %c0_73] : memref<3x384x128xbf16, #tpu.memory_space<vmem>>, vector<1x384x128xbf16>
    %46 = vector.shape_cast %45 : vector<1x384x128xbf16> to vector<384x128xbf16>
    %cst_74 = arith.constant dense<0.000000e+00> : vector<256x128xf32>
    %47 = tpu.matmul %44, %46, %cst_74 {dimension_numbers = #tpu.dot_dimension_numbers<[1], [0], [0], [1], [0, 0, 1, 1], [], []>} : vector<256x384xbf16>, vector<384x128xbf16>, vector<256x128xf32> -> vector<256x128xf32>
    %c0_75 = arith.constant 0 : index
    %c1_76 = arith.constant 1 : index
    %c0_77 = arith.constant 0 : index
    %c0_78 = arith.constant 0 : index
    %48 = vector.load %arg7[%c0_75, %c1_76, %c0_77, %c0_78] : memref<1x18x16x384xbf16, #tpu.memory_space<vmem>>, vector<1x16x16x384xbf16>
    %49 = vector.shape_cast %48 : vector<1x16x16x384xbf16> to vector<256x384xbf16>
    %c1_79 = arith.constant 1 : index
    %c0_80 = arith.constant 0 : index
    %c0_81 = arith.constant 0 : index
    %50 = vector.load %arg4[%c1_79, %c0_80, %c0_81] : memref<3x384x128xbf16, #tpu.memory_space<vmem>>, vector<1x384x128xbf16>
    %51 = vector.shape_cast %50 : vector<1x384x128xbf16> to vector<384x128xbf16>
    %cst_82 = arith.constant dense<0.000000e+00> : vector<256x128xf32>
    %52 = tpu.matmul %49, %51, %cst_82 {dimension_numbers = #tpu.dot_dimension_numbers<[1], [0], [0], [1], [0, 0, 1, 1], [], []>} : vector<256x384xbf16>, vector<384x128xbf16>, vector<256x128xf32> -> vector<256x128xf32>
    %53 = arith.addf %47, %52 : vector<256x128xf32>
    %c0_83 = arith.constant 0 : index
    %c2_84 = arith.constant 2 : index
    %c0_85 = arith.constant 0 : index
    %c0_86 = arith.constant 0 : index
    %54 = vector.load %arg7[%c0_83, %c2_84, %c0_85, %c0_86] : memref<1x18x16x384xbf16, #tpu.memory_space<vmem>>, vector<1x16x16x384xbf16>
    %55 = vector.shape_cast %54 : vector<1x16x16x384xbf16> to vector<256x384xbf16>
    %c2_87 = arith.constant 2 : index
    %c0_88 = arith.constant 0 : index
    %c0_89 = arith.constant 0 : index
    %56 = vector.load %arg4[%c2_87, %c0_88, %c0_89] : memref<3x384x128xbf16, #tpu.memory_space<vmem>>, vector<1x384x128xbf16>
    %57 = vector.shape_cast %56 : vector<1x384x128xbf16> to vector<384x128xbf16>
    %cst_90 = arith.constant dense<0.000000e+00> : vector<256x128xf32>
    %58 = tpu.matmul %55, %57, %cst_90 {dimension_numbers = #tpu.dot_dimension_numbers<[1], [0], [0], [1], [0, 0, 1, 1], [], []>} : vector<256x384xbf16>, vector<384x128xbf16>, vector<256x128xf32> -> vector<256x128xf32>
    %59 = arith.addf %53, %58 : vector<256x128xf32>
    %c0_91 = arith.constant 0 : index
    %c0_92 = arith.constant 0 : index
    %60 = vector.load %arg5[%c0_91, %c0_92] : memref<1x128xf32, #tpu.memory_space<vmem>>, vector<1x128xf32>
    %61 = vector.broadcast %60 : vector<1x128xf32> to vector<256x128xf32>
    %62 = arith.addf %59, %61 : vector<256x128xf32>
    %63 = vector.shape_cast %8 : vector<1x16x16x128xbf16> to vector<256x128xbf16>
    %64 = arith.extf %63 : vector<256x128xbf16> to vector<256x128xf32>
    %65 = arith.addf %62, %64 : vector<256x128xf32>
    %cst_93 = arith.constant 0.000000e+00 : f32
    %66 = vector.broadcast %cst_93 : f32 to vector<256x128xf32>
    %67 = arith.maximumf %65, %66 : vector<256x128xf32>
    %68 = vector.shape_cast %67 : vector<256x128xf32> to vector<1x16x16x128xf32>
    %c0_94 = arith.constant 0 : index
    %c0_95 = arith.constant 0 : index
    %c0_96 = arith.constant 0 : index
    %c0_97 = arith.constant 0 : index
    %69 = vector.load %arg6[%c0_94, %c0_95, %c0_96, %c0_97] : memref<1x16x16x128xf32, #tpu.memory_space<vmem>>, vector<1x16x16x128xf32>
    tpu.vector_store %arg6[%c0_94, %c0_95, %c0_96, %c0_97], %68 {strides = array<i32>} : memref<1x16x16x128xf32, #tpu.memory_space<vmem>>, vector<1x16x16x128xf32>,
    return
  }
  func.func @transform_0(%arg0: i32) -> (i32, i32, i32, i32) {
    %c0_i32 = arith.constant 0 : i32
    %c0_i32_0 = arith.constant 0 : i32
    %c0_i32_1 = arith.constant 0 : i32
    %c0_i32_2 = arith.constant 0 : i32
    return %arg0, %c0_i32, %c0_i32_0, %c0_i32_1 : i32, i32, i32, i32
  }
  func.func @transform_1(%arg0: i32) -> (i32, i32, i32) {
    %c0_i32 = arith.constant 0 : i32
    %c0_i32_0 = arith.constant 0 : i32
    %c0_i32_1 = arith.constant 0 : i32
    %c0_i32_2 = arith.constant 0 : i32
    return %c0_i32, %c0_i32_0, %c0_i32_1 : i32, i32, i32
  }
  func.func @transform_2(%arg0: i32) -> (i32, i32) {
    %c0_i32 = arith.constant 0 : i32
    %c0_i32_0 = arith.constant 0 : i32
    %c0_i32_1 = arith.constant 0 : i32
    return %c0_i32, %c0_i32_0 : i32, i32
  }
  func.func @transform_3(%arg0: i32) -> (i32, i32, i32) {
    %c0_i32 = arith.constant 0 : i32
    %c0_i32_0 = arith.constant 0 : i32
    %c0_i32_1 = arith.constant 0 : i32
    %c0_i32_2 = arith.constant 0 : i32
    return %c0_i32, %c0_i32_0, %c0_i32_1 : i32, i32, i32
  }
  func.func @transform_4(%arg0: i32) -> (i32, i32) {
    %c0_i32 = arith.constant 0 : i32
    %c0_i32_0 = arith.constant 0 : i32
    %c0_i32_1 = arith.constant 0 : i32
    return %c0_i32, %c0_i32_0 : i32, i32
  }
  func.func @transform_5(%arg0: i32) -> (i32, i32, i32, i32) {
    %c0_i32 = arith.constant 0 : i32
    %c0_i32_0 = arith.constant 0 : i32
    %c0_i32_1 = arith.constant 0 : i32
    %c0_i32_2 = arith.constant 0 : i32
    return %arg0, %c0_i32, %c0_i32_0, %c0_i32_1 : i32, i32, i32, i32
  }
}

</mosaic_0001>

<bundles_post_ra>
// kernel: tpu_custom_call.1
= control target key start
LH: loop header
LB: loop body
LE: loop exit
PB: predicated region body
PF: predicated region fallthrough
CT: control target
= control target key end

     0   :  { %10 = vsyncpa [#allocation4], 0  ;;  %s11713_s0 = inlined_call_operand.hbm [shape: bf16[2,16,16,128], index: 0, kind: input, shape index: {}]   ;;  %s11714_s1 = inlined_call_operand.hbm [shape: bf16[3,384,128], index: 1, kind: input, shape index: {}]   ;;  %s11715_s2 = inlined_call_operand.vmem [shape: f32[1,128], index: 2, kind: input, shape index: {}]   ;;  %s11716_s3 = inlined_call_operand.hbm [shape: bf16[3,384,128], index: 3, kind: input, shape index: {}]   ;;  %s11717_s4 = inlined_call_operand.vmem [shape: f32[1,128], index: 4, kind: input, shape index: {}]   ;;  %s11718_s5 = inlined_call_operand.hbm [shape: f32[2,16,16,128], index: 5, kind: output, shape index: {}]  }
   0x1   :  { %12 = vsyncpa [#allocation4 + $0x1], 0 }
   0x2   :  { %13 = vsyncpa [#allocation7], 0 }
   0x3   :  { %14 = vsyncpa [#allocation5], 0 }
   0x4   :  { %16 = vsyncpa [#allocation5 + $0x1], 0  ;;  %s9539_s18 = smov 0   ;;  %s9541_s19 = smov 0  }
   0x5   :  { %s9543_s20 = smov 0   ;;  %s9545_s21 = smov 0  }
   0x6 LB: > { %s9560_s22 = sadd.s32 4294967295, %s9498_s21   ;;  %s7219_s23 = sadd.s32 4294967294, %s9498_s21   ;;  %s9498_s21 = sphi %s9545_s21, %s11951_s21   ;;  %s9494_s20 = sphi %s9543_s20, %s11950_s20   ;;  %s9490_s19 = sphi %s9541_s19, %s11949_s19   ;;  %s9486_s18 = sphi %s9539_s18, %s11948_s18  }
   0x7   : > { %p42_p0 = scmp.ne.s32.totalorder %s9490_s19, %s9486_s18  ;;  %p11719_p1 = scmp.eq.s32.totalorder %s9560_s22, 0 }
   0x8   : > { %p150_p2 = scmp.eq.s32.totalorder %s9560_s22, 1  ;;  %p156_p3 = scmp.eq.s32.totalorder %s7219_s23, 1 }
   0x9   : > { %p9569_p4 = por %p11719_p1, %p42_p0  ;;  %p7220_p5 = scmp.ge.s32.totalorder %s9498_s21, 1 }
   0xa   : > { %p9574_p6 = por %p156_p3, %p42_p0  ;;  %p163_p7 = scmp.lt.s32.totalorder %s9498_s21, 3 }
   0xb   : > { %s11786_s24 = scalar_select %p9569_p4, 1, 0 }
   0xc   : > { %s11787_s25 = scalar_select %p9574_p6, 1, 0 }
   0xd   : > { %p9579_p8 = pnand %p7220_p5, %p163_p7  ;;  %s9500_s27 = smov [#allocation6]  }
   0xe   : > { %s175_s28 = sshll.u32 %s9500_s27, 4  ;;  %s9501_s30 = smov [#allocation8]   ;;  %s176_s28 = int_to_ptr.vmem [resolvable:$true] %s175_s28 }
   0xf   : > { %s11788_s26 = scalar_select %p9579_p8, 1, 0 }
  0x10   : > { %p8853_p9 = pneg %p9579_p8  ;;  %s191_s6 = sshll.u32 %s9501_s30, 4  ;;  %s192_s6 = int_to_ptr.vmem [resolvable:$true] %s191_s6 }
  0x11   : > { %s9361_s7 = scalar_lea.vmem %s176_s28, 9216  ;;  %p9369_p5 = scmp.lt.s32.totalorder %s176_s28, %s176_s28 }
  0x12   : > { %p9588_p11 = pnand %p8853_p9, %p11719_p1  ;;  %p9362_p13 = scmp.ne.s32.totalorder %s176_s28, %s9361_s7 }
  0x13   : > { %p9370_p7 = scmp.lt.s32.totalorder %s9361_s7, %s9361_s7 }
  0x14   : > { %p9352_p12 = pneg %p9588_p11 }
  0x15   : > { %p9371_p10 = por %p9370_p7, %p9369_p5 }
  0x16   : > { %p9364_p0 = pnand %p9362_p13, %p9352_p12 }
  0x18   : > { %p9365_p3 = pneg %p9364_p0 }
  0x1a   : > { %p9372_p9 = pnand %p9371_p10, %p9365_p3 }
  0x1c   : > { %9375 = shalt.err (!%p9372_p9)
}
  0x1d   : > { %s11720_s8 = smov 64   ;;  %s9503_s9 = smov 4  }
  0x1e   : > { %8856 = dma.hbm_to_vmem [thread:$0]  (!%p9588_p11), %s11714_s1, 9216, %s176_s28, [#allocation7], %s11720_s8, %s11720_s8, %s9503_s9  }
  0x1f   : > { %s9387_s12 = scalar_lea.vmem %s192_s6, 9216  ;;  %p9395_p10 = scmp.lt.s32.totalorder %s192_s6, %s192_s6 }
  0x20   : > { %p9388_p13 = scmp.ne.s32.totalorder %s192_s6, %s9387_s12  ;;  %p9396_p3 = scmp.lt.s32.totalorder %s9387_s12, %s9387_s12 }
  0x22   : > { %p9390_p0 = pnand %p9388_p13, %p9352_p12  ;;  %p9397_p7 = por %p9396_p3, %p9395_p10 }
  0x24   : > { %p9391_p5 = pneg %p9390_p0 }
  0x26   : > { %p9398_p9 = pnand %p9397_p7, %p9391_p5 }
  0x28   : > { %9401 = shalt.err (!%p9398_p9)
}
  0x29   : > { %8859 = dma.hbm_to_vmem [thread:$0]  (!%p9588_p11), %s11716_s3, 9216, %s192_s6, [#allocation7], %s11720_s8, %s11720_s8, %s9503_s9  }
  0x2a   : > { %s9617_s15 = sadd.s32 1, %s9498_s21   ;;  %s29_s16 = sadd.s32 1, %s9494_s20 }
  0x2b   : > { %s26_s17 = ssub.s32 %s9498_s21, %s9617_s15  ;;  %p36_p12 = scmp.ne.s32.totalorder %s9494_s20, %s9490_s19 }
  0x2c   : > { %p27_p13 = scmp.eq.s32.totalorder %s26_s17, 0  ;;  %p37_p0 = scmp.eq.s32.totalorder %s9498_s21, 0 }
  0x2d   : > { %p9627_p5 = por %p150_p2, %p36_p12  ;;  %p8870_p10 = scmp.lt.s32.totalorder %s9498_s21, 2 }
  0x2e   : > { %s9633_s27 = scalar_select %p27_p13, %s9494_s20, %s29_s16  }
  0x2f   : > { %s11790_s23 = scalar_select %p9627_p5, 1, 0 }
  0x30   : > { %p38_p3 = por %p37_p0, %p36_p12  ;;  %s208_s28 = sand.u32 1, %s9494_s20  }
  0x31   : > { %s7224_s29 = sshll.u32 %s208_s28, 7  ;;  %s7703_s30 = sshll.u32 %s9498_s21, 11 }
  0x32   : > { %s9640_s10 = scalar_lea.hbm %s11713_s0, %s7703_s30  ;;  %s212_s11 = scalar_lea.vmem [#allocation3], %s7224_s29 }
  0x33   : > { %s219_s12 = sshll.u32 %s212_s11, 4  ;;  %p9644_p2 = pnand %p8870_p10, %p38_p3  ;;  %s9642_s12 = int_to_ptr.vmem [resolvable:$true] %s219_s12 }
  0x34   : > { %s9648_s14 = scalar_lea.sflag [#allocation4], %s208_s28  ;;  %s9402_s16 = scalar_lea.hbm %s9640_s10, 2048 }
  0x35   : > { %p9403_p11 = scmp.ne.s32.totalorder %s9640_s10, %s9402_s16  ;;  %p9404_p7 = pneg %p9644_p2 }
  0x36   : > { %s9407_s29 = scalar_lea.hbm %s11713_s0, 4096  ;;  %p9408_p13 = scmp.lt.s32.totalorder %s9640_s10, %s11713_s0 }
  0x37   : > { %p9405_p9 = pnand %p9404_p7, %p9403_p11  ;;  %p9409_p0 = scmp.lt.s32.totalorder %s9407_s29, %s9402_s16 }
  0x39   : > { %p9406_p12 = pneg %p9405_p9  ;;  %p9410_p10 = por %p9409_p0, %p9408_p13 }
  0x3b   : > { %p9411_p3 = pnand %p9410_p10, %p9406_p12 }
  0x3d   : > { %9414 = shalt.err (!%p9411_p3)
}
  0x3e   : > { %s9415_s28 = scalar_lea.vmem %s9642_s12, 2048  ;;  %s9504_s11 = smov [#allocation3]  }
  0x3f   : > { %p9416_p1 = scmp.ne.s32.totalorder %s9642_s12, %s9415_s28  ;;  %s9420_s8 = sshll.u32 %s9504_s11, 4  ;;  %s9421_s8 = int_to_ptr.vmem [resolvable:$false] %s9420_s8 }
  0x40   : > { %s9422_s17 = scalar_lea.vmem %s9421_s8, 4096  ;;  %p9423_p9 = scmp.lt.s32.totalorder %s9642_s12, %s9421_s8 }
  0x41   : > { %p9418_p6 = pnand %p9416_p1, %p9404_p7  ;;  %p9424_p5 = scmp.lt.s32.totalorder %s9422_s17, %s9415_s28 }
  0x43   : > { %p9419_p11 = pneg %p9418_p6  ;;  %p9425_p4 = por %p9424_p5, %p9423_p9 }
  0x45   : > { %p9426_p8 = pnand %p9425_p4, %p9419_p11 }
  0x47   : > { %9429 = shalt.err (!%p9426_p8)
}
  0x48   : > { %s11792_s16 = smov 64   ;;  %p11793_p1 = scmp.ne.s32.totalorder %s11788_s26, 0 }
  0x49   : > { %8863 = dma.hbm_to_vmem [thread:$0]  (!%p9644_p2), %s9640_s10, 2048, %s9642_s12, %s9648_s14, %s11792_s16, %s11792_s16, %s9503_s9  }
  0x4a   : > { %231 = sbr.rel (%p11793_p1) target bundleno = 1134 (0x46e), region = 40 }
  0x4f   : > { %s9675_s30 = sand.u32 1, %s9490_s19   ;;  %p11794_p4 = scmp.ne.s32.totalorder %s11786_s24, 0 }
  0x50   : > { %s7228_s8 = sshll.u32 %s9675_s30, 7  ;;  %s234_s29 = scalar_lea.sflag [#allocation4], %s9675_s30 }
  0x51   : > { %s9679_s6 = scalar_lea.vmem [#allocation3], %s7228_s8 }
  0x52   : > { %9473 = dma.done.wait (%p11794_p4), %s234_s29, 2048  }
  0x53   : > { %9475 = vsyncadd (%p11794_p4), %s234_s29, 4294965248  ;;  %p11795_p6 = scmp.eq.s32.totalorder %s9560_s22, 0 }
  0x55   : > { %9477 = dma.done.wait (%p11795_p6), [#allocation7], 18432   ;;  %p11796_p8 = pmov %p11795_p6 }
  0x56   : > { %v8913_v0 = vld [vmem:[#allocation6 + $0x138] sm:$0xff]   ;;  %v8916_v3 = vld [vmem:[#allocation6 + $0x130] sm:$0xff]   ;;  %vm284_vm0 = vsmask.f32 256  ;;  %v8919_v6 = vld [vmem:[#allocation6 + $0x128] sm:$0xff]   ;;  %vm283_vm1 = vcmask 1040384  }
  0x57   : > { %9479 = vsyncadd (%p11796_p8), [#allocation7], 4294948864  ;;  %v8914_v1 = vld [vmem:[#allocation6 + $0x178] sm:$0xff]   ;;  %7737 = vmatprep.subr.bf16.mxu0 %v8913_v0  ;;  %v8917_v4 = vld [vmem:[#allocation6 + $0x170] sm:$0xff]   ;;  %v9505_v14 = vmov 0   ;;  %vm334_vm4 = vcmask 1043459  }
  0x58   : > { %v8915_v2 = vld [vmem:[#allocation6 + $0xf8] sm:$0xff]   ;;  %8553 = vmatprep.subr.bf16.mxu1 %v8914_v1  ;;  %v8918_v5 = vld [vmem:[#allocation6 + $0xf0] sm:$0xff]   ;;  %v8920_v7 = vld [vmem:[#allocation6 + $0x168] sm:$0xff]   ;;  %273 = vst [vmem:[#allocation2] sm:$0xff] %v9505_v14  ;;  %vm335_vm3 = vsmask.f32 7950 }
  0x59   : > { %7738 = vmatpush3.bf16.msra.mxu0 %v8915_v2  ;;  %8554 = vmatpush3.bf16.msra.mxu1 %v8914_v1  ;;  %v8921_v8 = vld [vmem:[#allocation6 + $0xe8] sm:$0xff]   ;;  %v8922_v9 = vld [vmem:[#allocation6 + $0x120] sm:$0xff]   ;;  %v8925_v12 = vld [vmem:[#allocation6 + $0x118] sm:$0xff]   ;;  %274 = vst [vmem:[#allocation2 + $0x8] sm:$0xf] %v9505_v14  ;;  %vm707_vm10 = vcmask 1043456  }
  0x5a   : > { %7739 = vmatprep.subr.bf16.mxu0 %v8916_v3  ;;  %8555 = vmatprep.subr.bf16.mxu1 %v8917_v4  ;;  %v8923_v10 = vld [vmem:[#allocation6 + $0x160] sm:$0xff]   ;;  %v8926_v13 = vld [vmem:[#allocation6 + $0x158] sm:$0xff]   ;;  %276 = vst [vmem:[#allocation2 + $0x14] sm:$0xf] %v9505_v14  ;;  %279 = vst [vmem:[#allocation2 + $0x1a0] sm:$0xf] %v9505_v14 }
  0x5b   : > { %v8924_v11 = vld [vmem:[#allocation6 + $0xe0] sm:$0xff]   ;;  %281 = vst [vmem:[#allocation2 + $0x1ac] sm:$0xf] %v9505_v14  ;;  %vm9690_vm2 = vmand %vm283_vm1, %vm284_vm0  ;;  %v8927_v16 = vld [vmem:[#allocation6 + $0xd8] sm:$0xff]   ;;  %vm417_vm5 = vsmask.f32 4368 }
  0x5c   : > { %v8928_v17 = vld [vmem:[#allocation6 + $0x110] sm:$0xff]   ;;  %vm9694_vm6 = vmand %vm334_vm4, %vm335_vm3  ;;  %vm806_vm7 = vsmask.f32 3328  ;;  %vm807_vm8 = vsmask.f32 7440  ;;  %v8931_v21 = vld [vmem:[#allocation6 + $0x108] sm:$0xff]  }
  0x5d   : > { %7740 = vmatpush3.bf16.msra.mxu0 %v8918_v5  ;;  %8556 = vmatpush3.bf16.msra.mxu1 %v8917_v4  ;;  %v8929_v18 = vld [vmem:[#allocation6 + $0x150] sm:$0xff]   ;;  %vm708_vm9 = vsmask.f32 7938  ;;  %v8932_v22 = vld [vmem:[#allocation6 + $0x148] sm:$0xff]   ;;  %v8934_v24 = vld [vmem:[#allocation6 + $0x100] sm:$0xff]   ;;  %s7231_s14 = sshll.u32 %s9675_s30, 8 }
  0x5e   : > { %7741 = vmatprep.subr.bf16.mxu0 %v8919_v6  ;;  %8557 = vmatprep.subr.bf16.mxu1 %v8920_v7  ;;  %v8930_v20 = vld [vmem:[#allocation6 + $0xd0] sm:$0xff]   ;;  %v8933_v23 = vld [vmem:[#allocation6 + $0xc8] sm:$0xff]   ;;  %v8935_v25 = vld [vmem:[#allocation6 + $0x140] sm:$0xff]   ;;  %s11480_s7 = scalar_lea.vmem [#allocation9], %s7231_s14  ;;  %s7736_s28 = sshll.u32 %s9560_s22, 12 }
  0x5f   : > { %v286_v26 = vld [vmem:[#allocation2 + $0x18] sm:$0x1]  ;;  %v9699_v27 = vld [vmem:[%s9679_s6] sm:$0xf]  ;;  %v9702_v28 = vld [vmem:[%s9679_s6 + $0x4] sm:$0xf]  ;;  %s11667_s8 = scalar_lea.hbm %s11718_s5, %s7736_s28 }
  0x60   : > { %11801 = vst [vmem:[#allocation13_spill] sm:$0xff] %v9699_v27  ;;  %11802 = vst [vmem:[#allocation14_spill] sm:$0xff] %v9702_v28  ;;  %v287_v29 = vsel %vm9690_vm2, 0, %v286_v26  ;;  %v420_v30 = vshrl.u32 %v9699_v27, 16  ;;  %v423_v31 = vshll.u32 %v9699_v27, 16  ;;  %v428_v32 = vshrl.u32 %v9702_v28, 16 }
  0x61   : > { %7742 = vmatpush3.bf16.msra.mxu0 %v8921_v8  ;;  %8558 = vmatpush3.bf16.msra.mxu1 %v8920_v7  ;;  %774 = vst [vmem:[#allocation2 + $0x1c] sm:$0xf] %v9699_v27  ;;  %775 = vst [vmem:[#allocation2 + $0x28] sm:$0xf] %v9702_v28  ;;  %v337_v33 = vld [vmem:[#allocation2 + $0x2c] sm:$0x8] }
  0x62   : > { %7743 = vmatprep.subr.bf16.mxu0 %v8922_v9  ;;  %8559 = vmatprep.subr.bf16.mxu1 %v8923_v10  ;;  %v8936_v34 = vld [vmem:[#allocation6 + $0xc0] sm:$0xff]   ;;  %288 = vst [vmem:[#allocation2 + $0x18] sm:$0x1] %v287_v29  ;;  %v431_v35 = vshll.u32 %v9702_v28, 16  ;;  %v338_v36 = vsel %vm9694_vm6, 0, %v337_v33  ;;  %v422_v39 = vrot.slane %v420_v30, 7  ;;  %vm9723_vm11 = vmor %vm284_vm0, %vm417_vm5 }
  0x63   : > { %v340_v37 = vld [vmem:[#allocation2 + $0x44] sm:$0x8]  ;;  %v9715_v38 = vld [vmem:[%s9679_s6 + $0x8] sm:$0xf]  ;;  %v430_v40 = vrot.slane %v428_v32, 7  ;;  %v809_v41 = vrot.slane %v420_v30, 4  ;;  %vm9735_vm12 = vmor %vm806_vm7, %vm807_vm8 }
  0x64   : > { %11803 = vst [vmem:[#allocation15_spill] sm:$0xff] %v9715_v38  ;;  %339 = vst [vmem:[#allocation2 + $0x2c] sm:$0x8] %v338_v36  ;;  %v810_v42 = vrot.slane %v423_v31, 5  ;;  %v9718_v43 = vld [vmem:[%s9679_s6 + $0xc] sm:$0xf]  ;;  %v425_v49 = vor.u32 %v423_v31, %v422_v39 }
  0x65   : > { %7744 = vmatpush3.bf16.msra.mxu0 %v8924_v11  ;;  %8560 = vmatpush3.bf16.msra.mxu1 %v8923_v10  ;;  %11804 = vst [vmem:[#allocation16_spill] sm:$0xff] %v9718_v43  ;;  %776 = vst [vmem:[#allocation2 + $0x34] sm:$0xf] %v9715_v38  ;;  %v813_v45 = vrot.slane %v431_v35, 5  ;;  %v815_v46 = vrot.slane %v428_v32, 4  ;;  %v341_v47 = vsel %vm9694_vm6, 0, %v340_v37  ;;  %v433_v51 = vor.u32 %v431_v35, %v430_v40 }
  0x66   : > { %7745 = vmatprep.subr.bf16.mxu0 %v8925_v12  ;;  %8561 = vmatprep.subr.bf16.mxu1 %v8926_v13  ;;  %v436_v48 = vshrl.u32 %v9715_v38, 16  ;;  %777 = vst [vmem:[#allocation2 + $0x40] sm:$0xf] %v9718_v43  ;;  %v426_v50 = vrot.slane %v422_v39, 4  ;;  %v811_v52 = vor.u32 %v810_v42, %v809_v41  ;;  %342 = vst [vmem:[#allocation2 + $0x44] sm:$0x8] %v341_v47 }
  0x67   : > { %v9731_v53 = vld [vmem:[#allocation6 + $0xb8] sm:$0xff]   ;;  %v816_v55 = vor.u32 %v815_v46, %v813_v45  ;;  %v439_v56 = vshll.u32 %v9715_v38, 16  ;;  %v444_v57 = vshrl.u32 %v9718_v43, 16  ;;  %v447_v58 = vshll.u32 %v9718_v43, 16  ;;  %vm9746_vm13 = vmand %vm707_vm10, %vm708_vm9  ;;  %v289_v7 = vld [vmem:[#allocation2 + $0x30] sm:$0x1] }
  0x68   : > { %v8942_v59 = vld [vmem:[#allocation6 + $0x78] sm:$0xff]   ;;  %v434_v60 = vsel %vm9723_vm11, %v426_v50, %v433_v51  ;;  %v812_v62 = vrot.slane %v811_v52, 4  ;;  %v818_v63 = vrot.slane %v436_v48, 4  ;;  %vm9752_vm14 = vmand %vm707_vm10, %vm806_vm7  ;;  %v438_v8 = vrot.slane %v436_v48, 7  ;;  %v346_v35 = vld [vmem:[#allocation2 + $0x74] sm:$0x8] }
  0x69   : > { %7746 = vmatpush3.bf16.msra.mxu0 %v8927_v16  ;;  %8562 = vmatpush3.bf16.msra.mxu1 %v8926_v13  ;;  %713 = vst [vmem:[#allocation2 + $0x24] sm:$0xf] %v434_v60  ;;  %v817_v0 = vrot.slane %v816_v55, 4  ;;  %v819_v2 = vrot.slane %v439_v56, 5  ;;  %v822_v3 = vrot.slane %v447_v58, 5  ;;  %v824_v4 = vrot.slane %v444_v57, 4 }
  0x6a   : > { %7747 = vmatprep.subr.bf16.mxu0 %v8928_v17  ;;  %8563 = vmatprep.subr.bf16.mxu1 %v8929_v18  ;;  %v710_v5 = vld [vmem:[#allocation2 + $0x18] sm:$0xf]  ;;  %v814_v6 = vsel %vm9735_vm12, %v812_v62, %v813_v45  ;;  %v446_v9 = vrot.slane %v444_v57, 7  ;;  %v290_v14 = vsel %vm9690_vm2, 0, %v289_v7  ;;  %v343_v16 = vld [vmem:[#allocation2 + $0x5c] sm:$0x8] }
  0x6b   : > { %v711_v10 = vsel %vm9746_vm13, %v425_v49, %v710_v5  ;;  %985 = vst [vmem:[#allocation2 + $0x20] sm:$0xf] %v814_v6  ;;  %v987_v11 = vld [vmem:[#allocation2 + $0x2c] sm:$0xf]  ;;  %v820_v12 = vor.u32 %v819_v2, %v818_v63  ;;  %v825_v13 = vor.u32 %v824_v4, %v822_v3  ;;  %291 = vst [vmem:[#allocation2 + $0x30] sm:$0x1] %v290_v14 }
  0x6c   : > { %712 = vst [vmem:[#allocation2 + $0x18] sm:$0xf] %v711_v10  ;;  %v988_v17 = vsel %vm9752_vm14, %v817_v0, %v987_v11  ;;  %v344_v29 = vsel %vm9694_vm6, 0, %v343_v16  ;;  %v347_v40 = vsel %vm9694_vm6, 0, %v346_v35  ;;  %v9788_v41 = vld [vmem:[%s9679_s6 + $0x18] sm:$0xf] }
  0x6d   : > { %7748 = vmatpush3.bf16.msra.mxu0 %v8930_v20  ;;  %8564 = vmatpush3.bf16.msra.mxu1 %v8929_v18  ;;  %v441_v18 = vor.u32 %v439_v56, %v438_v8  ;;  %v442_v20 = vrot.slane %v438_v8, 4  ;;  %989 = vst [vmem:[#allocation2 + $0x2c] sm:$0xf] %v988_v17  ;;  %v991_v26 = vld [vmem:[#allocation2 + $0x44] sm:$0xf]  ;;  %11815 = vst [vmem:[#allocation19_spill] sm:$0xff] %v9788_v41 }
  0x6e   : > { %7749 = vmatprep.subr.bf16.mxu0 %v8931_v21  ;;  %8565 = vmatprep.subr.bf16.mxu1 %v8932_v22  ;;  %v449_v21 = vor.u32 %v447_v58, %v446_v9  ;;  %345 = vst [vmem:[#allocation2 + $0x5c] sm:$0x8] %v344_v29  ;;  %v9791_v42 = vld [vmem:[%s9679_s6 + $0x1c] sm:$0xf]  ;;  %348 = vst [vmem:[#allocation2 + $0x74] sm:$0x8] %v347_v40 }
  0x6f   : > { %11816 = vst [vmem:[#allocation20_spill] sm:$0xff] %v9791_v42  ;;  %v468_v49 = vshrl.u32 %v9788_v41, 16  ;;  %780 = vst [vmem:[#allocation2 + $0x64] sm:$0xf] %v9788_v41  ;;  %v471_v50 = vshll.u32 %v9788_v41, 16  ;;  %v476_v51 = vshrl.u32 %v9791_v42, 16 }
  0x70   : > { %v450_v31 = vsel %vm9723_vm11, %v442_v20, %v449_v21  ;;  %v1164_v45 = vld [vmem:[#allocation2 + $0x24] sm:$0xff]  ;;  %781 = vst [vmem:[#allocation2 + $0x70] sm:$0xf] %v9791_v42  ;;  %v479_v52 = vshll.u32 %v9791_v42, 16  ;;  %v9826_v35 = vld [vmem:[%s9679_s6 + $0x20] sm:$0xf] }
  0x71   : > { %7750 = vmatpush3.bf16.msra.mxu0 %v8933_v23  ;;  %8566 = vmatpush3.bf16.msra.mxu1 %v8932_v22  ;;  %v9766_v22 = vld [vmem:[%s9679_s6 + $0x10] sm:$0xf]  ;;  %v9769_v23 = vld [vmem:[%s9679_s6 + $0x14] sm:$0xf]  ;;  %717 = vst [vmem:[#allocation2 + $0x3c] sm:$0xf] %v450_v31 }
  0x72   : > { %7751 = vmatprep.subr.bf16.mxu0 %v8934_v24  ;;  %8567 = vmatprep.subr.bf16.mxu1 %v8935_v25  ;;  %11813 = vst [vmem:[#allocation17_spill] sm:$0xff] %v9766_v22  ;;  %11814 = vst [vmem:[#allocation18_spill] sm:$0xff] %v9769_v23  ;;  %v821_v24 = vrot.slane %v820_v12, 4  ;;  %v452_v30 = vshrl.u32 %v9766_v22, 16  ;;  %v455_v32 = vshll.u32 %v9766_v22, 16  ;;  %v460_v33 = vshrl.u32 %v9769_v23, 16 }
  0x73   : > { %778 = vst [vmem:[#allocation2 + $0x4c] sm:$0xf] %v9766_v22  ;;  %779 = vst [vmem:[#allocation2 + $0x58] sm:$0xf] %v9769_v23  ;;  %v836_v58 = vrot.slane %v468_v49, 4  ;;  %v8956_v60 = vld [vmem:[#allocation6 + $0xb0] sm:$0xff]  }
  0x74   : > { %v823_v36 = vsel %vm9735_vm12, %v821_v24, %v822_v3  ;;  %v827_v39 = vrot.slane %v452_v30, 4  ;;  %v828_v46 = vrot.slane %v455_v32, 5  ;;  %v833_v48 = vrot.slane %v460_v33, 4  ;;  %v1162_v62 = vld [vmem:[#allocation2 + $0x18] sm:$0xff]  ;;  %v714_v0 = vld [vmem:[#allocation2 + $0x30] sm:$0xf] }
  0x75   : > { %7752 = vmatpush3.bf16.msra.mxu0 %v8936_v34  ;;  %8568 = vmatpush3.bf16.msra.mxu1 %v8935_v25  ;;  %v826_v25 = vrot.slane %v825_v13, 4  ;;  %v463_v34 = vshll.u32 %v9769_v23, 16  ;;  %990 = vst [vmem:[#allocation2 + $0x38] sm:$0xf] %v823_v36  ;;  %v9801_v55 = vrot.slane %v452_v30, 7  ;;  %v837_v2 = vrot.slane %v471_v50, 5 }
  0x76   : > { %8601 = vmatprep.subr.bf16.mxu0 %v9731_v53  ;;  %7873 = vmatprep.subr.bf16.mxu1 %v8942_v59  ;;  %v829_v56 = vor.u32 %v828_v46, %v827_v39  ;;  %v462_v59 = vrot.slane %v460_v33, 7  ;;  %v8937_v63 = vld [vmem:[#allocation2 + $0x1c] ss:$12 sps:$4 sm:$0xff]   ;;  %v8939_v3 = vld [vmem:[#allocation2 + $0x20] ss:$12 sps:$4 sm:$0xff]   ;;  %v7232_v4 = vcombine.low %v1162_v62, %v1164_v45  ;;  %v715_v6 = vsel %vm9746_vm13, %v441_v18, %v714_v0  ;;  %v9156_v42 = vld [vmem:[#allocation8 + $0x140] sm:$0xff]  }
  0x77   : > { %v992_v37 = vsel %vm9752_vm14, %v826_v25, %v991_v26  ;;  %v831_v47 = vrot.slane %v463_v34, 5  ;;  %v8943_v5 = vld [vmem:[#allocation6 + $0x38] sm:$0xff]   ;;  %1707 = vmatprep.mubr.bf16.mxu0 %v8937_v63  ;;  %716 = vst [vmem:[#allocation2 + $0x30] sm:$0xf] %v715_v6  ;;  %v995_v9 = vld [vmem:[#allocation2 + $0x5c] sm:$0xf]  ;;  %v838_v10 = vor.u32 %v837_v2, %v836_v58  ;;  %8569 = vmatprep.mubr.bf16.mxu1 %v8939_v3 }
  0x78   : > { %993 = vst [vmem:[#allocation2 + $0x44] sm:$0xf] %v992_v37  ;;  %v830_v7 = vrot.slane %v829_v56, 4  ;;  %v840_v11 = vrot.slane %v479_v52, 5  ;;  %v842_v12 = vrot.slane %v476_v51, 4  ;;  %v8949_v13 = vld [vmem:[#allocation6 + $0x70] sm:$0xff]   ;;  %v465_v14 = vor.u32 %v463_v34, %v462_v59  ;;  %1708 = vmatmul.mubr.bf16.vlgmr.msra.gmra.mxu0 %v7232_v4 }
  0x79   : > { %v834_v57 = vor.u32 %v833_v48, %v831_v47  ;;  %v292_v18 = vld [vmem:[#allocation2 + $0x48] sm:$0x1]  ;;  %v458_v20 = vrot.slane %v9801_v55, 4  ;;  %8602 = vmatpush3.bf16.msra.mxu0 %v9731_v53  ;;  %v839_v25 = vrot.slane %v838_v10, 4  ;;  %v999_v26 = vld [vmem:[#allocation2 + $0x74] sm:$0xf]  ;;  %v457_v0 = vor.u32 %v455_v32, %v9801_v55 }
  0x7a   : > { %v832_v16 = vsel %vm9735_vm12, %v830_v7, %v831_v47  ;;  %v843_v24 = vor.u32 %v842_v12, %v840_v11  ;;  %v8950_v29 = vld [vmem:[#allocation6 + $0x30] sm:$0xff]   ;;  %v293_v30 = vsel %vm9690_vm2, 0, %v292_v18  ;;  %v349_v33 = vld [vmem:[#allocation2 + $0x8c] sm:$0x8]  ;;  %8603 = vmatprep.subr.bf16.mxu0 %v8956_v60  ;;  %11817 = vst [vmem:[#allocation21_spill] sm:$0xff] %v9826_v35  ;;  %v484_v39 = vshrl.u32 %v9826_v35, 16 }
  0x7b   : > { %v835_v8 = vrot.slane %v834_v57, 4  ;;  %994 = vst [vmem:[#allocation2 + $0x50] sm:$0xf] %v832_v16  ;;  %v466_v31 = vsel %vm9723_vm11, %v458_v20, %v465_v14  ;;  %294 = vst [vmem:[#allocation2 + $0x48] sm:$0x1] %v293_v30  ;;  %v350_v53 = vsel %vm9694_vm6, 0, %v349_v33  ;;  %v841_v37 = vsel %vm9735_vm12, %v839_v25, %v840_v11 }
  0x7c   : > { %v844_v34 = vrot.slane %v843_v24, 4  ;;  %721 = vst [vmem:[#allocation2 + $0x54] sm:$0xf] %v466_v31  ;;  %v9829_v36 = vld [vmem:[%s9679_s6 + $0x24] sm:$0xf]  ;;  %v487_v40 = vshll.u32 %v9826_v35, 16 }
  0x7d   : > { %v996_v17 = vsel %vm9752_vm14, %v835_v8, %v995_v9  ;;  %11818 = vst [vmem:[#allocation22_spill] sm:$0xff] %v9829_v36  ;;  %351 = vst [vmem:[#allocation2 + $0x8c] sm:$0x8] %v350_v53  ;;  %v492_v45 = vshrl.u32 %v9829_v36, 16  ;;  %v352_v46 = vld [vmem:[#allocation2 + $0xa4] sm:$0x8]  ;;  %8604 = vmatpush3.bf16.msra.mxu0 %v8956_v60 }
  0x7e   : > { %997 = vst [vmem:[#allocation2 + $0x5c] sm:$0xf] %v996_v17  ;;  %782 = vst [vmem:[#allocation2 + $0x7c] sm:$0xf] %v9826_v35  ;;  %v8957_v47 = vld [vmem:[#allocation6 + $0x68] sm:$0xff]   ;;  %v1000_v48 = vsel %vm9752_vm14, %v844_v34, %v999_v26  ;;  %v495_v56 = vshll.u32 %v9829_v36, 16 }
  0x7f   : > { %v8940_v21 = vld [vmem:[#allocation2 + $0x38] ss:$12 sps:$4 sm:$0xff]   ;;  %783 = vst [vmem:[#allocation2 + $0x88] sm:$0xf] %v9829_v36  ;;  %998 = vst [vmem:[#allocation2 + $0x68] sm:$0xf] %v841_v37 }
  0x80   : > { %8570 = vmatmul.mubr.bf16.vlgmr.msra.gmra.mxu1 %v8940_v21  ;;  %v353_v57 = vsel %vm9694_vm6, 0, %v352_v46  ;;  %v9844_v58 = vld [vmem:[%s9679_s6 + $0x28] sm:$0xf]  ;;  %v9847_v59 = vld [vmem:[%s9679_s6 + $0x2c] sm:$0xf]  ;;  %v845_v2 = vrot.slane %v484_v39, 4 }
  0x81   : > { %7874 = vmatpush3.bf16.msra.mxu1 %v8943_v5  ;;  %11819 = vst [vmem:[#allocation23_spill] sm:$0xff] %v9844_v58  ;;  %11820 = vst [vmem:[#allocation24_spill] sm:$0xff] %v9847_v59  ;;  %v8944_v62 = vld [vmem:[#allocation2 + $0x34] ss:$12 sps:$4 sm:$0xff]   ;;  %v8947_v63 = vld [vmem:[#allocation2 + $0x30] ss:$12 sps:$4 sm:$0xff]  }
  0x82   : > { %7875 = vmatprep.subr.bf16.mxu1 %v8949_v13  ;;  %1001 = vst [vmem:[#allocation2 + $0x74] sm:$0xf] %v1000_v48  ;;  %354 = vst [vmem:[#allocation2 + $0xa4] sm:$0x8] %v353_v57  ;;  %v8958_v3 = vld [vmem:[#allocation6 + $0x28] sm:$0xff]   ;;  %v846_v4 = vrot.slane %v487_v40, 5  ;;  %1715 = vmatprep.mubr.bf16.mxu0 %v8944_v62 }
  0x83   : > { %784 = vst [vmem:[#allocation2 + $0x94] sm:$0xf] %v9844_v58  ;;  %785 = vst [vmem:[#allocation2 + $0xa0] sm:$0xf] %v9847_v59  ;;  %v849_v60 = vrot.slane %v495_v56, 5  ;;  %v851_v5 = vrot.slane %v492_v45, 4  ;;  %1716 = vmatmul.mubr.bf16.gmra.mxu0 %v8947_v63 }
  0x84   : > { %v500_v32 = vshrl.u32 %v9844_v58, 16  ;;  %v8964_v55 = vld [vmem:[#allocation6 + $0x60] sm:$0xff]   ;;  %v847_v7 = vor.u32 %v846_v4, %v845_v2  ;;  %v503_v9 = vshll.u32 %v9844_v58, 16  ;;  %v508_v10 = vshrl.u32 %v9847_v59, 16  ;;  %v718_v11 = vld [vmem:[#allocation2 + $0x48] sm:$0xf] }
  0x85   : > { %v8946_v6 = vld [vmem:[#allocation2 + $0x50] ss:$12 sps:$4 sm:$0xff]   ;;  %7876 = vmatpush3.bf16.msra.mxu1 %v8950_v29  ;;  %v852_v8 = vor.u32 %v851_v5, %v849_v60  ;;  %v511_v12 = vshll.u32 %v9847_v59, 16  ;;  %v470_v14 = vrot.slane %v468_v49, 7  ;;  %v719_v16 = vsel %vm9746_vm13, %v457_v0, %v718_v11  ;;  %v1003_v20 = vld [vmem:[#allocation2 + $0x8c] sm:$0xf] }
  0x86   : > { %7877 = vmatprep.subr.bf16.mxu1 %v8957_v47  ;;  %8573 = vmatprep.mubr.bf16.mxu1 %v8946_v6  ;;  %v854_v13 = vrot.slane %v500_v32, 4  ;;  %v848_v17 = vrot.slane %v847_v7, 4  ;;  %v855_v21 = vrot.slane %v503_v9, 5  ;;  %v8965_v24 = vld [vmem:[#allocation6 + $0x20] sm:$0xff]   ;;  %720 = vst [vmem:[#allocation2 + $0x48] sm:$0xf] %v719_v16 }
  0x87   : > { %v853_v18 = vrot.slane %v852_v8, 4  ;;  %v858_v25 = vrot.slane %v511_v12, 5  ;;  %v860_v26 = vrot.slane %v508_v10, 4  ;;  %v295_v53 = vld [vmem:[#allocation2 + $0x60] sm:$0x1]  ;;  %v474_v47 = vrot.slane %v470_v14, 4 }
  0x88   : > { %v850_v49 = vsel %vm9735_vm12, %v848_v17, %v849_v60  ;;  %v856_v31 = vor.u32 %v855_v21, %v854_v13  ;;  %v296_v46 = vsel %vm9690_vm2, 0, %v295_v53  ;;  %v478_v48 = vrot.slane %v476_v51, 7  ;;  %v355_v57 = vld [vmem:[#allocation2 + $0xbc] sm:$0x8]  ;;  %v9889_v0 = vld [vmem:[%s9679_s6 + $0x30] sm:$0xf] }
  0x89   : > { %7878 = vmatpush3.bf16.msra.mxu1 %v8958_v3  ;;  %v8948_v29 = vld [vmem:[#allocation2 + $0x68] ss:$12 sps:$4 sm:$0xff]   ;;  %v1004_v30 = vsel %vm9752_vm14, %v853_v18, %v1003_v20  ;;  %v1007_v33 = vld [vmem:[#allocation2 + $0xa4] sm:$0xf]  ;;  %1002 = vst [vmem:[#allocation2 + $0x80] sm:$0xf] %v850_v49  ;;  %v861_v34 = vor.u32 %v860_v26, %v858_v25  ;;  %v473_v18 = vor.u32 %v471_v50, %v470_v14 }
  0x8a   : > { %7879 = vmatprep.subr.bf16.mxu1 %v8964_v55  ;;  %1005 = vst [vmem:[#allocation2 + $0x8c] sm:$0xf] %v1004_v30  ;;  %8574 = vmatmul.mubr.bf16.gmra.mxu1 %v8948_v29  ;;  %v857_v37 = vrot.slane %v856_v31, 4  ;;  %297 = vst [vmem:[#allocation2 + $0x60] sm:$0x1] %v296_v46  ;;  %v356_v63 = vsel %vm9694_vm6, 0, %v355_v57  ;;  %v481_v4 = vor.u32 %v479_v52, %v478_v48 }
  0x8b   : > { %v862_v62 = vrot.slane %v861_v34, 4  ;;  %11821 = vst [vmem:[#allocation25_spill] sm:$0xff] %v9889_v0  ;;  %v9892_v2 = vld [vmem:[%s9679_s6 + $0x34] sm:$0xf]  ;;  %357 = vst [vmem:[#allocation2 + $0xbc] sm:$0x8] %v356_v63 }
  0x8c   : > { %11822 = vst [vmem:[#allocation26_spill] sm:$0xff] %v9892_v2  ;;  %v859_v3 = vsel %vm9735_vm12, %v857_v37, %v858_v25  ;;  %v516_v51 = vshrl.u32 %v9889_v0, 16  ;;  %v519_v60 = vshll.u32 %v9889_v0, 16  ;;  %786 = vst [vmem:[#allocation2 + $0xac] sm:$0xf] %v9889_v0  ;;  %v524_v7 = vshrl.u32 %v9892_v2, 16 }
  0x8d   : > { %7880 = vmatpush3.bf16.msra.mxu1 %v8965_v24  ;;  %787 = vst [vmem:[#allocation2 + $0xb8] sm:$0xf] %v9892_v2  ;;  %v358_v5 = vld [vmem:[#allocation2 + $0xd4] sm:$0x8]  ;;  %v9903_v55 = vld [vmem:[%s9679_s6 + $0x38] sm:$0xf]  ;;  %v1008_v6 = vsel %vm9752_vm14, %v862_v62, %v1007_v33  ;;  %v482_v20 = vsel %vm9723_vm11, %v474_v47, %v481_v4 }
  0x8e   : > { %11823 = vst [vmem:[#allocation27_spill] sm:$0xff] %v9903_v55  ;;  %1006 = vst [vmem:[#allocation2 + $0x98] sm:$0xf] %v859_v3  ;;  %v527_v52 = vshll.u32 %v9892_v2, 16  ;;  %v359_v8 = vsel %vm9694_vm6, 0, %v358_v5  ;;  %v8971_v13 = vld [vmem:[#allocation6 + $0xa8] sm:$0xff]  }
  0x8f   : > { %v9912_v11 = vld [vmem:[%s9679_s6 + $0x3c] sm:$0xf]  ;;  %788 = vst [vmem:[#allocation2 + $0xc4] sm:$0xf] %v9903_v55  ;;  %v8954_v17 = vld [vmem:[#allocation2 + $0x48] ss:$12 sps:$4 sm:$0xff]   ;;  %8605 = vmatprep.subr.bf16.mxu0 %v8971_v13 }
  0x90   : > { %11824 = vst [vmem:[#allocation28_spill] sm:$0xff] %v9912_v11  ;;  %v8951_v16 = vld [vmem:[#allocation2 + $0x4c] ss:$12 sps:$4 sm:$0xff]   ;;  %1009 = vst [vmem:[#allocation2 + $0xa4] sm:$0xf] %v1008_v6  ;;  %v863_v21 = vrot.slane %v516_v51, 4  ;;  %8606 = vmatpush3.bf16.msra.mxu0 %v8971_v13 }
  0x91   : > { %360 = vst [vmem:[#allocation2 + $0xd4] sm:$0x8] %v359_v8  ;;  %789 = vst [vmem:[#allocation2 + $0xd0] sm:$0xf] %v9912_v11  ;;  %v864_v24 = vrot.slane %v519_v60, 5  ;;  %v867_v25 = vrot.slane %v527_v52, 5  ;;  %1723 = vmatprep.mubr.bf16.mxu0 %v8951_v16 }
  0x92   : > { %725 = vst [vmem:[#allocation2 + $0x6c] sm:$0xf] %v482_v20  ;;  %v869_v26 = vrot.slane %v524_v7, 4  ;;  %v532_v50 = vshrl.u32 %v9903_v55, 16  ;;  %v8953_v14 = vld [vmem:[#allocation2 + $0x80] ss:$12 sps:$4 sm:$0xff]   ;;  %1724 = vmatmul.mubr.bf16.gmra.mxu0 %v8954_v17 }
  0x93   : > { %v865_v29 = vor.u32 %v864_v24, %v863_v21  ;;  %v535_v30 = vshll.u32 %v9903_v55, 16  ;;  %v540_v31 = vshrl.u32 %v9912_v11, 16  ;;  %8577 = vmatprep.mubr.bf16.mxu1 %v8953_v14  ;;  %v722_v33 = vld [vmem:[#allocation2 + $0x60] sm:$0xf]  ;;  %v543_v34 = vshll.u32 %v9912_v11, 16  ;;  %v8972_v62 = vld [vmem:[#allocation6 + $0x58] sm:$0xff]  }
  0x94   : > { %v870_v49 = vor.u32 %v869_v26, %v867_v25  ;;  %v872_v53 = vrot.slane %v532_v50, 4  ;;  %v723_v37 = vsel %vm9746_vm13, %v473_v18, %v722_v33  ;;  %v1011_v48 = vld [vmem:[#allocation2 + $0xbc] sm:$0xf]  ;;  %v298_v4 = vld [vmem:[#allocation2 + $0x78] sm:$0x1]  ;;  %7881 = vmatprep.subr.bf16.mxu1 %v8972_v62  ;;  %v486_v20 = vrot.slane %v484_v39, 7 }
  0x95   : > { %v866_v46 = vrot.slane %v865_v29, 4  ;;  %v873_v57 = vrot.slane %v535_v30, 5  ;;  %724 = vst [vmem:[#allocation2 + $0x60] sm:$0xf] %v723_v37  ;;  %v876_v63 = vrot.slane %v543_v34, 5  ;;  %v878_v3 = vrot.slane %v540_v31, 4 }
  0x96   : > { %v871_v47 = vrot.slane %v870_v49, 4  ;;  %v299_v18 = vsel %vm9690_vm2, 0, %v298_v4  ;;  %v494_v21 = vrot.slane %v492_v45, 7  ;;  %v361_v24 = vld [vmem:[#allocation2 + $0xec] sm:$0x8]  ;;  %v490_v33 = vrot.slane %v486_v20, 4 }
  0x97   : > { %v8955_v5 = vld [vmem:[#allocation2 + $0x98] ss:$12 sps:$4 sm:$0xff]   ;;  %v868_v6 = vsel %vm9735_vm12, %v866_v46, %v867_v25  ;;  %v874_v13 = vor.u32 %v873_v57, %v872_v53  ;;  %v879_v17 = vor.u32 %v878_v3, %v876_v63  ;;  %300 = vst [vmem:[#allocation2 + $0x78] sm:$0x1] %v299_v18  ;;  %v362_v26 = vsel %vm9694_vm6, 0, %v361_v24  ;;  %s7127_s11 = sshll.u32 %s11480_s7, 4  ;;  %s11669_s11 = int_to_ptr.vmem [resolvable:$true] %s7127_s11 }
  0x98   : > { %v1012_v8 = vsel %vm9752_vm14, %v871_v47, %v1011_v48  ;;  %v1015_v16 = vld [vmem:[#allocation2 + $0xd4] sm:$0xf]  ;;  %1010 = vst [vmem:[#allocation2 + $0xb0] sm:$0xf] %v868_v6  ;;  %8578 = vmatmul.mubr.bf16.gmra.mxu1 %v8955_v5  ;;  %v9955_v14 = vld [vmem:[%s9679_s6 + $0x40] sm:$0xf]  ;;  %v497_v39 = vor.u32 %v495_v56, %v494_v21 }
  0x99   : > { %1013 = vst [vmem:[#allocation2 + $0xbc] sm:$0xf] %v1012_v8  ;;  %v875_v25 = vrot.slane %v874_v13, 4  ;;  %11825 = vst [vmem:[#allocation29_spill] sm:$0xff] %v9955_v14  ;;  %v9958_v29 = vld [vmem:[%s9679_s6 + $0x44] sm:$0xf]  ;;  %v489_v8 = vor.u32 %v487_v40, %v486_v20 }
  0x9a   : > { %11826 = vst [vmem:[#allocation30_spill] sm:$0xff] %v9958_v29  ;;  %v880_v49 = vrot.slane %v879_v17, 4  ;;  %363 = vst [vmem:[#allocation2 + $0xec] sm:$0x8] %v362_v26  ;;  %v364_v45 = vld [vmem:[#allocation2 + $0x104] sm:$0x8]  ;;  %v498_v3 = vsel %vm9723_vm11, %v490_v33, %v497_v39 }
  0x9b   : > { %790 = vst [vmem:[#allocation2 + $0xdc] sm:$0xf] %v9955_v14  ;;  %791 = vst [vmem:[#allocation2 + $0xe8] sm:$0xf] %v9958_v29  ;;  %v9965_v53 = vld [vmem:[%s9679_s6 + $0x48] sm:$0xf]  ;;  %v877_v37 = vsel %vm9735_vm12, %v875_v25, %v876_v63 }
  0x9c   : > { %11827 = vst [vmem:[#allocation31_spill] sm:$0xff] %v9965_v53  ;;  %v548_v46 = vshrl.u32 %v9955_v14, 16  ;;  %v11728_v47 = vshll.u32 %v9955_v14, 16  ;;  %v556_v48 = vshrl.u32 %v9958_v29, 16  ;;  %v9973_v57 = vld [vmem:[%s9679_s6 + $0x4c] sm:$0xf]  ;;  %v1016_v62 = vsel %vm9752_vm14, %v880_v49, %v1015_v16 }
  0x9d   : > { %11828 = vst [vmem:[#allocation32_spill] sm:$0xff] %v9973_v57  ;;  %792 = vst [vmem:[#allocation2 + $0xf4] sm:$0xf] %v9965_v53  ;;  %v8973_v56 = vld [vmem:[#allocation6 + $0x18] sm:$0xff]   ;;  %v11749_v63 = vshll.u32 %v9958_v29, 16  ;;  %v365_v4 = vsel %vm9694_vm6, 0, %v364_v45 }
  0x9e   : > { %1014 = vst [vmem:[#allocation2 + $0xc8] sm:$0xf] %v877_v37  ;;  %793 = vst [vmem:[#allocation2 + $0x100] sm:$0xf] %v9973_v57  ;;  %v8959_v5 = vld [vmem:[#allocation2 + $0x64] ss:$12 sps:$4 sm:$0xff]   ;;  %7882 = vmatpush3.bf16.msra.mxu1 %v8973_v56 }
  0x9f   : > { %v8962_v6 = vld [vmem:[#allocation2 + $0x60] ss:$12 sps:$4 sm:$0xff]   ;;  %1017 = vst [vmem:[#allocation2 + $0xd4] sm:$0xf] %v1016_v62  ;;  %729 = vst [vmem:[#allocation2 + $0x84] sm:$0xf] %v498_v3  ;;  %1731 = vmatprep.mubr.bf16.mxu0 %v8959_v5 }
  0xa0   : > { %v881_v13 = vrot.slane %v548_v46, 4  ;;  %366 = vst [vmem:[#allocation2 + $0x104] sm:$0x8] %v365_v4  ;;  %v882_v16 = vrot.slane %v11728_v47, 5  ;;  %v885_v17 = vrot.slane %v11749_v63, 5  ;;  %v887_v18 = vrot.slane %v556_v48, 4  ;;  %1732 = vmatmul.mubr.bf16.gmra.mxu0 %v8962_v6 }
  0xa1   : > { %v11748_v21 = vshrl.u32 %v9965_v53, 16  ;;  %v8961_v24 = vld [vmem:[#allocation2 + $0xb0] ss:$12 sps:$4 sm:$0xff]   ;;  %v726_v40 = vld [vmem:[#allocation2 + $0x78] sm:$0xf]  ;;  %v11724_v26 = vshll.u32 %v9965_v53, 16 }
  0xa2   : > { %v883_v20 = vor.u32 %v882_v16, %v881_v13  ;;  %v888_v25 = vor.u32 %v887_v18, %v885_v17  ;;  %v11739_v49 = vshrl.u32 %v9973_v57, 16  ;;  %8581 = vmatprep.mubr.bf16.mxu1 %v8961_v24  ;;  %v727_v33 = vsel %vm9746_vm13, %v489_v8, %v726_v40  ;;  %v1019_v39 = vld [vmem:[#allocation2 + $0xec] sm:$0xf]  ;;  %v301_v6 = vld [vmem:[#allocation2 + $0x90] sm:$0x1]  ;;  %v9348_v44 = vld [vmem:[#allocation2] sm:$0xff] }
  0xa3   : > { %v11729_v45 = vshll.u32 %v9973_v57, 16  ;;  %v890_v37 = vrot.slane %v11748_v21, 4  ;;  %728 = vst [vmem:[#allocation2 + $0x78] sm:$0xf] %v727_v33  ;;  %v891_v3 = vrot.slane %v11724_v26, 5  ;;  %v502_v8 = vrot.slane %v500_v32, 7 }
  0xa4   : > { %v884_v56 = vrot.slane %v883_v20, 4  ;;  %v889_v62 = vrot.slane %v888_v25, 4  ;;  %v896_v4 = vrot.slane %v11739_v49, 4  ;;  %v302_v40 = vsel %vm9690_vm2, 0, %v301_v6  ;;  %v367_v26 = vld [vmem:[#allocation2 + $0x11c] sm:$0x8] }
  0xa5   : > { %v894_v5 = vrot.slane %v11729_v45, 5  ;;  %v892_v24 = vor.u32 %v891_v3, %v890_v37  ;;  %303 = vst [vmem:[#allocation2 + $0x90] sm:$0x1] %v302_v40  ;;  %v506_v33 = vrot.slane %v502_v8, 4  ;;  %v510_v32 = vrot.slane %v508_v10, 7  ;;  %v8980_v40 = vld [vmem:[#allocation6 + $0x10] sm:$0xff]  }
  0xa6   : > { %v8963_v13 = vld [vmem:[#allocation2 + $0xc8] ss:$12 sps:$4 sm:$0xff]   ;;  %v886_v16 = vsel %vm9735_vm12, %v884_v56, %v885_v17  ;;  %v1020_v18 = vsel %vm9752_vm14, %v889_v62, %v1019_v39  ;;  %v368_v56 = vsel %vm9694_vm6, 0, %v367_v26  ;;  %v10021_v39 = vld [vmem:[%s9679_s6 + $0x50] sm:$0xf]  ;;  %v11076_v1 = vcombine.low %v9348_v44, %v9348_v44  ;;  %s7114_s29 = scalar_lea.sflag [#allocation5], %s9675_s30 }
  0xa7   : > { %1018 = vst [vmem:[#allocation2 + $0xe0] sm:$0xf] %v886_v16  ;;  %1021 = vst [vmem:[#allocation2 + $0xec] sm:$0xf] %v1020_v18  ;;  %v897_v20 = vor.u32 %v896_v4, %v894_v5  ;;  %v1023_v25 = vld [vmem:[#allocation2 + $0x104] sm:$0xf]  ;;  %8582 = vmatmul.mubr.bf16.gmra.mxu1 %v8963_v13  ;;  %v513_v3 = vor.u32 %v511_v12, %v510_v32 }
  0xa8   : > { %v893_v17 = vrot.slane %v892_v24, 4  ;;  %11829 = vst [vmem:[#allocation33_spill] sm:$0xff] %v10021_v39  ;;  %v10024_v37 = vld [vmem:[%s9679_s6 + $0x54] sm:$0xf]  ;;  %369 = vst [vmem:[#allocation2 + $0x11c] sm:$0x8] %v368_v56 }
  0xa9   : > { %11830 = vst [vmem:[#allocation34_spill] sm:$0xff] %v10024_v37  ;;  %v898_v62 = vrot.slane %v897_v20, 4  ;;  %v11731_v4 = vshrl.u32 %v10021_v39, 16  ;;  %v11725_v10 = vshll.u32 %v10021_v39, 16  ;;  %794 = vst [vmem:[#allocation2 + $0x10c] sm:$0xf] %v10021_v39 }
  0xaa   : > { %795 = vst [vmem:[#allocation2 + $0x118] sm:$0xf] %v10024_v37  ;;  %v370_v6 = vld [vmem:[#allocation2 + $0x134] sm:$0x8]  ;;  %v8979_v26 = vld [vmem:[#allocation6 + $0x50] sm:$0xff]   ;;  %v895_v13 = vsel %vm9735_vm12, %v893_v17, %v894_v5  ;;  %v11727_v16 = vshrl.u32 %v10024_v37, 16  ;;  %v505_v5 = vor.u32 %v503_v9, %v502_v8  ;;  %v514_v17 = vsel %vm9723_vm11, %v506_v33, %v513_v3 }
  0xab   : > { %v11726_v18 = vshll.u32 %v10024_v37, 16  ;;  %v371_v12 = vsel %vm9694_vm6, 0, %v370_v6  ;;  %v10039_v24 = vld [vmem:[%s9679_s6 + $0x58] sm:$0xf]  ;;  %v8969_v32 = vld [vmem:[#allocation2 + $0x78] ss:$12 sps:$4 sm:$0xff]   ;;  %v1024_v56 = vsel %vm9752_vm14, %v898_v62, %v1023_v25  ;;  %7883 = vmatprep.subr.bf16.mxu1 %v8979_v26 }
  0xac   : > { %11831 = vst [vmem:[#allocation35_spill] sm:$0xff] %v10039_v24  ;;  %v10041_v20 = vld [vmem:[#allocation2 + $0x7c] ss:$12 sps:$4 sm:$0xff]   ;;  %1022 = vst [vmem:[#allocation2 + $0xf8] sm:$0xf] %v895_v13  ;;  %v899_v6 = vrot.slane %v11731_v4, 4  ;;  %7884 = vmatpush3.bf16.msra.mxu1 %v8980_v40 }
  0xad   : > { %372 = vst [vmem:[#allocation2 + $0x134] sm:$0x8] %v371_v12  ;;  %796 = vst [vmem:[#allocation2 + $0x124] sm:$0xf] %v10039_v24  ;;  %v900_v13 = vrot.slane %v11725_v10, 5  ;;  %v903_v25 = vrot.slane %v11726_v18, 5  ;;  %1739 = vmatprep.mubr.bf16.mxu0 %v10041_v20 }
  0xae   : > { %1025 = vst [vmem:[#allocation2 + $0x104] sm:$0xf] %v1024_v56  ;;  %733 = vst [vmem:[#allocation2 + $0x9c] sm:$0xf] %v514_v17  ;;  %v905_v9 = vrot.slane %v11727_v16, 4  ;;  %v11730_v33 = vshrl.u32 %v10039_v24, 16  ;;  %1740 = vmatmul.mubr.bf16.gmra.mxu0 %v8969_v32 }
  0xaf   : > { %v10059_v8 = vld [vmem:[%s9679_s6 + $0x5c] sm:$0xf]  ;;  %v11732_v62 = vshll.u32 %v10039_v24, 16  ;;  %v10069_v12 = vrot.slane %v516_v51, 7  ;;  %v901_v17 = vor.u32 %v900_v13, %v899_v6  ;;  %v730_v18 = vld [vmem:[#allocation2 + $0x90] sm:$0xf] }
  0xb0   : > { %11832 = vst [vmem:[#allocation36_spill] sm:$0xff] %v10059_v8  ;;  %v11734_v3 = vshrl.u32 %v10059_v8, 16  ;;  %v11733_v26 = vshll.u32 %v10059_v8, 16  ;;  %797 = vst [vmem:[#allocation2 + $0x130] sm:$0xf] %v10059_v8  ;;  %v906_v10 = vor.u32 %v905_v9, %v903_v25  ;;  %v908_v40 = vrot.slane %v11730_v33, 4 }
  0xb1   : > { %v8968_v56 = vld [vmem:[#allocation2 + $0xe0] ss:$12 sps:$4 sm:$0xff]   ;;  %v909_v16 = vrot.slane %v11732_v62, 5  ;;  %v731_v51 = vsel %vm9746_vm13, %v505_v5, %v730_v18  ;;  %v902_v32 = vrot.slane %v901_v17, 4  ;;  %v1027_v13 = vld [vmem:[#allocation2 + $0x11c] sm:$0xf] }
  0xb2   : > { %v912_v47 = vrot.slane %v11733_v26, 5  ;;  %v914_v45 = vrot.slane %v11734_v3, 4  ;;  %8585 = vmatprep.mubr.bf16.mxu1 %v8968_v56  ;;  %v907_v6 = vrot.slane %v906_v10, 4  ;;  %732 = vst [vmem:[#allocation2 + $0x90] sm:$0xf] %v731_v51  ;;  %v522_v18 = vrot.slane %v10069_v12, 4 }
  0xb3   : > { %v910_v9 = vor.u32 %v909_v16, %v908_v40  ;;  %v304_v4 = vld [vmem:[#allocation2 + $0xa8] sm:$0x1]  ;;  %v904_v62 = vsel %vm9735_vm12, %v902_v32, %v903_v25  ;;  %v526_v5 = vrot.slane %v524_v7, 7  ;;  %v373_v25 = vld [vmem:[#allocation2 + $0x14c] sm:$0x8]  ;;  %v8986_v7 = vld [vmem:[#allocation6 + $0xa0] sm:$0xff]  }
  0xb4   : > { %v915_v33 = vor.u32 %v914_v45, %v912_v47  ;;  %v1028_v26 = vsel %vm9752_vm14, %v907_v6, %v1027_v13  ;;  %v1031_v3 = vld [vmem:[#allocation2 + $0x134] sm:$0xf]  ;;  %v305_v56 = vsel %vm9690_vm2, 0, %v304_v4  ;;  %1026 = vst [vmem:[#allocation2 + $0x110] sm:$0xf] %v904_v62  ;;  %v374_v4 = vsel %vm9694_vm6, 0, %v373_v25  ;;  %8607 = vmatprep.subr.bf16.mxu0 %v8986_v7 }
  0xb5   : > { %v8970_v10 = vld [vmem:[#allocation2 + $0xf8] ss:$12 sps:$4 sm:$0xff]   ;;  %1029 = vst [vmem:[#allocation2 + $0x11c] sm:$0xf] %v1028_v26  ;;  %v911_v16 = vrot.slane %v910_v9, 4  ;;  %v521_v25 = vor.u32 %v519_v60, %v10069_v12  ;;  %8608 = vmatpush3.bf16.msra.mxu0 %v8986_v7  ;;  %p11945_p2 = scmp.ne.s32.totalorder %s11790_s23, 0 }
  0xb6   : > { %306 = vst [vmem:[#allocation2 + $0xa8] sm:$0x1] %v305_v56  ;;  %v916_v45 = vrot.slane %v915_v33, 4  ;;  %v10091_v17 = vld [vmem:[%s9679_s6 + $0x60] sm:$0xf]  ;;  %8586 = vmatmul.mubr.bf16.gmra.mxu1 %v8970_v10  ;;  %v8987_v60 = vld [vmem:[#allocation6 + $0x48] sm:$0xff]  }
  0xb7   : > { %11833 = vst [vmem:[#allocation37_spill] sm:$0xff] %v10091_v17  ;;  %v913_v40 = vsel %vm9735_vm12, %v911_v16, %v912_v47  ;;  %v10098_v51 = vld [vmem:[%s9679_s6 + $0x64] sm:$0xf]  ;;  %v11736_v62 = vshrl.u32 %v10091_v17, 16  ;;  %v11735_v33 = vshll.u32 %v10091_v17, 16  ;;  %v529_v47 = vor.u32 %v527_v52, %v526_v5  ;;  %7885 = vmatprep.subr.bf16.mxu1 %v8987_v60  ;;  %s9506_s22 = smov [#allocation9]  }
  0xb8   : > { %11834 = vst [vmem:[#allocation38_spill] sm:$0xff] %v10098_v51  ;;  %798 = vst [vmem:[#allocation2 + $0x13c] sm:$0xf] %v10091_v17  ;;  %v1032_v26 = vsel %vm9752_vm14, %v916_v45, %v1031_v3  ;;  %v11738_v32 = vshrl.u32 %v10098_v51, 16  ;;  %v11737_v6 = vshll.u32 %v10098_v51, 16  ;;  %s9434_s24 = sshll.u32 %s9506_s22, 4  ;;  %s9435_s24 = int_to_ptr.vmem [resolvable:$false] %s9434_s24 }
  0xb9   : > { %1030 = vst [vmem:[#allocation2 + $0x128] sm:$0xf] %v913_v40  ;;  %375 = vst [vmem:[#allocation2 + $0x14c] sm:$0x8] %v374_v4  ;;  %v376_v13 = vld [vmem:[#allocation2 + $0x164] sm:$0x8]  ;;  %v530_v40 = vsel %vm9723_vm11, %v522_v18, %v529_v47  ;;  %p9437_p13 = scmp.lt.s32.totalorder %s11669_s11, %s9435_s24 }
  0xba   : > { %799 = vst [vmem:[#allocation2 + $0x148] sm:$0xf] %v10098_v51  ;;  %v10111_v9 = vld [vmem:[%s9679_s6 + $0x68] sm:$0xf]  ;;  %1033 = vst [vmem:[#allocation2 + $0x134] sm:$0xf] %v1032_v26 }
  0xbb   : > { %11835 = vst [vmem:[#allocation39_spill] sm:$0xff] %v10111_v9  ;;  %v917_v56 = vrot.slane %v11736_v62, 4  ;;  %v918_v3 = vrot.slane %v11735_v33, 5  ;;  %v377_v52 = vsel %vm9694_vm6, 0, %v376_v13  ;;  %v10120_v10 = vld [vmem:[%s9679_s6 + $0x6c] sm:$0xf] }
  0xbc   : > { %11836 = vst [vmem:[#allocation40_spill] sm:$0xff] %v10120_v10  ;;  %v11747_v16 = vshrl.u32 %v10111_v9, 16  ;;  %800 = vst [vmem:[#allocation2 + $0x154] sm:$0xf] %v10111_v9  ;;  %v10124_v45 = vld [vmem:[#allocation2 + $0x94] ss:$12 sps:$4 sm:$0xff]  }
  0xbd   : > { %v10126_v5 = vld [vmem:[#allocation2 + $0x90] ss:$12 sps:$4 sm:$0xff]   ;;  %v921_v4 = vrot.slane %v11737_v6, 5  ;;  %378 = vst [vmem:[#allocation2 + $0x164] sm:$0x8] %v377_v52  ;;  %v919_v26 = vor.u32 %v918_v3, %v917_v56  ;;  %v923_v13 = vrot.slane %v11738_v32, 4  ;;  %1747 = vmatprep.mubr.bf16.mxu0 %v10124_v45 }
  0xbe   : > { %801 = vst [vmem:[#allocation2 + $0x160] sm:$0xf] %v10120_v10  ;;  %737 = vst [vmem:[#allocation2 + $0xb4] sm:$0xf] %v530_v40  ;;  %v11740_v33 = vshll.u32 %v10111_v9, 16  ;;  %v11741_v62 = vshrl.u32 %v10120_v10, 16  ;;  %1748 = vmatmul.mubr.bf16.gmra.mxu0 %v10126_v5 }
  0xbf   : > { %v8976_v12 = vld [vmem:[#allocation2 + $0x110] ss:$12 sps:$4 sm:$0xff]   ;;  %v734_v18 = vld [vmem:[#allocation2 + $0xa8] sm:$0xf]  ;;  %v920_v47 = vrot.slane %v919_v26, 4  ;;  %v924_v52 = vor.u32 %v923_v13, %v921_v4  ;;  %v11744_v7 = vshll.u32 %v10120_v10, 16 }
  0xc0   : > { %v926_v56 = vrot.slane %v11747_v16, 4  ;;  %v8988_v3 = vld [vmem:[#allocation6 + $0x8] sm:$0xff]   ;;  %8589 = vmatprep.mubr.bf16.mxu1 %v8976_v12  ;;  %v735_v40 = vsel %vm9746_vm13, %v521_v25, %v734_v18  ;;  %v927_v6 = vrot.slane %v11740_v33, 5  ;;  %v932_v32 = vrot.slane %v11741_v62, 4  ;;  %v1035_v49 = vld [vmem:[#allocation2 + $0x14c] sm:$0xf] }
  0xc1   : > { %736 = vst [vmem:[#allocation2 + $0xa8] sm:$0xf] %v735_v40  ;;  %v922_v26 = vsel %vm9735_vm12, %v920_v47, %v921_v4  ;;  %v925_v13 = vrot.slane %v924_v52, 4  ;;  %v930_v60 = vrot.slane %v11744_v7, 5  ;;  %7886 = vmatpush3.bf16.msra.mxu1 %v8988_v3  ;;  %v8978_v12 = vld [vmem:[#allocation2 + $0x128] ss:$12 sps:$4 sm:$0xff]  }
  0xc2   : > { %1034 = vst [vmem:[#allocation2 + $0x140] sm:$0xf] %v922_v26  ;;  %v928_v25 = vor.u32 %v927_v6, %v926_v56  ;;  %8590 = vmatmul.mubr.bf16.gmra.mxu1 %v8978_v12  ;;  %v307_v4 = vld [vmem:[#allocation2 + $0xc0] sm:$0x1]  ;;  %v534_v47 = vrot.slane %v532_v50, 7  ;;  %v542_v52 = vrot.slane %v540_v31, 7 }
  0xc3   : > { %v1036_v18 = vsel %vm9752_vm14, %v925_v13, %v1035_v49  ;;  %v933_v33 = vor.u32 %v932_v32, %v930_v60  ;;  %v308_v6 = vsel %vm9690_vm2, 0, %v307_v4  ;;  %v379_v56 = vld [vmem:[#allocation2 + $0x17c] sm:$0x8]  ;;  %v10164_v49 = vld [vmem:[%s9679_s6 + $0x70] sm:$0xf]  ;;  %s9436_s26 = scalar_lea.vmem %s9435_s24, 8192 }
  0xc4   : > { %v1039_v62 = vld [vmem:[#allocation2 + $0x164] sm:$0xf]  ;;  %1037 = vst [vmem:[#allocation2 + $0x14c] sm:$0xf] %v1036_v18  ;;  %v929_v40 = vrot.slane %v928_v25, 4  ;;  %11837 = vst [vmem:[#allocation41_spill] sm:$0xff] %v10164_v49  ;;  %v545_v13 = vor.u32 %v543_v34, %v542_v52 }
  0xc5   : > { %v934_v3 = vrot.slane %v933_v33, 4  ;;  %309 = vst [vmem:[#allocation2 + $0xc0] sm:$0x1] %v308_v6  ;;  %v538_v26 = vrot.slane %v534_v47, 4  ;;  %v10171_v50 = vld [vmem:[%s9679_s6 + $0x74] sm:$0xf] }
  0xc6   : > { %v931_v32 = vsel %vm9735_vm12, %v929_v40, %v930_v60  ;;  %11838 = vst [vmem:[#allocation42_spill] sm:$0xff] %v10171_v50  ;;  %802 = vst [vmem:[#allocation2 + $0x16c] sm:$0xf] %v10164_v49  ;;  %v382_v31 = vld [vmem:[#allocation2 + $0x194] sm:$0x8]  ;;  %v380_v25 = vsel %vm9694_vm6, 0, %v379_v56 }
  0xc7   : > { %v8994_v33 = vld [vmem:[#allocation6 + $0x40] sm:$0xff]   ;;  %1038 = vst [vmem:[#allocation2 + $0x158] sm:$0xf] %v931_v32  ;;  %v1040_v12 = vsel %vm9752_vm14, %v934_v3, %v1039_v62  ;;  %v11745_v60 = vshrl.u32 %v10164_v49, 16  ;;  %v11742_v18 = vshll.u32 %v10164_v49, 16  ;;  %v537_v62 = vor.u32 %v535_v30, %v534_v47 }
  0xc8   : > { %803 = vst [vmem:[#allocation2 + $0x178] sm:$0xf] %v10171_v50  ;;  %v10182_v34 = vld [vmem:[%s9679_s6 + $0x78] sm:$0xf]  ;;  %v8995_v40 = vld [vmem:[#allocation6] sm:$0xff]   ;;  %v546_v3 = vsel %vm9723_vm11, %v538_v26, %v545_v13  ;;  %v11743_v6 = vshrl.u32 %v10171_v50, 16  ;;  %7887 = vmatprep.subr.bf16.mxu1 %v8994_v33 }
  0xc9   : > { %11839 = vst [vmem:[#allocation43_spill] sm:$0xff] %v10182_v34  ;;  %v10184_v4 = vld [vmem:[#allocation2 + $0xac] ss:$12 sps:$4 sm:$0xff]   ;;  %v10186_v52 = vld [vmem:[#allocation2 + $0xa8] ss:$12 sps:$4 sm:$0xff]   ;;  %v11746_v56 = vshll.u32 %v10171_v50, 16  ;;  %7888 = vmatpush3.bf16.msra.mxu1 %v8995_v40 }
  0xca   : > { %1041 = vst [vmem:[#allocation2 + $0x164] sm:$0xf] %v1040_v12  ;;  %381 = vst [vmem:[#allocation2 + $0x17c] sm:$0x8] %v380_v25  ;;  %v935_v32 = vrot.slane %v11745_v60, 4  ;;  %v936_v12 = vrot.slane %v11742_v18, 5  ;;  %1755 = vmatprep.mubr.bf16.mxu0 %v10184_v4 }
  0xcb   : > { %804 = vst [vmem:[#allocation2 + $0x184] sm:$0xf] %v10182_v34  ;;  %741 = vst [vmem:[#allocation2 + $0xcc] sm:$0xf] %v546_v3  ;;  %v383_v30 = vsel %vm9694_vm6, 0, %v382_v31  ;;  %v941_v47 = vrot.slane %v11743_v6, 4  ;;  %1756 = vmatmul.mubr.bf16.gmra.mxu0 %v10186_v52 }
  0xcc   : > { %384 = vst [vmem:[#allocation2 + $0x194] sm:$0x8] %v383_v30  ;;  %v10205_v26 = vld [vmem:[%s9679_s6 + $0x7c] sm:$0xf]  ;;  %v11750_v13 = vshrl.u32 %v10182_v34, 16  ;;  %v11751_v33 = vshll.u32 %v10182_v34, 16  ;;  %v937_v19 = vor.u32 %v936_v12, %v935_v32 }
  0xcd   : > { %11840 = vst [vmem:[#allocation44_spill] sm:$0xff] %v10205_v26  ;;  %v550_v25 = vrot.slane %v548_v46, 7  ;;  %v8983_v3 = vld [vmem:[#allocation2 + $0x140] ss:$12 sps:$4 sm:$0xff]   ;;  %v939_v31 = vrot.slane %v11746_v56, 5  ;;  %v11752_v40 = vshrl.u32 %v10205_v26, 16 }
  0xce   : > { %805 = vst [vmem:[#allocation2 + $0x190] sm:$0xf] %v10205_v26  ;;  %v11753_v30 = vshll.u32 %v10205_v26, 16  ;;  %v944_v18 = vrot.slane %v11750_v13, 4  ;;  %v945_v6 = vrot.slane %v11751_v33, 5  ;;  %v8999_v46 = vld [vmem:[#allocation6 + $0x98] sm:$0xff]   ;;  %8593 = vmatprep.mubr.bf16.mxu1 %v8983_v3 }
  0xcf   : > { %v738_v7 = vld [vmem:[#allocation2 + $0xc0] sm:$0xf]  ;;  %v938_v60 = vrot.slane %v937_v19, 4  ;;  %v942_v32 = vor.u32 %v941_v47, %v939_v31  ;;  %v950_v12 = vrot.slane %v11752_v40, 4  ;;  %v554_v63 = vrot.slane %v550_v25, 4  ;;  %8609 = vmatprep.subr.bf16.mxu0 %v8999_v46  ;;  %s9430_s6 = scalar_lea.vmem %s11669_s11, 4096 }
  0xd0   : > { %v739_v56 = vsel %vm9746_vm13, %v537_v62, %v738_v7  ;;  %v946_v16 = vor.u32 %v945_v6, %v944_v18  ;;  %v948_v21 = vrot.slane %v11753_v30, 5  ;;  %v558_v47 = vrot.slane %v556_v48, 7  ;;  %8610 = vmatpush3.bf16.msra.mxu0 %v8999_v46  ;;  %v310_v6 = vld [vmem:[#allocation2 + $0xd8] sm:$0x1]  ;;  %p9431_p5 = scmp.ne.s32.totalorder %s11669_s11, %s9430_s6  ;;  %p9438_p0 = scmp.lt.s32.totalorder %s9436_s26, %s9430_s6 }
  0xd1   : > { %v8985_v13 = vld [vmem:[#allocation2 + $0x158] ss:$12 sps:$4 sm:$0xff]   ;;  %740 = vst [vmem:[#allocation2 + $0xc0] sm:$0xf] %v739_v56  ;;  %v940_v3 = vsel %vm9735_vm12, %v938_v60, %v939_v31  ;;  %v943_v33 = vrot.slane %v942_v32, 4  ;;  %v11841_v56 = vshll.u32 %v9958_v29, 16 }
  0xd2   : > { %1042 = vst [vmem:[#allocation2 + $0x170] sm:$0xf] %v940_v3  ;;  %v1043_v19 = vld [vmem:[#allocation2 + $0x17c] sm:$0xf]  ;;  %v947_v40 = vrot.slane %v946_v16, 4  ;;  %v951_v7 = vor.u32 %v950_v12, %v948_v21  ;;  %8594 = vmatmul.mubr.bf16.gmra.mxu1 %v8985_v13  ;;  %v311_v48 = vsel %vm9690_vm2, 0, %v310_v6  ;;  %p9432_p7 = pnand %p9431_p5, %p11945_p2  ;;  %p9439_p10 = por %p9438_p0, %p9437_p13 }
  0xd3   : > { %v1044_v18 = vsel %vm9752_vm14, %v943_v33, %v1043_v19  ;;  %v1047_v62 = vld [vmem:[#allocation2 + $0x194] sm:$0xf]  ;;  %v561_v30 = vor.u32 %v11841_v56, %v558_v47  ;;  %312 = vst [vmem:[#allocation2 + $0xd8] sm:$0x1] %v311_v48  ;;  %v10241_v13 = vld [vmem:[#allocation6 + $0x238] sm:$0xff]   ;;  %v11842_v46 = vshrl.u32 %v9965_v53, 16 }
  0xd4   : > { %1045 = vst [vmem:[#allocation2 + $0x17c] sm:$0xf] %v1044_v18  ;;  %v949_v60 = vsel %vm9735_vm12, %v947_v40, %v948_v21  ;;  %v952_v31 = vrot.slane %v951_v7, 4  ;;  %v313_v33 = vld [vmem:[#allocation2 + $0xf0] sm:$0x1]  ;;  %v11843_v40 = vshrl.u32 %v9973_v57, 16  ;;  %8649 = vmatprep.subr.bf16.mxu1 %v10241_v13  ;;  %p9433_p12 = pneg %p9432_p7 }
  0xd5   : > { %1046 = vst [vmem:[#allocation2 + $0x188] sm:$0xf] %v949_v60  ;;  %v562_v16 = vsel %vm9723_vm11, %v554_v63, %v561_v30  ;;  %v566_v32 = vrot.slane %v11842_v46, 7  ;;  %v314_v21 = vsel %vm9690_vm2, 0, %v313_v33  ;;  %v316_v30 = vld [vmem:[#allocation2 + $0x108] sm:$0x1] }
  0xd6   : > { %v1048_v12 = vsel %vm9752_vm14, %v952_v31, %v1047_v62  ;;  %745 = vst [vmem:[#allocation2 + $0xe4] sm:$0xf] %v562_v16  ;;  %v574_v3 = vrot.slane %v11843_v40, 7  ;;  %315 = vst [vmem:[#allocation2 + $0xf0] sm:$0x1] %v314_v21  ;;  %v11844_v47 = vshrl.u32 %v10021_v39, 16  ;;  %p9440_p3 = pnand %p9439_p10, %p9433_p12 }
  0xd7   : > { %1049 = vst [vmem:[#allocation2 + $0x194] sm:$0xf] %v1048_v12  ;;  %v570_v63 = vrot.slane %v566_v32, 4  ;;  %v10254_v7 = vld [vmem:[#allocation2 + $0xc4] ss:$12 sps:$4 sm:$0xff]   ;;  %v11845_v62 = vshll.u32 %v9973_v57, 16 }
  0xd8   : > { %v582_v19 = vrot.slane %v11844_v47, 7  ;;  %v10256_v18 = vld [vmem:[#allocation2 + $0xc0] ss:$12 sps:$4 sm:$0xff]   ;;  %v317_v56 = vsel %vm9690_vm2, 0, %v316_v30  ;;  %v11846_v60 = vshll.u32 %v9955_v14, 16  ;;  %v11847_v16 = vshrl.u32 %v10024_v37, 16  ;;  %1763 = vmatprep.mubr.bf16.mxu0 %v10254_v7 }
  0xd9   : > { %v577_v6 = vor.u32 %v11845_v62, %v574_v3  ;;  %318 = vst [vmem:[#allocation2 + $0x108] sm:$0x1] %v317_v56  ;;  %1764 = vmatmul.mubr.bf16.gmra.mxu0 %v10256_v18  ;;  %v11848_v21 = vshll.u32 %v9965_v53, 16  ;;  %v11849_v3 = vshll.u32 %v10024_v37, 16  ;;  %v9344_v47 = vld [vmem:[#allocation2] sm:$0xff]  ;;  %v11861_v37 = vshll.u32 %v10091_v17, 16 }
  0xda   : > { %v553_v31 = vor.u32 %v11846_v60, %v550_v25  ;;  %v586_v48 = vrot.slane %v582_v19, 4  ;;  %v590_v33 = vrot.slane %v11847_v16, 7  ;;  %v742_v30 = vld [vmem:[#allocation2 + $0xd8] sm:$0xf]  ;;  %v7305_v62 = vcombine.high %v9344_v47, %v9344_v47  ;;  %v9013_v56 = vld [vmem:[#allocation6 + $0x90] sm:$0xff]  }
  0xdb   : > { %v578_v46 = vsel %vm9723_vm11, %v570_v63, %v577_v6  ;;  %v8991_v12 = vld [vmem:[#allocation2 + $0x170] ss:$12 sps:$4 sm:$0xff]   ;;  %v569_v40 = vor.u32 %v11848_v21, %v566_v32  ;;  %v11850_v60 = vshrl.u32 %v10039_v24, 16  ;;  %v11851_v6 = vshll.u32 %v10021_v39, 16  ;;  %8611 = vmatprep.subr.bf16.mxu0 %v9013_v56  ;;  %v9104_v53 = vld [vmem:[#allocation2 + $0x10c] ss:$12 sps:$4 sm:$0xff]  }
  0xdc   : > { %749 = vst [vmem:[#allocation2 + $0xfc] sm:$0xf] %v578_v46  ;;  %v593_v25 = vor.u32 %v11849_v3, %v590_v33  ;;  %8597 = vmatprep.mubr.bf16.mxu1 %v8991_v12  ;;  %v743_v63 = vsel %vm9746_vm13, %v553_v31, %v742_v30  ;;  %v11852_v46 = vshrl.u32 %v10059_v8, 16  ;;  %8612 = vmatpush3.bf16.msra.mxu0 %v9013_v56  ;;  %v11853_v30 = vshll.u32 %v10059_v8, 16  ;;  %v322_v56 = vld [vmem:[#allocation2 + $0x138] sm:$0x1] }
  0xdd   : > { %v598_v16 = vrot.slane %v11850_v60, 7  ;;  %v585_v29 = vor.u32 %v11851_v6, %v582_v19  ;;  %744 = vst [vmem:[#allocation2 + $0xd8] sm:$0xf] %v743_v63  ;;  %v746_v3 = vld [vmem:[#allocation2 + $0xf0] sm:$0xf]  ;;  %v11854_v6 = vshrl.u32 %v10091_v17, 16 }
  0xde   : > { %v594_v32 = vsel %vm9723_vm11, %v586_v48, %v593_v25  ;;  %v606_v33 = vrot.slane %v11852_v46, 7  ;;  %v8993_v21 = vld [vmem:[#allocation2 + $0x188] ss:$12 sps:$4 sm:$0xff]   ;;  %v747_v12 = vsel %vm9746_vm13, %v569_v40, %v746_v3  ;;  %v319_v60 = vld [vmem:[#allocation2 + $0x120] sm:$0x1]  ;;  %v323_v46 = vsel %vm9690_vm2, 0, %v322_v56 }
  0xdf   : > { %753 = vst [vmem:[#allocation2 + $0x114] sm:$0xf] %v594_v32  ;;  %v602_v31 = vrot.slane %v598_v16, 4  ;;  %v614_v48 = vrot.slane %v11854_v6, 7  ;;  %8598 = vmatmul.mubr.bf16.gmra.mxu1 %v8993_v21  ;;  %748 = vst [vmem:[#allocation2 + $0xf0] sm:$0xf] %v747_v12  ;;  %v7304_v12 = vcombine.low %v9344_v47, %v9344_v47 }
  0xe0   : > { %v609_v19 = vor.u32 %v11853_v30, %v606_v33  ;;  %v750_v25 = vld [vmem:[#allocation2 + $0x108] sm:$0xf]  ;;  %v320_v63 = vsel %vm9690_vm2, 0, %v319_v60  ;;  %2429 = vmatprep.mubr.bf16.mxu1 %v7305_v62  ;;  %v11855_v21 = vshrl.u32 %v10098_v51, 16  ;;  %324 = vst [vmem:[#allocation2 + $0x138] sm:$0x1] %v323_v46 }
  0xe1   : > { %v751_v32 = vsel %vm9746_vm13, %v585_v29, %v750_v25  ;;  %321 = vst [vmem:[#allocation2 + $0x120] sm:$0x1] %v320_v63  ;;  %v618_v33 = vrot.slane %v614_v48, 4  ;;  %v9003_v62 = vld [vmem:[#allocation2 + $0x1c] ss:$12 sps:$4 sm:$0xff]   ;;  %v11856_v60 = vshll.u32 %v10098_v51, 16 }
  0xe2   : > { %v610_v40 = vsel %vm9723_vm11, %v602_v31, %v609_v19  ;;  %752 = vst [vmem:[#allocation2 + $0x108] sm:$0xf] %v751_v32  ;;  %v622_v3 = vrot.slane %v11855_v21, 7  ;;  %v9027_v30 = vld [vmem:[#allocation6 + $0x88] sm:$0xff]   ;;  %v11857_v6 = vshrl.u32 %v10111_v9, 16  ;;  %v11858_v63 = vshll.u32 %v10039_v24, 16 }
  0xe3   : > { %757 = vst [vmem:[#allocation2 + $0x12c] sm:$0xf] %v610_v40  ;;  %v10304_v19 = vld [vmem:[#allocation2 + $0xdc] ss:$12 sps:$4 sm:$0xff]   ;;  %v11859_v40 = vshrl.u32 %v10120_v10, 16  ;;  %v9014_v46 = vld [vmem:[#allocation6 + $0x230] sm:$0xff]   ;;  %8613 = vmatprep.subr.bf16.mxu0 %v9027_v30 }
  0xe4   : > { %v625_v29 = vor.u32 %v11856_v60, %v622_v3  ;;  %v630_v31 = vrot.slane %v11857_v6, 7  ;;  %v10306_v25 = vld [vmem:[#allocation2 + $0xd8] ss:$12 sps:$4 sm:$0xff]   ;;  %v601_v32 = vor.u32 %v11858_v63, %v598_v16  ;;  %v325_v21 = vld [vmem:[#allocation2 + $0x150] sm:$0x1]  ;;  %v11860_v60 = vshrl.u32 %v10164_v49, 16  ;;  %1771 = vmatprep.mubr.bf16.mxu0 %v10304_v19  ;;  %8614 = vmatpush3.bf16.msra.mxu0 %v9027_v30 }
  0xe5   : > { %v638_v56 = vrot.slane %v11859_v40, 7  ;;  %v10317_v51 = vld [vmem:[#allocation2 + $0xf4] ss:$12 sps:$4 sm:$0xff]   ;;  %v617_v16 = vor.u32 %v11861_v37, %v614_v48  ;;  %v326_v63 = vsel %vm9690_vm2, 0, %v325_v21  ;;  %1772 = vmatmul.mubr.bf16.gmra.mxu0 %v10306_v25  ;;  %v11863_v39 = vshrl.u32 %v10171_v50, 16  ;;  %v9028_v48 = vld [vmem:[#allocation6 + $0x228] sm:$0xff]  }
  0xe6   : > { %v626_v47 = vsel %vm9723_vm11, %v618_v33, %v625_v29  ;;  %v634_v3 = vrot.slane %v630_v31, 4  ;;  %v646_v6 = vrot.slane %v11860_v60, 7  ;;  %v11862_v33 = vshll.u32 %v10120_v10, 16  ;;  %327 = vst [vmem:[#allocation2 + $0x150] sm:$0x1] %v326_v63  ;;  %1779 = vmatprep.mubr.bf16.mxu0 %v10317_v51  ;;  %v9129_v10 = vld [vmem:[#allocation8 + $0xf8] sm:$0xff]  }
  0xe7   : > { %761 = vst [vmem:[#allocation2 + $0x144] sm:$0xf] %v626_v47  ;;  %2430 = vmatmul.mubr.bf16.vlgmr.msra.gmra.mxu1 %v7304_v12  ;;  %v328_v60 = vld [vmem:[#allocation2 + $0x168] sm:$0x1]  ;;  %v654_v24 = vrot.slane %v11863_v39, 7  ;;  %v9133_v57 = vld [vmem:[#allocation8 + $0x128] sm:$0xff]  }
  0xe8   : > { %v641_v29 = vor.u32 %v11862_v33, %v638_v56  ;;  %v754_v40 = vld [vmem:[#allocation2 + $0x120] sm:$0xf]  ;;  %v650_v8 = vrot.slane %v646_v6, 4  ;;  %8650 = vmatpush3.bf16.msra.mxu1 %v10241_v13  ;;  %v329_v12 = vsel %vm9690_vm2, 0, %v328_v60  ;;  %2437 = vmatprep.mubr.bf16.mxu1 %v9003_v62  ;;  %v10336_v56 = vld [vmem:[#allocation2 + $0xf0] ss:$12 sps:$4 sm:$0xff]  }
  0xe9   : > { %v755_v37 = vsel %vm9746_vm13, %v601_v32, %v754_v40  ;;  %v9006_v47 = vld [vmem:[#allocation2 + $0x18] ss:$12 sps:$4 sm:$0xff]   ;;  %8651 = vmatprep.subr.bf16.mxu1 %v9014_v46  ;;  %330 = vst [vmem:[#allocation2 + $0x168] sm:$0x1] %v329_v12  ;;  %v11864_v13 = vshll.u32 %v10171_v50, 16  ;;  %v11865_v32 = vshrl.u32 %v10182_v34, 16 }
  0xea   : > { %v642_v30 = vsel %vm9723_vm11, %v634_v3, %v641_v29  ;;  %756 = vst [vmem:[#allocation2 + $0x120] sm:$0xf] %v755_v37  ;;  %v758_v39 = vld [vmem:[#allocation2 + $0x138] sm:$0xf]  ;;  %v10344_v3 = vld [vmem:[#allocation2 + $0x34] ss:$12 sps:$4 sm:$0xff]  }
  0xeb   : > { %765 = vst [vmem:[#allocation2 + $0x15c] sm:$0xf] %v642_v30  ;;  %v657_v21 = vor.u32 %v11864_v13, %v654_v24  ;;  %v662_v63 = vrot.slane %v11865_v32, 7  ;;  %v10342_v33 = vld [vmem:[#allocation2 + $0x10c] ss:$12 sps:$4 sm:$0xff]   ;;  %v759_v62 = vsel %vm9746_vm13, %v617_v16, %v758_v39  ;;  %v9035_v29 = vld [vmem:[#allocation6 + $0x80] sm:$0xff]  }
  0xec   : > { %v11866_v40 = vshrl.u32 %v10205_v26, 16  ;;  %760 = vst [vmem:[#allocation2 + $0x138] sm:$0xf] %v759_v62  ;;  %v11867_v37 = vshll.u32 %v10111_v9, 16  ;;  %v331_v12 = vld [vmem:[#allocation2 + $0x180] sm:$0x1]  ;;  %8652 = vmatpush3.bf16.msra.mxu1 %v9014_v46  ;;  %8615 = vmatprep.subr.bf16.mxu0 %v9035_v29 }
  0xed   : > { %v658_v24 = vsel %vm9723_vm11, %v650_v8, %v657_v21  ;;  %v666_v13 = vrot.slane %v662_v63, 4  ;;  %v332_v32 = vsel %vm9690_vm2, 0, %v331_v12  ;;  %v11868_v16 = vshll.u32 %v10205_v26, 16  ;;  %v9042_v50 = vld [vmem:[#allocation6 + $0x1f8] sm:$0xff]   ;;  %8653 = vmatprep.subr.bf16.mxu1 %v9028_v48  ;;  %8616 = vmatpush3.bf16.msra.mxu0 %v9035_v29  ;;  %v762_v62 = vld [vmem:[#allocation2 + $0x150] sm:$0xf] }
  0xee   : > { %v670_v60 = vrot.slane %v11866_v40, 7  ;;  %v633_v30 = vor.u32 %v11867_v37, %v630_v31  ;;  %769 = vst [vmem:[#allocation2 + $0x174] sm:$0xf] %v658_v24  ;;  %333 = vst [vmem:[#allocation2 + $0x180] sm:$0x1] %v332_v32  ;;  %v11869_v31 = vshll.u32 %v10164_v49, 16  ;;  %8009 = vmatprep.subr.bf16.mxu0 %v9042_v50  ;;  %1780 = vmatmul.mubr.bf16.gmra.mxu0 %v10336_v56 }
  0xef   : > { %v9036_v8 = vld [vmem:[#allocation6 + $0x220] sm:$0xff]   ;;  %2438 = vmatmul.mubr.bf16.gmra.mxu1 %v9006_v47  ;;  %1787 = vmatprep.mubr.bf16.mxu0 %v10342_v33  ;;  %v11870_v29 = vshll.u32 %v10182_v34, 16  ;;  %v10373_v37 = vld [vmem:[#allocation2 + $0x4c] ss:$12 sps:$4 sm:$0xff]  }
  0xf0   : > { %v673_v39 = vor.u32 %v11868_v16, %v670_v60  ;;  %v649_v40 = vor.u32 %v11869_v31, %v646_v6  ;;  %v763_v15 = vsel %vm9746_vm13, %v633_v30, %v762_v62  ;;  %2445 = vmatprep.mubr.bf16.mxu1 %v10344_v3  ;;  %v10367_v21 = vld [vmem:[#allocation2 + $0x30] ss:$12 sps:$4 sm:$0xff]   ;;  %8654 = vmatpush3.bf16.msra.mxu1 %v9028_v48  ;;  %v766_v6 = vld [vmem:[#allocation2 + $0x168] sm:$0xf]  ;;  %v10397_v62 = vld [vmem:[#allocation2 + $0x60] ss:$12 sps:$4 sm:$0xff]  }
  0xf1   : > { %764 = vst [vmem:[#allocation2 + $0x150] sm:$0xf] %v763_v15  ;;  %v665_v60 = vor.u32 %v11870_v29, %v662_v63  ;;  %v10371_v50 = vld [vmem:[#allocation2 + $0x108] ss:$12 sps:$4 sm:$0xff]   ;;  %8655 = vmatprep.subr.bf16.mxu1 %v9036_v8  ;;  %v10377_v30 = vld [vmem:[#allocation2 + $0x124] ss:$12 sps:$4 sm:$0xff]  }
  0xf2   : > { %v674_v46 = vsel %vm9723_vm11, %v666_v13, %v673_v39  ;;  %v767_v47 = vsel %vm9746_vm13, %v649_v40, %v766_v6  ;;  %v9044_v12 = vld [vmem:[#allocation6 + $0x218] sm:$0xff]   ;;  %v10387_v13 = vld [vmem:[#allocation2 + $0x64] ss:$12 sps:$4 sm:$0xff]   ;;  %v10401_v40 = vld [vmem:[#allocation2 + $0x154] ss:$12 sps:$4 sm:$0xff]  }
  0xf3   : > { %773 = vst [vmem:[#allocation2 + $0x18c] sm:$0xf] %v674_v46  ;;  %768 = vst [vmem:[#allocation2 + $0x168] sm:$0xf] %v767_v47  ;;  %v10385_v63 = vld [vmem:[#allocation2 + $0x48] ss:$12 sps:$4 sm:$0xff]  }
  0xf4   : > { %8656 = vmatpush3.bf16.msra.mxu1 %v9036_v8  ;;  %v10389_v32 = vld [vmem:[#allocation2 + $0x120] ss:$12 sps:$4 sm:$0xff]   ;;  %v10391_v16 = vld [vmem:[#allocation2 + $0x13c] ss:$12 sps:$4 sm:$0xff]   ;;  %v10399_v31 = vld [vmem:[#allocation2 + $0x138] ss:$12 sps:$4 sm:$0xff]  }
  0xf5   : > { %v770_v24 = vld [vmem:[#allocation2 + $0x180] sm:$0xf]  ;;  %8657 = vmatprep.subr.bf16.mxu1 %v9044_v12  ;;  %v9062_v8 = vld [vmem:[#allocation6 + $0x208] sm:$0xff]   ;;  %v9037_v47 = vld [vmem:[#allocation2 + $0x184] ss:$12 sps:$4 sm:$0xff]  }
  0xf6   : > { %v771_v48 = vsel %vm9746_vm13, %v665_v60, %v770_v24  ;;  %1788 = vmatmul.mubr.bf16.gmra.mxu0 %v10371_v50  ;;  %v9053_v39 = vld [vmem:[#allocation6 + $0x210] sm:$0xff]   ;;  %v10409_v15 = vld [vmem:[#allocation2 + $0x16c] ss:$12 sps:$4 sm:$0xff]   ;;  %v9071_v60 = vld [vmem:[#allocation6 + $0x200] sm:$0xff]  }
  0xf7   : > { %772 = vst [vmem:[#allocation2 + $0x180] sm:$0xf] %v771_v48  ;;  %2446 = vmatmul.mubr.bf16.gmra.mxu1 %v10367_v21  ;;  %1795 = vmatprep.mubr.bf16.mxu0 %v10377_v30  ;;  %v9345_v6 = vld [vmem:[#allocation2 + $0x78] ss:$12 sps:$4 sm:$0xff]   ;;  %v9040_v24 = vld [vmem:[#allocation2 + $0x8] ss:$12 sps:$4 sm:$0xff]  }
  0xf8   : > { %2453 = vmatprep.mubr.bf16.mxu1 %v10373_v37  ;;  %8658 = vmatpush3.bf16.msra.mxu1 %v9044_v12  ;;  %v10407_v46 = vld [vmem:[#allocation2 + $0x150] ss:$12 sps:$4 sm:$0xff]   ;;  %v9043_v12 = vld [vmem:[#allocation6 + $0x1b8] sm:$0xff]   ;;  %v9045_v48 = vld [vmem:[#allocation2 + $0x38] ss:$12 sps:$4 sm:$0xff]  }
  0xf9   : > { %8659 = vmatprep.subr.bf16.mxu1 %v9053_v39  ;;  %v9093_v26 = vld [vmem:[#allocation2 + $0xc4] ss:$12 sps:$4 sm:$0xff]   ;;  %v9106_v0 = vld [vmem:[#allocation2 + $0x108] ss:$12 sps:$4 sm:$0xff]  }
  0xfa   : > { %v10414_v29 = vld [vmem:[#allocation2 + $0x168] ss:$12 sps:$4 sm:$0xff]   ;;  %v9115_v49 = vld [vmem:[#allocation2 + $0x158] ss:$12 sps:$4 sm:$0xff]  }
  0xfb   : > { %v9114_v23 = vld [vmem:[#allocation2 + $0x138] ss:$12 sps:$4 sm:$0xff]   ;;  %v4407_v61 = vld [vmem:[#allocation2 + $0x194] sm:$0xf] }
  0xfc   : > { %8660 = vmatpush3.bf16.msra.mxu1 %v9053_v39  ;;  %v9047_v39 = vld [vmem:[#allocation6 + $0x1f0] sm:$0xff]  }
  0xfd   : > { %8661 = vmatprep.subr.bf16.mxu1 %v9062_v8 }
  0xfe   : > { %1796 = vmatmul.mubr.bf16.gmra.mxu0 %v10389_v32 }
  0xff   : > { %2454 = vmatmul.mubr.bf16.gmra.mxu1 %v10385_v63  ;;  %1803 = vmatprep.mubr.bf16.mxu0 %v10391_v16 }
 0x100   : > { %2461 = vmatprep.mubr.bf16.mxu1 %v10387_v13  ;;  %8662 = vmatpush3.bf16.msra.mxu1 %v9062_v8  ;;  %v9051_v8 = vld [vmem:[#allocation6 + $0x1e8] sm:$0xff]  }
 0x101   : > { %8663 = vmatprep.subr.bf16.mxu1 %v9071_v60 }
 0x104   : > { %8664 = vmatpush3.bf16.msra.mxu1 %v9071_v60  ;;  %v9050_v60 = vld [vmem:[#allocation2 + $0x80] ss:$12 sps:$4 sm:$0xff]  }
 0x106   : > { %1804 = vmatmul.mubr.bf16.gmra.mxu0 %v10399_v31 }
 0x107   : > { %2462 = vmatmul.mubr.bf16.gmra.mxu1 %v10397_v62  ;;  %1811 = vmatprep.mubr.bf16.mxu0 %v10401_v40 }
 0x108   : > { %2469 = vmatprep.mubr.bf16.mxu1 %v10041_v20  ;;  %v9039_v20 = vld [vmem:[#allocation2 + $0x180] ss:$12 sps:$4 sm:$0xff]  }
 0x10e   : > { %1812 = vmatmul.mubr.bf16.gmra.mxu0 %v10407_v46 }
 0x10f   : > { %2470 = vmatmul.mubr.bf16.gmra.mxu1 %v9345_v6  ;;  %1819 = vmatprep.mubr.bf16.mxu0 %v10409_v15  ;;  %v9049_v6 = vld [vmem:[#allocation2 + $0x68] ss:$12 sps:$4 sm:$0xff]  }
 0x110   : > { %2477 = vmatprep.mubr.bf16.mxu1 %v10124_v45  ;;  %v9041_v45 = vld [vmem:[#allocation2 + $0x20] ss:$12 sps:$4 sm:$0xff]  }
 0x116   : > { %1820 = vmatmul.mubr.bf16.gmra.mxu0 %v10414_v29 }
 0x117   : > { %2478 = vmatmul.mubr.bf16.gmra.mxu1 %v10126_v5  ;;  %1827 = vmatprep.mubr.bf16.mxu0 %v9037_v47  ;;  %v9048_v5 = vld [vmem:[#allocation6 + $0x1b0] sm:$0xff]  }
 0x118   : > { %2485 = vmatprep.mubr.bf16.mxu1 %v10184_v4  ;;  %v9046_v4 = vld [vmem:[#allocation2 + $0x50] ss:$12 sps:$4 sm:$0xff]   ;;  %v9054_v47 = vld [vmem:[#allocation2 + $0x98] ss:$12 sps:$4 sm:$0xff]  }
 0x11e   : > { %1828 = vmatmul.mubr.bf16.gmra.mxu0 %v9039_v20  ;;  %v9061_v20 = vld [vmem:[#allocation6 + $0x198] sm:$0xff]  }
 0x11f   : > { %2486 = vmatmul.mubr.bf16.gmra.mxu1 %v10186_v52  ;;  %8617 = vmatprep.mubr.bf16.mxu0 %v9040_v24  ;;  %v9052_v52 = vld [vmem:[#allocation6 + $0x1a8] sm:$0xff]   ;;  %v9065_v24 = vld [vmem:[#allocation6 + $0x1d0] sm:$0xff]  }
 0x120   : > { %2493 = vmatprep.mubr.bf16.mxu1 %v10254_v7  ;;  %v9056_v7 = vld [vmem:[#allocation6 + $0x1e0] sm:$0xff]  }
 0x126   : > { %8618 = vmatmul.mubr.bf16.vlgmr.msra.gmra.mxu0 %v9041_v45  ;;  %v9066_v45 = vld [vmem:[#allocation6 + $0x190] sm:$0xff]  }
 0x127   : > { %2494 = vmatmul.mubr.bf16.gmra.mxu1 %v10256_v18  ;;  %8010 = vmatpush3.bf16.msra.mxu0 %v9043_v12  ;;  %v9057_v18 = vld [vmem:[#allocation6 + $0x1a0] sm:$0xff]  }
 0x128   : > { %2501 = vmatprep.mubr.bf16.mxu1 %v10304_v19  ;;  %8621 = vmatprep.mubr.bf16.mxu0 %v9045_v48  ;;  %v9060_v19 = vld [vmem:[#allocation6 + $0x1d8] sm:$0xff]   ;;  %v9070_v48 = vld [vmem:[#allocation6 + $0x188] sm:$0xff]  }
 0x129   : > { %8011 = vmatprep.subr.bf16.mxu0 %v9047_v39  ;;  %v9058_v12 = vld [vmem:[#allocation2 + $0xc8] ss:$12 sps:$4 sm:$0xff]  }
 0x12a   : > { %v9074_v39 = vld [vmem:[#allocation6 + $0x1c0] sm:$0xff]  }
 0x12b   : > { %8012 = vmatpush3.bf16.msra.mxu0 %v9048_v5  ;;  %v9075_v5 = vld [vmem:[#allocation6 + $0x180] sm:$0xff]  }
 0x12c   : > { %8013 = vmatprep.subr.bf16.mxu0 %v9051_v8 }
 0x12e   : > { %8622 = vmatmul.mubr.bf16.gmra.mxu0 %v9046_v4 }
 0x12f   : > { %2502 = vmatmul.mubr.bf16.gmra.mxu1 %v10306_v25  ;;  %8625 = vmatprep.mubr.bf16.mxu0 %v9049_v6  ;;  %v9069_v25 = vld [vmem:[#allocation6 + $0x1c8] sm:$0xff]  }
 0x130   : > { %2509 = vmatprep.mubr.bf16.mxu1 %v10317_v51  ;;  %8014 = vmatpush3.bf16.msra.mxu0 %v9052_v52  ;;  %v9055_v51 = vld [vmem:[#allocation2 + $0xb0] ss:$12 sps:$4 sm:$0xff]  }
 0x131   : > { %8015 = vmatprep.subr.bf16.mxu0 %v9056_v7  ;;  %v9064_v7 = vld [vmem:[#allocation2 + $0x110] ss:$12 sps:$4 sm:$0xff]  }
 0x134   : > { %8016 = vmatpush3.bf16.msra.mxu0 %v9057_v18 }
 0x135   : > { %8017 = vmatprep.subr.bf16.mxu0 %v9060_v19 }
 0x136   : > { %8626 = vmatmul.mubr.bf16.gmra.mxu0 %v9050_v60 }
 0x137   : > { %2510 = vmatmul.mubr.bf16.gmra.mxu1 %v10336_v56  ;;  %8629 = vmatprep.mubr.bf16.mxu0 %v9054_v47  ;;  %v9059_v56 = vld [vmem:[#allocation2 + $0xe0] ss:$12 sps:$4 sm:$0xff]  }
 0x138   : > { %2517 = vmatprep.mubr.bf16.mxu1 %v10342_v33  ;;  %8018 = vmatpush3.bf16.msra.mxu0 %v9061_v20  ;;  %v9063_v33 = vld [vmem:[#allocation2 + $0xf8] ss:$12 sps:$4 sm:$0xff]   ;;  %v7753_v4 = vpop.f32.mrf.mxu0  ;;  %v9067_v20 = vld [vmem:[#allocation2 + $0x128] ss:$12 sps:$4 sm:$0xff]  }
 0x139   : > { %8019 = vmatprep.subr.bf16.mxu0 %v9065_v24 }
 0x13a   : > { %v7754_v8 = vpop.f32.mrf.mxu0 }
 0x13b   : > { %v7755_v52 = vadd.f32 %v7754_v8, %v7753_v4 }
 0x13c   : > { %8020 = vmatpush3.bf16.msra.mxu0 %v9066_v45 }
 0x13d   : > { %8021 = vmatprep.subr.bf16.mxu0 %v9069_v25 }
 0x13e   : > { %8630 = vmatmul.mubr.bf16.gmra.mxu0 %v9055_v51  ;;  %v9068_v51 = vld [vmem:[#allocation2 + $0x140] ss:$12 sps:$4 sm:$0xff]  }
 0x13f   : > { %2518 = vmatmul.mubr.bf16.gmra.mxu1 %v10371_v50  ;;  %8633 = vmatprep.mubr.bf16.mxu0 %v9058_v12  ;;  %v7756_v50 = vpop.f32.mrf.mxu0 }
 0x140   : > { %2525 = vmatprep.mubr.bf16.mxu1 %v10377_v30  ;;  %8022 = vmatpush3.bf16.msra.mxu0 %v9070_v48  ;;  %v8571_v6 = vpop.f32.mrf.mxu1 }
 0x141   : > { %8023 = vmatprep.subr.bf16.mxu0 %v9074_v39  ;;  %v7757_v60 = vpop.f32.mrf.mxu0 }
 0x142   : > { %v1870_v30 = vpop.f32.mrf.mxu1  ;;  %v7758_v47 = vadd.f32 %v7757_v60, %v7756_v50 }
 0x143   : > { %v10431_v18 = vadd.f32 %v7755_v52, %v1870_v30  ;;  %v7759_v45 = vpop.f32.mrf.mxu0  ;;  %v9076_v52 = vld [vmem:[#allocation2 + $0x38] ss:$12 sps:$4 sm:$0xff]  }
 0x144   : > { %8024 = vmatpush3.bf16.msra.mxu0 %v9075_v5  ;;  %v8572_v19 = vpop.f32.mrf.mxu1  ;;  %v9072_v5 = vld [vmem:[#allocation2 + $0x158] ss:$12 sps:$4 sm:$0xff]  }
 0x146   : > { %8634 = vmatmul.mubr.bf16.gmra.mxu0 %v9059_v56  ;;  %v1873_v24 = vpop.f32.mrf.mxu1 }
 0x147   : > { %2526 = vmatmul.mubr.bf16.gmra.mxu1 %v10389_v32  ;;  %8637 = vmatprep.mubr.bf16.mxu0 %v9063_v33  ;;  %v10433_v25 = vadd.f32 %v7758_v47, %v1873_v24  ;;  %v7760_v32 = vpop.f32.mrf.mxu0  ;;  %v9078_v24 = vld [vmem:[#allocation2 + $0x68] ss:$12 sps:$4 sm:$0xff]  }
 0x148   : > { %2533 = vmatprep.mubr.bf16.mxu1 %v10391_v16  ;;  %v7761_v16 = vadd.f32 %v7760_v32, %v7759_v45 }
 0x149   : > { %v7762_v12 = vpop.f32.mrf.mxu0 }
 0x14a   : > { %v10437_v48 = vadd.f32 %v8571_v6, %v7761_v16  ;;  %v8575_v39 = vpop.f32.mrf.mxu1 }
 0x14b   : > { %v7763_v56 = vpop.f32.mrf.mxu0 }
 0x14c   : > { %v7764_v33 = vadd.f32 %v7763_v56, %v7762_v12  ;;  %v1886_v4 = vpop.f32.mrf.mxu1  ;;  %v9079_v56 = vld [vmem:[#allocation2 + $0x80] ss:$12 sps:$4 sm:$0xff]  }
 0x14e   : > { %8638 = vmatmul.mubr.bf16.gmra.mxu0 %v9064_v7  ;;  %v10439_v8 = vadd.f32 %v8572_v19, %v7764_v33  ;;  %v9077_v19 = vld [vmem:[#allocation2 + $0x50] ss:$12 sps:$4 sm:$0xff]  }
 0x14f   : > { %2534 = vmatmul.mubr.bf16.gmra.mxu1 %v10399_v31  ;;  %8641 = vmatprep.mubr.bf16.mxu0 %v9067_v20  ;;  %v8576_v31 = vpop.f32.mrf.mxu1 }
 0x150   : > { %2541 = vmatprep.mubr.bf16.mxu1 %v10401_v40  ;;  %v9073_v40 = vld [vmem:[#allocation2 + $0x170] ss:$12 sps:$4 sm:$0xff]  }
 0x151   : > { %v1889_v7 = vpop.f32.mrf.mxu1 }
 0x152   : > { %v7765_v50 = vpop.f32.mrf.mxu0 }
 0x154   : > { %v7766_v6 = vpop.f32.mrf.mxu0 }
 0x155   : > { %v7767_v30 = vadd.f32 %v7766_v6, %v7765_v50  ;;  %v9084_v6 = vld [vmem:[#allocation2 + $0xb0] ss:$12 sps:$4 sm:$0xff]  }
 0x156   : > { %8642 = vmatmul.mubr.bf16.gmra.mxu0 %v9068_v51  ;;  %v7768_v60 = vpop.f32.mrf.mxu0 }
 0x157   : > { %2542 = vmatmul.mubr.bf16.gmra.mxu1 %v10407_v46  ;;  %8645 = vmatprep.mubr.bf16.mxu0 %v9072_v5  ;;  %v10444_v47 = vadd.f32 %v7767_v30, %v1886_v4  ;;  %v9083_v4 = vld [vmem:[#allocation2 + $0x98] ss:$12 sps:$4 sm:$0xff]   ;;  %v9080_v30 = vld [vmem:[#allocation2 + $0x7c] ss:$12 sps:$4 sm:$0xff]  }
 0x158   : > { %2549 = vmatprep.mubr.bf16.mxu1 %v10409_v15  ;;  %v10447_v46 = vpop.f32.mrf.mxu1  ;;  %v7769_v15 = vpop.f32.mrf.mxu0 }
 0x159   : > { %v7770_v20 = vadd.f32 %v7769_v15, %v7768_v60  ;;  %v9091_v60 = vld [vmem:[#allocation2 + $0xc8] ss:$12 sps:$4 sm:$0xff]  }
 0x15a   : > { %v1902_v45 = vpop.f32.mrf.mxu1 }
 0x15b   : > { %v10449_v32 = vadd.f32 %v7770_v20, %v1889_v7 }
 0x15c   : > { %v10451_v16 = vpop.f32.mrf.mxu1 }
 0x15e   : > { %8646 = vmatmul.mubr.bf16.gmra.mxu0 %v9073_v40 }
 0x15f   : > { %2550 = vmatmul.mubr.bf16.gmra.mxu1 %v10414_v29  ;;  %3265 = vmatprep.mubr.bf16.mxu0 %v10344_v3  ;;  %v1905_v3 = vpop.f32.mrf.mxu1 }
 0x160   : > { %8665 = vmatprep.mubr.bf16.mxu1 %v9076_v52  ;;  %v7771_v29 = vpop.f32.mrf.mxu0 }
 0x162   : > { %v7772_v51 = vpop.f32.mrf.mxu0 }
 0x163   : > { %v7773_v12 = vadd.f32 %v7772_v51, %v7771_v29  ;;  %v9082_v51 = vld [vmem:[#allocation2 + $0x78] ss:$12 sps:$4 sm:$0xff]  }
 0x164   : > { %v7774_v5 = vpop.f32.mrf.mxu0 }
 0x165   : > { %v10455_v33 = vadd.f32 %v8575_v39, %v7773_v12  ;;  %v9092_v12 = vld [vmem:[#allocation2 + $0xe0] ss:$12 sps:$4 sm:$0xff]  }
 0x166   : > { %3266 = vmatmul.mubr.bf16.vlgmr.msra.gmra.mxu0 %v10367_v21  ;;  %v7775_v52 = vpop.f32.mrf.mxu0 }
 0x167   : > { %8666 = vmatmul.mubr.bf16.vlgmr.msra.gmra.mxu1 %v9077_v19  ;;  %3273 = vmatprep.mubr.bf16.mxu0 %v10373_v37  ;;  %v10457_v40 = vpop.f32.mrf.mxu1  ;;  %v7776_v50 = vadd.f32 %v7775_v52, %v7774_v5  ;;  %v9099_v52 = vld [vmem:[#allocation2 + $0xf8] ss:$12 sps:$4 sm:$0xff]  }
 0x168   : > { %8669 = vmatprep.mubr.bf16.mxu1 %v9078_v24 }
 0x169   : > { %v10460_v21 = vpop.f32.mrf.mxu1  ;;  %v10463_v37 = vadd.f32 %v8576_v31, %v7776_v50 }
 0x16b   : > { %v10465_v7 = vpop.f32.mrf.mxu1 }
 0x16d   : > { %v10467_v19 = vpop.f32.mrf.mxu1 }
 0x16e   : > { %3274 = vmatmul.mubr.bf16.gmra.mxu0 %v10385_v63  ;;  %v7777_v39 = vpop.f32.mrf.mxu0 }
 0x16f   : > { %8670 = vmatmul.mubr.bf16.gmra.mxu1 %v9079_v56  ;;  %3281 = vmatprep.mubr.bf16.mxu0 %v10387_v13  ;;  %v9085_v56 = vld [vmem:[#allocation2 + $0x94] ss:$12 sps:$4 sm:$0xff]  }
 0x170   : > { %8673 = vmatprep.mubr.bf16.mxu1 %v9083_v4  ;;  %v7778_v15 = vpop.f32.mrf.mxu0 }
 0x171   : > { %v7779_v20 = vadd.f32 %v7778_v15, %v7777_v39  ;;  %v9087_v39 = vld [vmem:[#allocation2 + $0x90] ss:$12 sps:$4 sm:$0xff]   ;;  %v9088_v15 = vld [vmem:[#allocation2 + $0xac] ss:$12 sps:$4 sm:$0xff]  }
 0x172   : > { %v7780_v63 = vpop.f32.mrf.mxu0 }
 0x173   : > { %v10470_v24 = vadd.f32 %v7779_v20, %v1902_v45 }
 0x174   : > { %v7781_v13 = vpop.f32.mrf.mxu0 }
 0x175   : > { %v7782_v29 = vadd.f32 %v7781_v13, %v7780_v63  ;;  %v9107_v63 = vld [vmem:[#allocation2 + $0x128] ss:$12 sps:$4 sm:$0xff]  }
 0x176   : > { %3282 = vmatmul.mubr.bf16.gmra.mxu0 %v10397_v62  ;;  %v10472_v31 = vpop.f32.mrf.mxu1 }
 0x177   : > { %8674 = vmatmul.mubr.bf16.gmra.mxu1 %v9084_v6  ;;  %3289 = vmatprep.mubr.bf16.mxu0 %v9080_v30  ;;  %v10476_v4 = vadd.f32 %v7782_v29, %v1905_v3 }
 0x178   : > { %8677 = vmatprep.mubr.bf16.mxu1 %v9091_v60  ;;  %v10474_v5 = vpop.f32.mrf.mxu1  ;;  %v9100_v60 = vld [vmem:[#allocation2 + $0x110] ss:$12 sps:$4 sm:$0xff]  }
 0x17a   : > { %v10478_v50 = vpop.f32.mrf.mxu1 }
 0x17c   : > { %v10480_v45 = vpop.f32.mrf.mxu1 }
 0x17e   : > { %3290 = vmatmul.mubr.bf16.gmra.mxu0 %v9082_v51  ;;  %v7783_v62 = vpop.f32.mrf.mxu0 }
 0x17f   : > { %8678 = vmatmul.mubr.bf16.gmra.mxu1 %v9092_v12  ;;  %3297 = vmatprep.mubr.bf16.mxu0 %v9085_v56 }
 0x180   : > { %8681 = vmatprep.mubr.bf16.mxu1 %v9099_v52  ;;  %v7784_v6 = vpop.f32.mrf.mxu0 }
 0x181   : > { %v7785_v30 = vadd.f32 %v7784_v6, %v7783_v62  ;;  %v9090_v62 = vld [vmem:[#allocation2 + $0xa8] ss:$12 sps:$4 sm:$0xff]   ;;  %v9108_v6 = vld [vmem:[#allocation2 + $0x140] ss:$12 sps:$4 sm:$0xff]  }
 0x182   : > { %v7786_v20 = vpop.f32.mrf.mxu0  ;;  %v10482_v13 = vpop.f32.mrf.mxu1 }
 0x183   : > { %v10485_v3 = vadd.f32 %v10447_v46, %v7785_v30  ;;  %v9128_v46 = vld [vmem:[#allocation8 + $0x138] sm:$0xff]  }
 0x184   : > { %v7787_v29 = vpop.f32.mrf.mxu0  ;;  %v10487_v51 = vpop.f32.mrf.mxu1  ;;  %8145 = vmatprep.subr.bf16.mxu1 %v9128_v46  ;;  %v9116_v46 = vld [vmem:[#allocation2 + $0x170] ss:$12 sps:$4 sm:$0xff]  }
 0x185   : > { %v7788_v12 = vadd.f32 %v7787_v29, %v7786_v20  ;;  %v9130_v20 = vld [vmem:[#allocation8 + $0x178] sm:$0xff]   ;;  %8146 = vmatpush3.bf16.msra.mxu1 %v9129_v10 }
 0x186   : > { %3298 = vmatmul.mubr.bf16.gmra.mxu0 %v9087_v39  ;;  %v10492_v52 = vpop.f32.mrf.mxu1  ;;  %8697 = vmatprep.subr.bf16.mxu0 %v9130_v20 }
 0x187   : > { %8682 = vmatmul.mubr.bf16.gmra.mxu1 %v9100_v60  ;;  %3305 = vmatprep.mubr.bf16.mxu0 %v9088_v15  ;;  %v10490_v56 = vadd.f32 %v10451_v16, %v7788_v12  ;;  %v9095_v12 = vld [vmem:[#allocation2 + $0xc0] ss:$12 sps:$4 sm:$0xff]  }
 0x188   : > { %8685 = vmatprep.mubr.bf16.mxu1 %v9107_v63  ;;  %v10494_v30 = vpop.f32.mrf.mxu1  ;;  %8698 = vmatpush3.bf16.msra.mxu0 %v9130_v20  ;;  %v9098_v20 = vld [vmem:[#allocation2 + $0xd8] ss:$12 sps:$4 sm:$0xff]  }
 0x18b   : > { %v7789_v34 = vpop.f32.mrf.mxu0 }
 0x18d   : > { %v7790_v39 = vpop.f32.mrf.mxu0 }
 0x18e   : > { %3306 = vmatmul.mubr.bf16.gmra.mxu0 %v9090_v62  ;;  %v7791_v60 = vadd.f32 %v7790_v39, %v7789_v34  ;;  %v9096_v62 = vld [vmem:[#allocation2 + $0xdc] ss:$12 sps:$4 sm:$0xff]  }
 0x18f   : > { %8686 = vmatmul.mubr.bf16.gmra.mxu1 %v9108_v6  ;;  %3313 = vmatprep.mubr.bf16.mxu0 %v9093_v26  ;;  %v7792_v16 = vpop.f32.mrf.mxu0  ;;  %v9123_v34 = vld [vmem:[#allocation2 + $0x188] ss:$12 sps:$4 sm:$0xff]   ;;  %v9131_v6 = vld [vmem:[#allocation8 + $0x130] sm:$0xff]  }
 0x190   : > { %8689 = vmatprep.mubr.bf16.mxu1 %v9115_v49  ;;  %v10497_v15 = vadd.f32 %v7791_v60, %v10460_v21  ;;  %8147 = vmatprep.subr.bf16.mxu1 %v9131_v6  ;;  %v9132_v49 = vld [vmem:[#allocation8 + $0xf0] sm:$0xff]  }
 0x191   : > { %v7793_v29 = vpop.f32.mrf.mxu0  ;;  %8148 = vmatpush3.bf16.msra.mxu1 %v9132_v49  ;;  %v9124_v60 = vld [vmem:[#allocation2 + $0x1a0] ss:$12 sps:$4 sm:$0xff]  }
 0x192   : > { %v10499_v63 = vpop.f32.mrf.mxu1  ;;  %v7794_v17 = vadd.f32 %v7793_v29, %v7792_v16  ;;  %v9101_v29 = vld [vmem:[#allocation2 + $0xf4] ss:$12 sps:$4 sm:$0xff]   ;;  %8149 = vmatprep.subr.bf16.mxu1 %v9133_v57 }
 0x193   : > { %v9135_v6 = vld [vmem:[#allocation8 + $0x170] sm:$0xff]  }
 0x194   : > { %v10501_v9 = vpop.f32.mrf.mxu1  ;;  %v10504_v26 = vadd.f32 %v7794_v17, %v10467_v19  ;;  %v9134_v19 = vld [vmem:[#allocation8 + $0xe8] sm:$0xff]   ;;  %8699 = vmatprep.subr.bf16.mxu0 %v9135_v6 }
 0x195   : > { %8150 = vmatpush3.bf16.msra.mxu1 %v9134_v19  ;;  %8700 = vmatpush3.bf16.msra.mxu0 %v9135_v6  ;;  %v9137_v6 = vld [vmem:[#allocation8 + $0xe0] sm:$0xff]  }
 0x196   : > { %3314 = vmatmul.mubr.bf16.gmra.mxu0 %v9095_v12  ;;  %v10506_v10 = vpop.f32.mrf.mxu1 }
 0x197   : > { %8690 = vmatmul.mubr.bf16.gmra.mxu1 %v9116_v46  ;;  %3321 = vmatprep.mubr.bf16.mxu0 %v9096_v62 }
 0x198   : > { %8693 = vmatprep.mubr.bf16.mxu1 %v9123_v34  ;;  %v10508_v39 = vpop.f32.mrf.mxu1 }
 0x199   : > { %v7795_v21 = vpop.f32.mrf.mxu0 }
 0x19b   : > { %v7796_v16 = vpop.f32.mrf.mxu0 }
 0x19c   : > { %v7797_v14 = vadd.f32 %v7796_v16, %v7795_v21  ;;  %v9103_v16 = vld [vmem:[#allocation2 + $0xf0] ss:$12 sps:$4 sm:$0xff]  }
 0x19d   : > { %v7798_v17 = vpop.f32.mrf.mxu0 }
 0x19e   : > { %3322 = vmatmul.mubr.bf16.gmra.mxu0 %v9098_v20  ;;  %v10513_v46 = vadd.f32 %v10457_v40, %v7797_v14  ;;  %v9136_v14 = vld [vmem:[#allocation8 + $0x120] sm:$0xff]  }
 0x19f   : > { %v10510_v12 = vpop.f32.mrf.mxu1  ;;  %8694 = vmatmul.mubr.bf16.gmra.mxu1 %v9124_v60  ;;  %v7799_v62 = vpop.f32.mrf.mxu0  ;;  %3329 = vmatprep.mubr.bf16.mxu0 %v9101_v29 }
 0x1a0   : > { %v7800_v49 = vadd.f32 %v7799_v62, %v7798_v17  ;;  %8151 = vmatprep.subr.bf16.mxu1 %v9136_v14 }
 0x1a1   : > { %v10515_v34 = vpop.f32.mrf.mxu1  ;;  %8152 = vmatpush3.bf16.msra.mxu1 %v9137_v6 }
 0x1a2   : > { %v10520_v57 = vadd.f32 %v10465_v7, %v7800_v49  ;;  %v9109_v49 = vld [vmem:[#allocation2 + $0x124] ss:$12 sps:$4 sm:$0xff]  }
 0x1a3   : > { %v10517_v21 = vpop.f32.mrf.mxu1 }
 0x1a5   : > { %v10522_v20 = vpop.f32.mrf.mxu1  ;;  %v7801_v40 = vpop.f32.mrf.mxu0 }
 0x1a6   : > { %3330 = vmatmul.mubr.bf16.gmra.mxu0 %v9103_v16 }
 0x1a7   : > { %v7889_v60 = vpop.f32.mrf.mxu1  ;;  %3337 = vmatprep.mubr.bf16.mxu0 %v9104_v53  ;;  %v7802_v29 = vpop.f32.mrf.mxu0 }
 0x1a8   : > { %v7803_v17 = vadd.f32 %v7802_v29, %v7801_v40 }
 0x1a9   : > { %v7890_v19 = vpop.f32.mrf.mxu1  ;;  %v7804_v2 = vpop.f32.mrf.mxu0 }
 0x1aa   : > { %v7891_v62 = vadd.f32 %v7890_v19, %v7889_v60  ;;  %v10525_v7 = vadd.f32 %v7803_v17, %v10474_v5 }
 0x1ab   : > { %v7892_v11 = vpop.f32.mrf.mxu1  ;;  %v7805_v36 = vpop.f32.mrf.mxu0 }
 0x1ac   : > { %v10528_v55 = vadd.f32 %v7891_v62, %v10431_v18  ;;  %v10530_v53 = vadd.f32 %v7805_v36, %v7804_v2  ;;  %v9111_v62 = vld [vmem:[#allocation2 + $0x120] ss:$12 sps:$4 sm:$0xff]   ;;  %v9112_v36 = vld [vmem:[#allocation2 + $0x13c] ss:$12 sps:$4 sm:$0xff]  }
 0x1ad   : > { %v7893_v16 = vpop.f32.mrf.mxu1 }
 0x1ae   : > { %v7894_v14 = vadd.f32 %v7893_v16, %v7892_v11  ;;  %v7807_v59 = vpop.f32.mrf.mxu0  ;;  %3338 = vmatmul.mubr.bf16.gmra.mxu0 %v9106_v0 }
 0x1af   : > { %v7895_v40 = vpop.f32.mrf.mxu1  ;;  %3345 = vmatprep.mubr.bf16.mxu0 %v9109_v49 }
 0x1b0   : > { %v10533_v60 = vadd.f32 %v7894_v14, %v10433_v25  ;;  %v7808_v29 = vpop.f32.mrf.mxu0 }
 0x1b1   : > { %v7896_v5 = vpop.f32.mrf.mxu1  ;;  %v7809_v19 = vadd.f32 %v7808_v29, %v7807_v59 }
 0x1b2   : > { %v7897_v17 = vadd.f32 %v7896_v5, %v7895_v40  ;;  %v7810_v35 = vpop.f32.mrf.mxu0  ;;  %v9138_v5 = vld [vmem:[#allocation8 + $0x118] sm:$0xff]  }
 0x1b3   : > { %v7898_v18 = vpop.f32.mrf.mxu1  ;;  %v10536_v6 = vadd.f32 %v10472_v31, %v7809_v19  ;;  %8153 = vmatprep.subr.bf16.mxu1 %v9138_v5  ;;  %v9145_v5 = vld [vmem:[#allocation8 + $0x160] sm:$0xff]  }
 0x1b4   : > { %v10539_v2 = vadd.f32 %v7897_v17, %v10437_v48  ;;  %v7811_v11 = vpop.f32.mrf.mxu0 }
 0x1b5   : > { %v7899_v0 = vpop.f32.mrf.mxu1  ;;  %v7812_v49 = vadd.f32 %v7811_v11, %v7810_v35  ;;  %v9139_v35 = vld [vmem:[#allocation8 + $0xd8] sm:$0xff]  }
 0x1b6   : > { %v7900_v16 = vadd.f32 %v7899_v0, %v7898_v18  ;;  %v7813_v25 = vpop.f32.mrf.mxu0  ;;  %3346 = vmatmul.mubr.bf16.gmra.mxu0 %v9111_v62  ;;  %v9140_v18 = vld [vmem:[#allocation8 + $0x168] sm:$0xff]   ;;  %8154 = vmatpush3.bf16.msra.mxu1 %v9139_v35 }
 0x1b7   : > { %v7901_v14 = vpop.f32.mrf.mxu1  ;;  %v10542_v59 = vadd.f32 %v10478_v50, %v7812_v49  ;;  %3353 = vmatprep.mubr.bf16.mxu0 %v9112_v36  ;;  %v9117_v50 = vld [vmem:[#allocation2 + $0x154] ss:$12 sps:$4 sm:$0xff]   ;;  %8701 = vmatprep.subr.bf16.mxu0 %v9140_v18 }
 0x1b8   : > { %v10545_v40 = vadd.f32 %v7900_v16, %v10439_v8  ;;  %v7814_v31 = vpop.f32.mrf.mxu0  ;;  %8702 = vmatpush3.bf16.msra.mxu0 %v9140_v18  ;;  %v9141_v16 = vld [vmem:[#allocation8 + $0x110] sm:$0xff]  }
 0x1b9   : > { %v7902_v29 = vpop.f32.mrf.mxu1  ;;  %v7815_v19 = vadd.f32 %v7814_v31, %v7813_v25  ;;  %8155 = vmatprep.subr.bf16.mxu1 %v9141_v16  ;;  %v9142_v31 = vld [vmem:[#allocation8 + $0xd0] sm:$0xff]   ;;  %8703 = vmatprep.subr.bf16.mxu0 %v9145_v5  ;;  %v9148_v16 = vld [vmem:[#allocation8 + $0x158] sm:$0xff]  }
 0x1ba   : > { %v7903_v48 = vadd.f32 %v7902_v29, %v7901_v14  ;;  %v7816_v17 = vpop.f32.mrf.mxu0  ;;  %8156 = vmatpush3.bf16.msra.mxu1 %v9142_v31 }
 0x1bb   : > { %v7904_v58 = vpop.f32.mrf.mxu1  ;;  %v10548_v62 = vadd.f32 %v7815_v19, %v10487_v51 }
 0x1bc   : > { %v10551_v36 = vadd.f32 %v7903_v48, %v10444_v47  ;;  %v7817_v8 = vpop.f32.mrf.mxu0  ;;  %8704 = vmatpush3.bf16.msra.mxu0 %v9145_v5 }
 0x1bd   : > { %v7905_v11 = vpop.f32.mrf.mxu1  ;;  %v10553_v0 = vadd.f32 %v7817_v8, %v7816_v17  ;;  %8705 = vmatprep.subr.bf16.mxu0 %v9148_v16 }
 0x1be   : > { %v7906_v49 = vadd.f32 %v7905_v11, %v7904_v58  ;;  %v7819_v25 = vpop.f32.mrf.mxu0  ;;  %3354 = vmatmul.mubr.bf16.gmra.mxu0 %v9114_v23  ;;  %v9119_v58 = vld [vmem:[#allocation2 + $0x150] ss:$12 sps:$4 sm:$0xff]   ;;  %v9120_v23 = vld [vmem:[#allocation2 + $0x16c] ss:$12 sps:$4 sm:$0xff]  }
 0x1bf   : > { %v7907_v14 = vpop.f32.mrf.mxu1  ;;  %3361 = vmatprep.mubr.bf16.mxu0 %v9117_v50 }
 0x1c0   : > { %v10556_v51 = vadd.f32 %v7906_v49, %v10449_v32  ;;  %v7820_v47 = vpop.f32.mrf.mxu0  ;;  %v9143_v32 = vld [vmem:[#allocation8 + $0x108] sm:$0xff]   ;;  %8706 = vmatpush3.bf16.msra.mxu0 %v9148_v16 }
 0x1c1   : > { %v7908_v29 = vpop.f32.mrf.mxu1  ;;  %v7821_v19 = vadd.f32 %v7820_v47, %v7819_v25  ;;  %v9144_v49 = vld [vmem:[#allocation8 + $0xc8] sm:$0xff]   ;;  %8157 = vmatprep.subr.bf16.mxu1 %v9143_v32 }
 0x1c2   : > { %v7909_v48 = vadd.f32 %v7908_v29, %v7907_v14  ;;  %v7822_v17 = vpop.f32.mrf.mxu0  ;;  %8158 = vmatpush3.bf16.msra.mxu1 %v9144_v49  ;;  %v9146_v29 = vld [vmem:[#allocation8 + $0x100] sm:$0xff]  }
 0x1c3   : > { %v7910_v35 = vpop.f32.mrf.mxu1  ;;  %v10559_v18 = vadd.f32 %v10482_v13, %v7821_v19  ;;  %8159 = vmatprep.subr.bf16.mxu1 %v9146_v29 }
 0x1c4   : > { %v10562_v50 = vadd.f32 %v7909_v48, %v10455_v33  ;;  %v7823_v8 = vpop.f32.mrf.mxu0  ;;  %v9147_v48 = vld [vmem:[#allocation8 + $0xc0] sm:$0xff]  }
 0x1c5   : > { %v7911_v11 = vpop.f32.mrf.mxu1  ;;  %v7824_v25 = vadd.f32 %v7823_v8, %v7822_v17  ;;  %v9122_v8 = vld [vmem:[#allocation2 + $0x168] ss:$12 sps:$4 sm:$0xff]  }
 0x1c6   : > { %v7912_v14 = vadd.f32 %v7911_v11, %v7910_v35  ;;  %v7825_v31 = vpop.f32.mrf.mxu0  ;;  %3362 = vmatmul.mubr.bf16.gmra.mxu0 %v9119_v58  ;;  %8160 = vmatpush3.bf16.msra.mxu1 %v9147_v48 }
 0x1c7   : > { %v7913_v47 = vpop.f32.mrf.mxu1  ;;  %v10565_v13 = vadd.f32 %v10492_v52, %v7824_v25  ;;  %3369 = vmatprep.mubr.bf16.mxu0 %v9120_v23  ;;  %v9149_v52 = vld [vmem:[#allocation8 + $0x150] sm:$0xff]  }
 0x1c8   : > { %v10568_v33 = vadd.f32 %v7912_v14, %v10463_v37  ;;  %v7826_v5 = vpop.f32.mrf.mxu0  ;;  %v9125_v37 = vld [vmem:[#allocation2 + $0x184] ss:$12 sps:$4 sm:$0xff]   ;;  %8707 = vmatprep.subr.bf16.mxu0 %v9149_v52 }
 0x1c9   : > { %v7914_v19 = vpop.f32.mrf.mxu1  ;;  %v7827_v17 = vadd.f32 %v7826_v5, %v7825_v31  ;;  %8708 = vmatpush3.bf16.msra.mxu0 %v9149_v52  ;;  %v9346_v52 = vld [vmem:[#allocation2] sm:$0xff] }
 0x1ca   : > { %v7915_v35 = vadd.f32 %v7914_v19, %v7913_v47  ;;  %v10570_v32 = vpop.f32.mrf.mxu0  ;;  %v9154_v47 = vld [vmem:[#allocation8 + $0x148] sm:$0xff]  }
 0x1cb   : > { %v7916_v58 = vpop.f32.mrf.mxu1  ;;  %v10573_v23 = vadd.f32 %v7827_v17, %v10501_v9  ;;  %8709 = vmatprep.subr.bf16.mxu0 %v9154_v47 }
 0x1cc   : > { %v10576_v11 = vadd.f32 %v7915_v35, %v10470_v24  ;;  %v10578_v49 = vpop.f32.mrf.mxu0  ;;  %v9127_v35 = vld [vmem:[#allocation2 + $0x180] ss:$12 sps:$4 sm:$0xff]  }
 0x1cd   : > { %v7917_v25 = vpop.f32.mrf.mxu1  ;;  %8710 = vmatpush3.bf16.msra.mxu0 %v9154_v47 }
 0x1ce   : > { %v7918_v16 = vadd.f32 %v7917_v25, %v7916_v58  ;;  %v7831_v14 = vpop.f32.mrf.mxu0  ;;  %3370 = vmatmul.mubr.bf16.gmra.mxu0 %v9122_v8  ;;  %v7422_v8 = vcombine.high %v9346_v52, %v9346_v52  ;;  %8711 = vmatprep.subr.bf16.mxu0 %v9156_v42 }
 0x1cf   : > { %v7919_v31 = vpop.f32.mrf.mxu1  ;;  %3377 = vmatprep.mubr.bf16.mxu0 %v9125_v37 }
 0x1d0   : > { %v10581_v29 = vadd.f32 %v7918_v16, %v10476_v4  ;;  %v7832_v9 = vpop.f32.mrf.mxu0 }
 0x1d1   : > { %v7920_v5 = vpop.f32.mrf.mxu1  ;;  %v7833_v19 = vadd.f32 %v7832_v9, %v7831_v14  ;;  %8712 = vmatpush3.bf16.msra.mxu0 %v9156_v42 }
 0x1d2   : > { %v7921_v24 = vadd.f32 %v7920_v5, %v7919_v31  ;;  %v7834_v48 = vpop.f32.mrf.mxu0 }
 0x1d3   : > { %v7922_v17 = vpop.f32.mrf.mxu1  ;;  %v10584_v58 = vadd.f32 %v10499_v63, %v7833_v19 }
 0x1d4   : > { %v10587_v37 = vadd.f32 %v7921_v24, %v10485_v3  ;;  %v7835_v4 = vpop.f32.mrf.mxu0 }
 0x1d5   : > { %v7923_v25 = vpop.f32.mrf.mxu1  ;;  %v7836_v16 = vadd.f32 %v7835_v4, %v7834_v48  ;;  %v7421_v48 = vcombine.low %v9346_v52, %v9346_v52 }
 0x1d6   : > { %v7924_v22 = vadd.f32 %v7923_v25, %v7922_v17  ;;  %v7837_v14 = vpop.f32.mrf.mxu0  ;;  %3378 = vmatmul.mubr.bf16.gmra.mxu0 %v9127_v35 }
 0x1d7   : > { %v7925_v31 = vpop.f32.mrf.mxu1  ;;  %v10590_v47 = vadd.f32 %v10506_v10, %v7836_v16  ;;  %3385 = vmatprep.mubr.bf16.mxu0 %v7422_v8 }
 0x1d8   : > { %v10593_v63 = vadd.f32 %v7924_v22, %v10490_v56  ;;  %v7838_v9 = vpop.f32.mrf.mxu0 }
 0x1d9   : > { %v7926_v5 = vpop.f32.mrf.mxu1  ;;  %v7839_v3 = vadd.f32 %v7838_v9, %v7837_v14 }
 0x1da   : > { %v7927_v19 = vadd.f32 %v7926_v5, %v7925_v31  ;;  %v10595_v24 = vpop.f32.mrf.mxu0 }
 0x1db   : > { %v7928_v41 = vpop.f32.mrf.mxu1  ;;  %v10598_v42 = vadd.f32 %v7839_v3, %v10515_v34  ;;  %v10610_v34 = vld [vmem:[#allocation8 + $0xb8] sm:$0xff]  }
 0x1dc   : > { %v10601_v17 = vadd.f32 %v7927_v19, %v10497_v15  ;;  %v10603_v10 = vpop.f32.mrf.mxu0  ;;  %8745 = vmatprep.subr.bf16.mxu1 %v10610_v34 }
 0x1dd   : > { %v7929_v35 = vpop.f32.mrf.mxu1 }
 0x1de   : > { %v7930_v8 = vadd.f32 %v7929_v35, %v7928_v41  ;;  %v7843_v22 = vpop.f32.mrf.mxu0  ;;  %3386 = vmatmul.mubr.bf16.gmra.mxu0 %v7421_v48 }
 0x1df   : > { %v7931_v56 = vpop.f32.mrf.mxu1 }
 0x1e0   : > { %v10606_v4 = vadd.f32 %v7930_v8, %v10504_v26  ;;  %v7844_v25 = vpop.f32.mrf.mxu0 }
 0x1e1   : > { %v7932_v16 = vpop.f32.mrf.mxu1  ;;  %v10608_v14 = vadd.f32 %v7844_v25, %v7843_v22 }
 0x1e2   : > { %v7933_v52 = vadd.f32 %v7932_v16, %v7931_v56  ;;  %v10612_v31 = vpop.f32.mrf.mxu0 }
 0x1e3   : > { %v7934_v15 = vpop.f32.mrf.mxu1 }
 0x1e4   : > { %v2488_v9 = vadd.f32 %v7933_v52, %v10513_v46  ;;  %v10616_v41 = vpop.f32.mrf.mxu0 }
 0x1e5   : > { %v7935_v5 = vpop.f32.mrf.mxu1 }
 0x1e6   : > { %v7936_v3 = vadd.f32 %v7935_v5, %v7934_v15  ;;  %v8619_v19 = vpop.f32.mrf.mxu0 }
 0x1e7   : > { %v7937_v26 = vpop.f32.mrf.mxu1  ;;  %v10619_v48 = vadd.f32 %v8619_v19, %v10539_v2  ;;  %v1938_v2 = vadd.f32 %v10530_v53, %v10480_v45 }
 0x1e8   : > { %v2491_v35 = vadd.f32 %v7936_v3, %v10520_v57  ;;  %v2592_v22 = vpop.f32.mrf.mxu0 }
 0x1e9   : > { %v7938_v8 = vpop.f32.mrf.mxu1  ;;  %v10623_v25 = vadd.f32 %v2592_v22, %v10528_v55 }
 0x1ea   : > { %v7939_v56 = vadd.f32 %v7938_v8, %v7937_v26  ;;  %v8620_v16 = vpop.f32.mrf.mxu0 }
 0x1eb   : > { %v7940_v46 = vpop.f32.mrf.mxu1  ;;  %v10626_v52 = vadd.f32 %v8620_v16, %v10545_v40 }
 0x1ec   : > { %v2496_v15 = vadd.f32 %v7939_v56, %v10525_v7  ;;  %v10629_v28 = vpop.f32.mrf.mxu0 }
 0x1ed   : > { %v7941_v5 = vpop.f32.mrf.mxu1 }
 0x1ee   : > { %v7942_v57 = vadd.f32 %v7941_v5, %v7940_v46  ;;  %v8623_v19 = vpop.f32.mrf.mxu0 }
 0x1ef   : > { %v7943_v3 = vpop.f32.mrf.mxu1  ;;  %v10634_v26 = vadd.f32 %v8623_v19, %v10562_v50 }
 0x1f0   : > { %v10636_v55 = vadd.f32 %v7942_v57, %v1938_v2  ;;  %v2608_v22 = vpop.f32.mrf.mxu0 }
 0x1f1   : > { %v7944_v8 = vpop.f32.mrf.mxu1  ;;  %v10639_v16 = vadd.f32 %v2608_v22, %v10551_v36 }
 0x1f2   : > { %v7945_v40 = vadd.f32 %v7944_v8, %v7943_v3  ;;  %v8624_v56 = vpop.f32.mrf.mxu0 }
 0x1f3   : > { %v7946_v7 = vpop.f32.mrf.mxu1  ;;  %v10642_v43 = vadd.f32 %v8624_v56, %v10568_v33 }
 0x1f4   : > { %v2504_v45 = vadd.f32 %v7945_v40, %v10536_v6  ;;  %v10645_v46 = vpop.f32.mrf.mxu0 }
 0x1f5   : > { %v7947_v53 = vpop.f32.mrf.mxu1 }
 0x1f6   : > { %v7948_v50 = vadd.f32 %v7947_v53, %v7946_v7  ;;  %v8627_v2 = vpop.f32.mrf.mxu0 }
 0x1f7   : > { %v7949_v5 = vpop.f32.mrf.mxu1  ;;  %v10648_v57 = vadd.f32 %v8627_v2, %v10587_v37  ;;  %v1954_v37 = vadd.f32 %v10553_v0, %v10494_v30 }
 0x1f8   : > { %v2507_v3 = vadd.f32 %v7948_v50, %v10542_v59  ;;  %v2624_v19 = vpop.f32.mrf.mxu0 }
 0x1f9   : > { %v7950_v36 = vpop.f32.mrf.mxu1  ;;  %v10652_v22 = vadd.f32 %v2624_v19, %v10576_v11 }
 0x1fa   : > { %v7951_v8 = vadd.f32 %v7950_v36, %v7949_v5  ;;  %v8628_v56 = vpop.f32.mrf.mxu0 }
 0x1fb   : > { %v7952_v33 = vpop.f32.mrf.mxu1  ;;  %v10655_v6 = vadd.f32 %v8628_v56, %v10593_v63 }
 0x1fc   : > { %v2512_v40 = vadd.f32 %v7951_v8, %v10548_v62  ;;  %v10658_v53 = vpop.f32.mrf.mxu0 }
 0x1fd   : > { %v7953_v7 = vpop.f32.mrf.mxu1 }
 0x1fe   : > { %v7954_v59 = vadd.f32 %v7953_v7, %v7952_v33  ;;  %v8631_v2 = vpop.f32.mrf.mxu0 }
 0x1ff   : > { %v7955_v50 = vpop.f32.mrf.mxu1  ;;  %v10662_v5 = vadd.f32 %v8631_v2, %v2488_v9 }
 0x200   : > { %v10664_v11 = vadd.f32 %v7954_v59, %v1954_v37  ;;  %v2640_v19 = vpop.f32.mrf.mxu0 }
 0x201   : > { %v7956_v36 = vpop.f32.mrf.mxu1  ;;  %v10667_v63 = vadd.f32 %v2640_v19, %v10601_v17  ;;  %v7830_v17 = vadd.f32 %v10578_v49, %v10570_v32 }
 0x202   : > { %11871 = vst [vmem:[#allocation45_spill] sm:$0xff] %v10664_v11  ;;  %v7957_v27 = vadd.f32 %v7956_v36, %v7955_v50  ;;  %v8632_v8 = vpop.f32.mrf.mxu0 }
 0x203   : > { %v7958_v62 = vpop.f32.mrf.mxu1  ;;  %v10669_v56 = vadd.f32 %v8632_v8, %v2491_v35 }
 0x204   : > { %v2520_v38 = vadd.f32 %v7957_v27, %v10559_v18  ;;  %v10672_v0 = vpop.f32.mrf.mxu0 }
 0x205   : > { %v7959_v30 = vpop.f32.mrf.mxu1 }
 0x206   : > { %v7960_v33 = vadd.f32 %v7959_v30, %v7958_v62  ;;  %v8635_v7 = vpop.f32.mrf.mxu0 }
 0x207   : > { %v7961_v9 = vpop.f32.mrf.mxu1  ;;  %v10674_v37 = vadd.f32 %v8635_v7, %v2504_v45  ;;  %v1970_v45 = vadd.f32 %v7830_v17, %v10508_v39 }
 0x208   : > { %v2523_v59 = vadd.f32 %v7960_v33, %v10565_v13  ;;  %v2656_v2 = vpop.f32.mrf.mxu0 }
 0x209   : > { %v7962_v50 = vpop.f32.mrf.mxu1  ;;  %v10679_v35 = vadd.f32 %v2656_v2, %v2496_v15 }
 0x20a   : > { %v7963_v36 = vadd.f32 %v7962_v50, %v7961_v9  ;;  %v8636_v27 = vpop.f32.mrf.mxu0 }
 0x20b   : > { %v7964_v19 = vpop.f32.mrf.mxu1  ;;  %v10681_v18 = vadd.f32 %v8636_v27, %v2507_v3 }
 0x20c   : > { %v2528_v62 = vadd.f32 %v7963_v36, %v10573_v23  ;;  %v10684_v30 = vpop.f32.mrf.mxu0 }
 0x20d   : > { %v7965_v8 = vpop.f32.mrf.mxu1 }
 0x20e   : > { %v7966_v13 = vadd.f32 %v7965_v8, %v7964_v19  ;;  %v8639_v7 = vpop.f32.mrf.mxu0 }
 0x20f   : > { %v7967_v33 = vpop.f32.mrf.mxu1  ;;  %v10687_v11 = vadd.f32 %v8639_v7, %v2520_v38 }
 0x210   : > { %v10689_v32 = vadd.f32 %v7966_v13, %v1970_v45  ;;  %v2672_v15 = vpop.f32.mrf.mxu0 }
 0x211   : > { %v7968_v49 = vpop.f32.mrf.mxu1  ;;  %v10691_v50 = vadd.f32 %v2672_v15, %v2512_v40  ;;  %v7842_v40 = vadd.f32 %v10603_v10, %v10595_v24 }
 0x212   : > { %v7969_v9 = vadd.f32 %v7968_v49, %v7967_v33  ;;  %v8640_v2 = vpop.f32.mrf.mxu0 }
 0x213   : > { %v7970_v3 = vpop.f32.mrf.mxu1  ;;  %v10693_v23 = vadd.f32 %v8640_v2, %v2523_v59 }
 0x214   : > { %v2536_v36 = vadd.f32 %v7969_v9, %v10584_v58  ;;  %v10696_v39 = vpop.f32.mrf.mxu0 }
 0x215   : > { %v7971_v27 = vpop.f32.mrf.mxu1 }
 0x216   : > { %v7972_v17 = vadd.f32 %v7971_v27, %v7970_v3  ;;  %v8643_v38 = vpop.f32.mrf.mxu0 }
 0x217   : > { %v7973_v19 = vpop.f32.mrf.mxu1  ;;  %v10698_v8 = vadd.f32 %v8643_v38, %v2536_v36  ;;  %v1986_v36 = vadd.f32 %v7842_v40, %v10522_v20 }
 0x218   : > { %v2539_v45 = vadd.f32 %v7972_v17, %v10590_v47  ;;  %v2688_v33 = vpop.f32.mrf.mxu0 }
 0x219   : > { %v7974_v13 = vpop.f32.mrf.mxu1  ;;  %v10703_v59 = vadd.f32 %v2688_v33, %v2528_v62  ;;  %v1991_v62 = vadd.f32 %v10510_v12, %v10608_v14 }
 0x21a   : > { %v7975_v7 = vadd.f32 %v7974_v13, %v7973_v19  ;;  %v8644_v58 = vpop.f32.mrf.mxu0  ;;  %v7848_v19 = vadd.f32 %v10616_v41, %v10612_v31  ;;  %v9193_v31 = vld [vmem:[#allocation8 + $0x78] sm:$0xff]  }
 0x21b   : > { %v7976_v49 = vpop.f32.mrf.mxu1  ;;  %v10705_v15 = vadd.f32 %v8644_v58, %v2539_v45  ;;  %8281 = vmatprep.subr.bf16.mxu0 %v9193_v31 }
 0x21c   : > { %v2544_v9 = vadd.f32 %v7975_v7, %v10598_v42  ;;  %v10708_v2 = vpop.f32.mrf.mxu0 }
 0x21d   : > { %11872 = vst [vmem:[#allocation46_spill] sm:$0xff] %v10705_v15  ;;  %v7977_v3 = vpop.f32.mrf.mxu1 }
 0x21e   : > { %v7978_v47 = vadd.f32 %v7977_v3, %v7976_v49  ;;  %v8647_v17 = vpop.f32.mrf.mxu0  ;;  %v1994_v49 = vadd.f32 %v10517_v21, %v7848_v19  ;;  %v10729_v21 = vld [vmem:[%s11715_s2] ss:$0 sm:$0xff] }
 0x21f   : > { %v7979_v27 = vpop.f32.mrf.mxu1 }
 0x220   : > { %v10711_v38 = vadd.f32 %v7978_v47, %v1986_v36  ;;  %v2704_v10 = vpop.f32.mrf.mxu0 }
 0x221   : > { %v7980_v24 = vpop.f32.mrf.mxu1  ;;  %v10717_v42 = vadd.f32 %v2704_v10, %v2544_v9 }
 0x222   : > { %v7981_v45 = vadd.f32 %v7980_v24, %v7979_v27  ;;  %v8648_v33 = vpop.f32.mrf.mxu0 }
 0x223   : > { %11873 = vst [vmem:[#allocation47_spill] sm:$0xff] %v10717_v42  ;;  %v7982_v13 = vpop.f32.mrf.mxu1 }
 0x224   : > { %v2552_v7 = vadd.f32 %v7981_v45, %v1991_v62  ;;  %v10719_v40 = vpop.f32.mrf.mxu0 }
 0x225   : > { %v7983_v20 = vpop.f32.mrf.mxu1 }
 0x226   : > { %v10722_v58 = vadd.f32 %v8647_v17, %v2552_v7  ;;  %v7984_v3 = vadd.f32 %v7983_v20, %v7982_v13  ;;  %v8025_v36 = vpop.f32.mrf.mxu0 }
 0x227   : > { %v8667_v47 = vpop.f32.mrf.mxu1 }
 0x228   : > { %11874 = vst [vmem:[#allocation48_spill] sm:$0xff] %v10722_v58  ;;  %v2555_v12 = vadd.f32 %v7984_v3, %v1994_v49  ;;  %v8026_v14 = vpop.f32.mrf.mxu0 }
 0x229   : > { %v3428_v15 = vpop.f32.mrf.mxu1  ;;  %v8027_v9 = vadd.f32 %v8026_v14, %v8025_v36 }
 0x22a   : > { %v10724_v41 = vadd.f32 %v8648_v33, %v2555_v12  ;;  %v8028_v27 = vpop.f32.mrf.mxu0  ;;  %v2596_v33 = vadd.f32 %v10629_v28, %v10533_v60 }
 0x22b   : > { %v8668_v24 = vpop.f32.mrf.mxu1  ;;  %v3429_v10 = vadd.f32 %v8027_v9, %v3428_v15 }
 0x22c   : > { %11875 = vst [vmem:[#allocation49_spill] sm:$0xff] %v10724_v41  ;;  %v8029_v17 = vpop.f32.mrf.mxu0 }
 0x22d   : > { %v3555_v62 = vadd.f32 %v3429_v10, %v10623_v25  ;;  %v8030_v19 = vadd.f32 %v8029_v17, %v8028_v27  ;;  %v3431_v45 = vpop.f32.mrf.mxu1 }
 0x22e   : > { %v8031_v13 = vpop.f32.mrf.mxu0 }
 0x22f   : > { %v3594_v7 = vadd.f32 %v10729_v21, %v3555_v62  ;;  %v3432_v20 = vadd.f32 %v8030_v19, %v3431_v45  ;;  %v10735_v14 = vpop.f32.mrf.mxu1 }
 0x230   : > { %v8032_v49 = vpop.f32.mrf.mxu0 }
 0x231   : > { %v3626_v3 = vmax.f32 %v3594_v7, 0.0  ;;  %v3556_v15 = vadd.f32 %v3432_v20, %v2596_v33  ;;  %v8033_v36 = vadd.f32 %v8032_v49, %v8031_v13  ;;  %v3444_v62 = vpop.f32.mrf.mxu1  ;;  %v4042_v20 = vld [vmem:[#allocation2 + $0x18] sm:$0xf] }
 0x232   : > { %v8034_v12 = vpop.f32.mrf.mxu0 }
 0x233   : > { %v7704_v31 = vpack.c.bf16 %v3626_v3, %v3626_v3  ;;  %v3595_v9 = vadd.f32 %v10729_v21, %v3556_v15  ;;  %v3437_v25 = vadd.f32 %v8667_v47, %v8033_v36 }
 0x234   : > { %v8035_v27 = vpop.f32.mrf.mxu0 }
 0x235   : > { %v3755_v10 = vshrl.u32 %v7704_v31, 16  ;;  %v3758_v17 = vshll.u32 %v7704_v31, 16  ;;  %4138 = vst [vmem:[#allocation2 + $0x1c] sm:$0xf] %v7704_v31  ;;  %v3627_v41 = vmax.f32 %v3595_v9, 0.0  ;;  %v3557_v28 = vadd.f32 %v3437_v25, %v10619_v48 }
 0x236   : > { %v8036_v60 = vadd.f32 %v8035_v27, %v8034_v12  ;;  %v8037_v19 = vpop.f32.mrf.mxu0  ;;  %v10741_v12 = vpop.f32.mrf.mxu1 }
 0x237   : > { %v3757_v45 = vrot.slane %v3755_v10, 7  ;;  %v4170_v33 = vrot.slane %v3755_v10, 4  ;;  %v4171_v13 = vrot.slane %v3758_v17, 5  ;;  %v7705_v7 = vpack.c.bf16 %v3627_v41, %v3627_v41 }
 0x238   : > { %v3596_v49 = vadd.f32 %v10729_v21, %v3557_v28  ;;  %v3440_v3 = vadd.f32 %v8668_v24, %v8036_v60  ;;  %v8038_v15 = vpop.f32.mrf.mxu0 }
 0x239   : > { %v3760_v47 = vor.u32 %v3758_v17, %v3757_v45  ;;  %v4172_v36 = vor.u32 %v4171_v13, %v4170_v33  ;;  %v3763_v58 = vshrl.u32 %v7705_v7, 16  ;;  %4139 = vst [vmem:[#allocation2 + $0x28] sm:$0xf] %v7705_v7  ;;  %v3766_v31 = vshll.u32 %v7705_v7, 16 }
 0x23a   : > { %v3628_v9 = vmax.f32 %v3596_v49, 0.0  ;;  %v3558_v48 = vadd.f32 %v3440_v3, %v10626_v52  ;;  %v8039_v25 = vadd.f32 %v8038_v15, %v8037_v19  ;;  %v8040_v27 = vpop.f32.mrf.mxu0  ;;  %v2612_v52 = vadd.f32 %v10645_v46, %v10556_v51 }
 0x23b   : > { %v4043_v41 = vsel %vm9746_vm13, %v3760_v47, %v4042_v20  ;;  %v4173_v10 = vrot.slane %v4172_v36, 4  ;;  %v3765_v42 = vrot.slane %v3763_v58, 7  ;;  %v4176_v28 = vrot.slane %v3763_v58, 4  ;;  %v3447_v58 = vpop.f32.mrf.mxu1 }
 0x23c   : > { %4044 = vst [vmem:[#allocation2 + $0x18] sm:$0xf] %v4043_v41  ;;  %v4174_v24 = vrot.slane %v3766_v31, 5  ;;  %v7706_v17 = vpack.c.bf16 %v3628_v9, %v3628_v9  ;;  %v3597_v60 = vadd.f32 %v10729_v21, %v3558_v48  ;;  %v3445_v33 = vadd.f32 %v8039_v25, %v3444_v62  ;;  %v8041_v13 = vpop.f32.mrf.mxu0  ;;  %v4347_v62 = vld [vmem:[#allocation2 + $0x2c] sm:$0xf] }
 0x23d   : > { %v3761_v7 = vrot.slane %v3757_v45, 4  ;;  %v3768_v49 = vor.u32 %v3766_v31, %v3765_v42  ;;  %v8042_v19 = vadd.f32 %v8041_v13, %v8040_v27  ;;  %v4046_v41 = vld [vmem:[#allocation2 + $0x30] sm:$0xf] }
 0x23e   : > { %v4175_v3 = vsel %vm9735_vm12, %v4173_v10, %v4174_v24  ;;  %v4177_v20 = vor.u32 %v4176_v28, %v4174_v24  ;;  %v3771_v15 = vshrl.u32 %v7706_v17, 16  ;;  %v3774_v47 = vshll.u32 %v7706_v17, 16  ;;  %4140 = vst [vmem:[#allocation2 + $0x34] sm:$0xf] %v7706_v17  ;;  %v8043_v36 = vpop.f32.mrf.mxu0 }
 0x23f   : > { %v3769_v9 = vsel %vm9723_vm11, %v3761_v7, %v3768_v49  ;;  %4346 = vst [vmem:[#allocation2 + $0x20] sm:$0xf] %v4175_v3  ;;  %v3629_v48 = vmax.f32 %v3597_v60, 0.0  ;;  %v3559_v51 = vadd.f32 %v3445_v33, %v10639_v16  ;;  %v3448_v46 = vadd.f32 %v8042_v19, %v3447_v58 }
 0x240   : > { %4045 = vst [vmem:[#allocation2 + $0x24] sm:$0xf] %v3769_v9  ;;  %v4178_v42 = vrot.slane %v4177_v20, 4  ;;  %v3773_v45 = vrot.slane %v3771_v15, 7  ;;  %v4179_v31 = vrot.slane %v3771_v15, 4  ;;  %v4180_v25 = vrot.slane %v3774_v47, 5  ;;  %v8044_v27 = vpop.f32.mrf.mxu0  ;;  %v10757_v20 = vpop.f32.mrf.mxu1 }
 0x241   : > { %v7707_v10 = vpack.c.bf16 %v3629_v48, %v3629_v48  ;;  %v3598_v28 = vadd.f32 %v10729_v21, %v3559_v51  ;;  %v3560_v24 = vadd.f32 %v3448_v46, %v2612_v52  ;;  %v8045_v17 = vadd.f32 %v8044_v27, %v8043_v36 }
 0x242   : > { %v4348_v13 = vsel %vm9752_vm14, %v4178_v42, %v4347_v62  ;;  %v3776_v7 = vor.u32 %v3774_v47, %v3773_v45  ;;  %v4181_v60 = vor.u32 %v4180_v25, %v4179_v31  ;;  %v8046_v49 = vpop.f32.mrf.mxu0  ;;  %v10761_v15 = vadd.f32 %v10658_v53, %v10581_v29 }
 0x243   : > { %4349 = vst [vmem:[#allocation2 + $0x2c] sm:$0xf] %v4348_v13  ;;  %v3779_v16 = vshrl.u32 %v7707_v10, 16  ;;  %v3782_v33 = vshll.u32 %v7707_v10, 16  ;;  %4141 = vst [vmem:[#allocation2 + $0x40] sm:$0xf] %v7707_v10  ;;  %v3599_v3 = vadd.f32 %v10729_v21, %v3560_v24  ;;  %v3453_v47 = vadd.f32 %v10735_v14, %v8045_v17  ;;  %v3460_v14 = vpop.f32.mrf.mxu1 }
 0x244   : > { %v3630_v19 = vmax.f32 %v3598_v28, 0.0  ;;  %v4047_v52 = vsel %vm9746_vm13, %v3776_v7, %v4046_v41  ;;  %v4182_v58 = vrot.slane %v4181_v60, 4  ;;  %v8047_v36 = vpop.f32.mrf.mxu0  ;;  %v3777_v46 = vrot.slane %v3773_v45, 4  ;;  %v9152_v24 = vld [vmem:[#allocation2 + $0x1c] ss:$12 sps:$4 sm:$0xff]  }
 0x245   : > { %4048 = vst [vmem:[#allocation2 + $0x30] sm:$0xf] %v4047_v52  ;;  %v3781_v9 = vrot.slane %v3779_v16, 7  ;;  %v4183_v62 = vrot.slane %v3782_v33, 5  ;;  %v4185_v48 = vrot.slane %v3779_v16, 4  ;;  %v3631_v42 = vmax.f32 %v3599_v3, 0.0  ;;  %5067 = vmatprep.mubr.bf16.mxu1 %v9152_v24 }
 0x246   : > { %v7708_v51 = vpack.c.bf16 %v3630_v19, %v3630_v19  ;;  %v3561_v31 = vadd.f32 %v3453_v47, %v10634_v26  ;;  %v8048_v25 = vadd.f32 %v8047_v36, %v8046_v49  ;;  %v8049_v27 = vpop.f32.mrf.mxu0  ;;  %v4351_v17 = vld [vmem:[#allocation2 + $0x44] sm:$0xf]  ;;  %v4050_v3 = vld [vmem:[#allocation2 + $0x48] sm:$0xf] }
 0x247   : > { %v3784_v29 = vor.u32 %v3782_v33, %v3781_v9  ;;  %v4184_v53 = vsel %vm9735_vm12, %v4182_v58, %v4183_v62  ;;  %v4186_v41 = vor.u32 %v4185_v48, %v4183_v62  ;;  %v9150_v28 = vld [vmem:[#allocation2 + $0x18] ss:$12 sps:$4 sm:$0xff]   ;;  %v7709_v7 = vpack.c.bf16 %v3631_v42, %v3631_v42  ;;  %v10776_v42 = vpop.f32.mrf.mxu1 }
 0x248   : > { %v3787_v10 = vshrl.u32 %v7708_v51, 16  ;;  %4142 = vst [vmem:[#allocation2 + $0x4c] sm:$0xf] %v7708_v51  ;;  %4350 = vst [vmem:[#allocation2 + $0x38] sm:$0xf] %v4184_v53  ;;  %v3790_v13 = vshll.u32 %v7708_v51, 16  ;;  %v3600_v45 = vadd.f32 %v10729_v21, %v3561_v31  ;;  %v3456_v26 = vadd.f32 %v10741_v12, %v8048_v25  ;;  %v8050_v60 = vpop.f32.mrf.mxu0  ;;  %5068 = vmatmul.mubr.bf16.vlgmr.msra.gmra.mxu1 %v9150_v28 }
 0x249   : > { %v9164_v49 = vld [vmem:[#allocation8 + $0xb0] sm:$0xff]   ;;  %v3785_v16 = vsel %vm9723_vm11, %v3777_v46, %v3784_v29  ;;  %v4187_v33 = vrot.slane %v4186_v41, 4  ;;  %v3795_v47 = vshrl.u32 %v7709_v7, 16  ;;  %v3798_v36 = vshll.u32 %v7709_v7, 16  ;;  %4143 = vst [vmem:[#allocation2 + $0x58] sm:$0xf] %v7709_v7  ;;  %8746 = vmatpush3.bf16.msra.mxu1 %v10610_v34 }
 0x24a   : > { %v3789_v19 = vrot.slane %v3787_v10, 7  ;;  %v4188_v52 = vrot.slane %v3787_v10, 4  ;;  %4049 = vst [vmem:[#allocation2 + $0x3c] sm:$0xf] %v3785_v16  ;;  %v4189_v58 = vrot.slane %v3790_v13, 5  ;;  %v3632_v9 = vmax.f32 %v3600_v45, 0.0  ;;  %v8052_v62 = vpop.f32.mrf.mxu0  ;;  %8747 = vmatprep.subr.bf16.mxu1 %v9164_v49 }
 0x24b   : > { %v4352_v12 = vsel %vm9752_vm14, %v4187_v33, %v4351_v17  ;;  %v3562_v46 = vadd.f32 %v3456_v26, %v10642_v43  ;;  %v9155_v31 = vld [vmem:[#allocation2 + $0x20] ss:$12 sps:$4 sm:$0xff]   ;;  %v3797_v29 = vrot.slane %v3795_v47, 7  ;;  %v4192_v53 = vrot.slane %v3798_v36, 5  ;;  %v9173_v28 = vld [vmem:[#allocation8 + $0xa8] sm:$0xff]  }
 0x24c   : > { %v3792_v48 = vor.u32 %v3790_v13, %v3789_v19  ;;  %v3793_v51 = vrot.slane %v3789_v19, 4  ;;  %4353 = vst [vmem:[#allocation2 + $0x44] sm:$0xf] %v4352_v12  ;;  %v4190_v25 = vor.u32 %v4189_v58, %v4188_v52  ;;  %v4194_v41 = vrot.slane %v3795_v47, 4  ;;  %v8053_v10 = vpop.f32.mrf.mxu0  ;;  %8713 = vmatprep.mubr.bf16.mxu0 %v9155_v31  ;;  %v4355_v26 = vld [vmem:[#allocation2 + $0x5c] sm:$0xf]  ;;  %v3463_v12 = vpop.f32.mrf.mxu1 }
 0x24d   : > { %v7710_v17 = vpack.c.bf16 %v3632_v9, %v3632_v9  ;;  %v3601_v13 = vadd.f32 %v10729_v21, %v3562_v46  ;;  %v8051_v43 = vadd.f32 %v8050_v60, %v8049_v27  ;;  %v3800_v45 = vor.u32 %v3798_v36, %v3797_v29  ;;  %8748 = vmatpush3.bf16.msra.mxu1 %v9164_v49  ;;  %v4054_v9 = vld [vmem:[#allocation2 + $0x60] sm:$0xf] }
 0x24e   : > { %v4051_v24 = vsel %vm9746_vm13, %v3792_v48, %v4050_v3  ;;  %v4191_v7 = vrot.slane %v4190_v25, 4  ;;  %v4195_v34 = vor.u32 %v4194_v41, %v4192_v53  ;;  %v8054_v16 = vadd.f32 %v8053_v10, %v8052_v62  ;;  %v8055_v33 = vpop.f32.mrf.mxu0  ;;  %8749 = vmatprep.subr.bf16.mxu1 %v9173_v28  ;;  %v9182_v62 = vld [vmem:[#allocation8 + $0xa0] sm:$0xff]  }
 0x24f   : > { %4052 = vst [vmem:[#allocation2 + $0x48] sm:$0xf] %v4051_v24  ;;  %v3803_v19 = vshrl.u32 %v7710_v17, 16  ;;  %v3806_v52 = vshll.u32 %v7710_v17, 16  ;;  %4144 = vst [vmem:[#allocation2 + $0x64] sm:$0xf] %v7710_v17  ;;  %v3461_v47 = vadd.f32 %v8051_v43, %v3460_v14  ;;  %v3801_v3 = vsel %vm9723_vm11, %v3793_v51, %v3800_v45 }
 0x250   : > { %v3633_v58 = vmax.f32 %v3601_v13, 0.0  ;;  %v4193_v27 = vsel %vm9735_vm12, %v4191_v7, %v4192_v53  ;;  %v4196_v60 = vrot.slane %v4195_v34, 4  ;;  %v3464_v36 = vadd.f32 %v8054_v16, %v3463_v12  ;;  %v8056_v48 = vpop.f32.mrf.mxu0  ;;  %4053 = vst [vmem:[#allocation2 + $0x54] sm:$0xf] %v3801_v3  ;;  %v9159_v24 = vld [vmem:[#allocation2 + $0x34] ss:$12 sps:$4 sm:$0xff]   ;;  %v10802_v12 = vpop.f32.mrf.mxu1 }
 0x251   : > { %4354 = vst [vmem:[#allocation2 + $0x50] sm:$0xf] %v4193_v27  ;;  %v10786_v46 = vrot.slane %v3803_v19, 7  ;;  %v4197_v31 = vrot.slane %v3803_v19, 4  ;;  %v4198_v14 = vrot.slane %v3806_v52, 5  ;;  %v3563_v29 = vadd.f32 %v3461_v47, %v10652_v22  ;;  %v9194_v17 = vld [vmem:[#allocation8 + $0x38] sm:$0xff]   ;;  %8750 = vmatpush3.bf16.msra.mxu1 %v9173_v28  ;;  %5075 = vmatprep.mubr.bf16.mxu1 %v9159_v24 }
 0x252   : > { %v7711_v25 = vpack.c.bf16 %v3633_v58, %v3633_v58  ;;  %v9157_v49 = vld [vmem:[#allocation2 + $0x30] ss:$12 sps:$4 sm:$0xff]   ;;  %v4356_v51 = vsel %vm9752_vm14, %v4196_v60, %v4355_v26  ;;  %v3564_v53 = vadd.f32 %v3464_v36, %v10761_v15  ;;  %v8057_v41 = vadd.f32 %v8056_v48, %v8055_v33  ;;  %v8058_v10 = vpop.f32.mrf.mxu0  ;;  %v9199_v26 = vld [vmem:[#allocation8 + $0x70] sm:$0xff]   ;;  %8751 = vmatprep.subr.bf16.mxu1 %v9182_v62 }
 0x253   : > { %v10794_v13 = vadd.f32 %v10672_v0, %v10606_v4  ;;  %4357 = vst [vmem:[#allocation2 + $0x5c] sm:$0xf] %v4356_v51  ;;  %v3808_v43 = vor.u32 %v3806_v52, %v10786_v46  ;;  %v4199_v7 = vor.u32 %v4198_v14, %v4197_v31  ;;  %v9160_v34 = vld [vmem:[#allocation2 + $0x38] ss:$12 sps:$4 sm:$0xff]   ;;  %v3602_v15 = vadd.f32 %v10729_v21, %v3563_v29  ;;  %v9191_v4 = vld [vmem:[#allocation8 + $0x98] sm:$0xff]  }
 0x254   : > { %v3811_v45 = vshrl.u32 %v7711_v25, 16  ;;  %4145 = vst [vmem:[#allocation2 + $0x70] sm:$0xf] %v7711_v25  ;;  %v3814_v22 = vshll.u32 %v7711_v25, 16  ;;  %v3603_v16 = vadd.f32 %v10729_v21, %v3564_v53  ;;  %v3469_v33 = vadd.f32 %v10757_v20, %v8057_v41  ;;  %v8059_v19 = vpop.f32.mrf.mxu0  ;;  %5076 = vmatmul.mubr.bf16.gmra.mxu1 %v9157_v49  ;;  %8714 = vmatmul.mubr.bf16.vlgmr.msra.gmra.mxu0 %v9160_v34  ;;  %v9200_v36 = vld [vmem:[#allocation8 + $0x30] sm:$0xff]   ;;  %v9206_v51 = vld [vmem:[#allocation8 + $0x68] sm:$0xff]  }
 0x255   : > { %v4055_v0 = vsel %vm9746_vm13, %v3808_v43, %v4054_v9  ;;  %v4200_v52 = vrot.slane %v4199_v7, 4  ;;  %v3634_v3 = vmax.f32 %v3602_v15, 0.0  ;;  %8282 = vmatpush3.bf16.msra.mxu0 %v9194_v17  ;;  %v10807_v48 = vadd.f32 %v10684_v30, %v10636_v55  ;;  %v4359_v14 = vld [vmem:[#allocation2 + $0x74] sm:$0xf]  ;;  %8752 = vmatpush3.bf16.msra.mxu1 %v9182_v62  ;;  %v10810_v49 = vld [vmem:[#allocation8 + $0x90] sm:$0xff]   ;;  %v9207_v30 = vld [vmem:[#allocation8 + $0x28] sm:$0xff]   ;;  %v3476_v43 = vpop.f32.mrf.mxu1 }
 0x256   : > { %v3813_v58 = vrot.slane %v3811_v45, 7  ;;  %v4203_v47 = vrot.slane %v3811_v45, 4  ;;  %4056 = vst [vmem:[#allocation2 + $0x60] sm:$0xf] %v4055_v0  ;;  %v4201_v28 = vrot.slane %v3814_v22, 5  ;;  %v3635_v27 = vmax.f32 %v3603_v16, 0.0  ;;  %v8061_v60 = vpop.f32.mrf.mxu0  ;;  %8283 = vmatprep.subr.bf16.mxu0 %v9199_v26  ;;  %8753 = vmatprep.subr.bf16.mxu1 %v9191_v4 }
 0x257   : > { %v3565_v20 = vadd.f32 %v3469_v33, %v10648_v57  ;;  %v3809_v9 = vrot.slane %v10786_v46, 4  ;;  %v8060_v25 = vadd.f32 %v8059_v19, %v8058_v10  ;;  %v7712_v53 = vpack.c.bf16 %v3634_v3, %v3634_v3  ;;  %v9161_v17 = vld [vmem:[#allocation2 + $0x48] ss:$12 sps:$4 sm:$0xff]   ;;  %v9163_v55 = vld [vmem:[#allocation2 + $0x4c] ss:$12 sps:$4 sm:$0xff]  }
 0x258   : > { %v3816_v31 = vor.u32 %v3814_v22, %v3813_v58  ;;  %v4202_v57 = vsel %vm9735_vm12, %v4200_v52, %v4201_v28  ;;  %v4204_v29 = vor.u32 %v4203_v47, %v4201_v28  ;;  %v7713_v41 = vpack.c.bf16 %v3635_v27, %v3635_v27  ;;  %v8062_v24 = vpop.f32.mrf.mxu0  ;;  %v9212_v45 = vld [vmem:[#allocation8 + $0x60] sm:$0xff]   ;;  %5083 = vmatprep.mubr.bf16.mxu1 %v9163_v55  ;;  %v4058_v28 = vld [vmem:[#allocation2 + $0x78] sm:$0xf] }
 0x259   : > { %4358 = vst [vmem:[#allocation2 + $0x68] sm:$0xf] %v4202_v57  ;;  %v3604_v62 = vadd.f32 %v10729_v21, %v3565_v20  ;;  %v3472_v10 = vadd.f32 %v10776_v42, %v8060_v25  ;;  %v8063_v7 = vadd.f32 %v8062_v24, %v8061_v60  ;;  %v3819_v26 = vshrl.u32 %v7712_v53, 16  ;;  %4146 = vst [vmem:[#allocation2 + $0x7c] sm:$0xf] %v7712_v53  ;;  %v9217_v60 = vld [vmem:[#allocation8 + $0x88] sm:$0xff]   ;;  %v10824_v25 = vpop.f32.mrf.mxu1 }
 0x25a   : > { %v3817_v46 = vsel %vm9723_vm11, %v3809_v9, %v3816_v31  ;;  %v4205_v34 = vrot.slane %v4204_v29, 4  ;;  %v3822_v22 = vshll.u32 %v7712_v53, 16  ;;  %v3827_v15 = vshrl.u32 %v7713_v41, 16  ;;  %4147 = vst [vmem:[#allocation2 + $0x88] sm:$0xf] %v7713_v41  ;;  %v10818_v16 = vpop.f32.mrf.mxu0  ;;  %8284 = vmatpush3.bf16.msra.mxu0 %v9200_v36  ;;  %8754 = vmatpush3.bf16.msra.mxu1 %v9191_v4  ;;  %v9219_v24 = vld [vmem:[#allocation8 + $0x58] sm:$0xff]  }
 0x25b   : > { %4057 = vst [vmem:[#allocation2 + $0x6c] sm:$0xf] %v3817_v46  ;;  %v3830_v33 = vshll.u32 %v7713_v41, 16  ;;  %v3636_v19 = vmax.f32 %v3604_v62, 0.0  ;;  %v3566_v0 = vadd.f32 %v3472_v10, %v10655_v6  ;;  %v3477_v52 = vadd.f32 %v8063_v7, %v3476_v43  ;;  %v9165_v42 = vld [vmem:[#allocation2 + $0x50] ss:$12 sps:$4 sm:$0xff]   ;;  %8285 = vmatprep.subr.bf16.mxu0 %v9206_v51  ;;  %8755 = vmatprep.subr.bf16.mxu1 %v10810_v49 }
 0x25c   : > { %v4360_v58 = vsel %vm9752_vm14, %v4205_v34, %v4359_v14  ;;  %v3821_v47 = vrot.slane %v3819_v26, 7  ;;  %v4206_v3 = vrot.slane %v3819_v26, 4  ;;  %v4207_v27 = vrot.slane %v3822_v22, 5  ;;  %v8065_v20 = vpop.f32.mrf.mxu0  ;;  %5084 = vmatmul.mubr.bf16.gmra.mxu1 %v9161_v17  ;;  %8717 = vmatprep.mubr.bf16.mxu0 %v9165_v42  ;;  %v4363_v57 = vld [vmem:[#allocation2 + $0x8c] sm:$0xf]  ;;  %v9213_v41 = vld [vmem:[#allocation8 + $0x20] sm:$0xff]  }
 0x25d   : > { %4361 = vst [vmem:[#allocation2 + $0x74] sm:$0xf] %v4360_v58  ;;  %v3829_v36 = vrot.slane %v3827_v15, 7  ;;  %v4210_v9 = vrot.slane %v3830_v33, 5  ;;  %v4212_v31 = vrot.slane %v3827_v15, 4  ;;  %v7714_v6 = vpack.c.bf16 %v3636_v19, %v3636_v19  ;;  %v10827_v55 = vld [vmem:[#allocation8 + $0x80] sm:$0xff]  }
 0x25e   : > { %v3824_v4 = vor.u32 %v3822_v22, %v3821_v47  ;;  %v3825_v51 = vrot.slane %v3821_v47, 4  ;;  %v4208_v14 = vor.u32 %v4207_v27, %v4206_v3  ;;  %v3605_v29 = vadd.f32 %v10729_v21, %v3566_v0  ;;  %v8067_v53 = vpop.f32.mrf.mxu0  ;;  %8286 = vmatpush3.bf16.msra.mxu0 %v9207_v30  ;;  %8756 = vmatpush3.bf16.msra.mxu1 %v10810_v49  ;;  %v4062_v34 = vld [vmem:[#allocation2 + $0x90] sm:$0xf]  ;;  %v3479_v49 = vpop.f32.mrf.mxu1  ;;  %v9220_v3 = vld [vmem:[#allocation8 + $0x18] sm:$0xff]  }
 0x25f   : > { %v3832_v46 = vor.u32 %v3830_v33, %v3829_v36  ;;  %v4213_v62 = vor.u32 %v4212_v31, %v4210_v9  ;;  %v3835_v10 = vshrl.u32 %v7714_v6, 16  ;;  %v3838_v43 = vshll.u32 %v7714_v6, 16  ;;  %4148 = vst [vmem:[#allocation2 + $0x94] sm:$0xf] %v7714_v6  ;;  %8287 = vmatprep.subr.bf16.mxu0 %v9212_v45  ;;  %8757 = vmatprep.subr.bf16.mxu1 %v9217_v60 }
 0x260   : > { %v4059_v17 = vsel %vm9746_vm13, %v3824_v4, %v4058_v28  ;;  %v4209_v7 = vrot.slane %v4208_v14, 4  ;;  %v3637_v26 = vmax.f32 %v3605_v29, 0.0  ;;  %v3567_v30 = vadd.f32 %v3477_v52, %v10667_v63  ;;  %v8068_v22 = vpop.f32.mrf.mxu0  ;;  %v9168_v28 = vld [vmem:[#allocation2 + $0x64] ss:$12 sps:$4 sm:$0xff]   ;;  %v10844_v6 = vpop.f32.mrf.mxu1 }
 0x261   : > { %4060 = vst [vmem:[#allocation2 + $0x78] sm:$0xf] %v4059_v17  ;;  %v3833_v15 = vsel %vm9723_vm11, %v3825_v51, %v3832_v46  ;;  %v4214_v33 = vrot.slane %v4213_v62, 4  ;;  %v10835_v19 = vrot.slane %v3835_v10, 7  ;;  %v4215_v0 = vrot.slane %v3835_v10, 4  ;;  %5091 = vmatprep.mubr.bf16.mxu1 %v9168_v28 }
 0x262   : > { %v9166_v45 = vld [vmem:[#allocation2 + $0x60] ss:$12 sps:$4 sm:$0xff]   ;;  %4061 = vst [vmem:[#allocation2 + $0x84] sm:$0xf] %v3833_v15  ;;  %v4211_v42 = vsel %vm9735_vm12, %v4209_v7, %v4210_v9  ;;  %v4216_v58 = vrot.slane %v3838_v43, 5  ;;  %v7715_v47 = vpack.c.bf16 %v3637_v26, %v3637_v26  ;;  %v3606_v63 = vadd.f32 %v10729_v21, %v3567_v30  ;;  %v8070_v52 = vpop.f32.mrf.mxu0  ;;  %8288 = vmatpush3.bf16.msra.mxu0 %v9213_v41 }
 0x263   : > { %4362 = vst [vmem:[#allocation2 + $0x80] sm:$0xf] %v4211_v42  ;;  %v4364_v27 = vsel %vm9752_vm14, %v4214_v33, %v4363_v57  ;;  %v3840_v36 = vor.u32 %v3838_v43, %v10835_v19  ;;  %v8066_v31 = vadd.f32 %v8065_v20, %v10818_v16  ;;  %8758 = vmatpush3.bf16.msra.mxu1 %v9217_v60  ;;  %v9225_v41 = vld [vmem:[#allocation8 + $0x50] sm:$0xff]  }
 0x264   : > { %8289 = vmatprep.subr.bf16.mxu0 %v9219_v24  ;;  %4365 = vst [vmem:[#allocation2 + $0x8c] sm:$0xf] %v4364_v27  ;;  %v4217_v9 = vor.u32 %v4216_v58, %v4215_v0  ;;  %v3843_v4 = vshrl.u32 %v7715_v47, 16  ;;  %v3846_v51 = vshll.u32 %v7715_v47, 16  ;;  %4149 = vst [vmem:[#allocation2 + $0xa0] sm:$0xf] %v7715_v47  ;;  %v8071_v29 = vpop.f32.mrf.mxu0  ;;  %8759 = vmatprep.subr.bf16.mxu1 %v10827_v55 }
 0x265   : > { %v3638_v14 = vmax.f32 %v3606_v63, 0.0  ;;  %v4063_v57 = vsel %vm9746_vm13, %v3840_v36, %v4062_v34  ;;  %v3480_v46 = vadd.f32 %v8066_v31, %v3479_v49  ;;  %v8069_v16 = vadd.f32 %v8068_v22, %v8067_v53  ;;  %5092 = vmatmul.mubr.bf16.gmra.mxu1 %v9166_v45  ;;  %v9169_v60 = vld [vmem:[#allocation2 + $0x68] ss:$12 sps:$4 sm:$0xff]   ;;  %v9226_v26 = vld [vmem:[#allocation8 + $0x10] sm:$0xff]   ;;  %v3492_v22 = vpop.f32.mrf.mxu1  ;;  %v9232_v0 = vld [vmem:[#allocation8 + $0x48] sm:$0xff]  }
 0x266   : > { %v8072_v20 = vadd.f32 %v8071_v29, %v8070_v52  ;;  %v9242_v24 = vld [vmem:[#allocation8 + $0x1f8] sm:$0xff]   ;;  %v4218_v62 = vrot.slane %v4217_v9, 4  ;;  %4064 = vst [vmem:[#allocation2 + $0x90] sm:$0xf] %v4063_v57  ;;  %v3845_v10 = vrot.slane %v3843_v4, 7  ;;  %v4219_v43 = vrot.slane %v3846_v51, 5  ;;  %v8073_v7 = vpop.f32.mrf.mxu0  ;;  %8290 = vmatpush3.bf16.msra.mxu0 %v9220_v3 }
 0x267   : > { %v4221_v17 = vrot.slane %v3843_v4, 4  ;;  %v4367_v30 = vld [vmem:[#allocation2 + $0xa4] sm:$0xf]  ;;  %v7716_v15 = vpack.c.bf16 %v3638_v14, %v3638_v14  ;;  %v3568_v33 = vadd.f32 %v3480_v46, %v10794_v13  ;;  %v3485_v34 = vadd.f32 %v10802_v12, %v8069_v16  ;;  %8718 = vmatmul.mubr.bf16.gmra.mxu0 %v9169_v60  ;;  %8291 = vmatprep.subr.bf16.mxu0 %v9225_v41  ;;  %v9233_v63 = vld [vmem:[#allocation8 + $0x8] sm:$0xff]   ;;  %v4066_v27 = vld [vmem:[#allocation2 + $0xa8] sm:$0xf]  ;;  %v10863_v41 = vpop.f32.mrf.mxu1 }
 0x268   : > { %v3488_v53 = vadd.f32 %v10824_v25, %v8072_v20  ;;  %v3841_v49 = vrot.slane %v10835_v19, 4  ;;  %v3848_v45 = vor.u32 %v3846_v51, %v3845_v10  ;;  %v4220_v42 = vsel %vm9735_vm12, %v4218_v62, %v4219_v43  ;;  %v8074_v47 = vpop.f32.mrf.mxu0  ;;  %8760 = vmatpush3.bf16.msra.mxu1 %v10827_v55  ;;  %v9172_v9 = vld [vmem:[#allocation2 + $0x7c] ss:$12 sps:$4 sm:$0xff]   ;;  %v9238_v4 = vld [vmem:[#allocation8 + $0x40] sm:$0xff]  }
 0x269   : > { %v4222_v58 = vor.u32 %v4221_v17, %v4219_v43  ;;  %4366 = vst [vmem:[#allocation2 + $0x98] sm:$0xf] %v4220_v42  ;;  %v3851_v13 = vshrl.u32 %v7716_v15, 16  ;;  %v3854_v12 = vshll.u32 %v7716_v15, 16  ;;  %4150 = vst [vmem:[#allocation2 + $0xac] sm:$0xf] %v7716_v15  ;;  %v3607_v25 = vadd.f32 %v10729_v21, %v3568_v33  ;;  %8417 = vmatprep.subr.bf16.mxu1 %v9242_v24 }
 0x26a   : > { %v3569_v52 = vadd.f32 %v3485_v34, %v10662_v5  ;;  %v9170_v28 = vld [vmem:[#allocation2 + $0x78] ss:$12 sps:$4 sm:$0xff]   ;;  %v3849_v19 = vsel %vm9723_vm11, %v3841_v49, %v3848_v45  ;;  %v3570_v36 = vadd.f32 %v3488_v53, %v10669_v56  ;;  %v8075_v31 = vadd.f32 %v8074_v47, %v8073_v7  ;;  %v8076_v55 = vpop.f32.mrf.mxu0  ;;  %8292 = vmatpush3.bf16.msra.mxu0 %v9226_v26  ;;  %v9239_v33 = vld [vmem:[#allocation8] sm:$0xff]   ;;  %v3495_v49 = vpop.f32.mrf.mxu1  ;;  %v9248_v45 = vld [vmem:[#allocation8 + $0x238] sm:$0xff]  }
 0x26b   : > { %v4223_v3 = vrot.slane %v4222_v58, 4  ;;  %4065 = vst [vmem:[#allocation2 + $0x9c] sm:$0xf] %v3849_v19  ;;  %v10861_v51 = vrot.slane %v3851_v13, 7  ;;  %v4224_v14 = vrot.slane %v3851_v13, 4  ;;  %v4225_v29 = vrot.slane %v3854_v12, 5  ;;  %8293 = vmatprep.subr.bf16.mxu0 %v9232_v0  ;;  %5099 = vmatprep.mubr.bf16.mxu1 %v9172_v9 }
 0x26c   : > { %v3639_v5 = vmax.f32 %v3607_v25, 0.0  ;;  %v3608_v46 = vadd.f32 %v10729_v21, %v3569_v52  ;;  %v3609_v56 = vadd.f32 %v10729_v21, %v3570_v36  ;;  %v3493_v16 = vadd.f32 %v8075_v31, %v3492_v22  ;;  %v8077_v20 = vpop.f32.mrf.mxu0  ;;  %v9174_v60 = vld [vmem:[#allocation2 + $0x80] ss:$12 sps:$4 sm:$0xff]  }
 0x26d   : > { %v4368_v57 = vsel %vm9752_vm14, %v4223_v3, %v4367_v30  ;;  %v3856_v24 = vor.u32 %v3854_v12, %v10861_v51  ;;  %v3857_v62 = vrot.slane %v10861_v51, 4  ;;  %v4226_v10 = vor.u32 %v4225_v29, %v4224_v14  ;;  %5100 = vmatmul.mubr.bf16.gmra.mxu1 %v9170_v28  ;;  %8721 = vmatprep.mubr.bf16.mxu0 %v9174_v60  ;;  %v4371_v28 = vld [vmem:[#allocation2 + $0xbc] sm:$0xf]  ;;  %v4070_v51 = vld [vmem:[#allocation2 + $0xc0] sm:$0xf] }
 0x26e   : > { %4369 = vst [vmem:[#allocation2 + $0xa4] sm:$0xf] %v4368_v57  ;;  %v7717_v43 = vpack.c.bf16 %v3639_v5, %v3639_v5  ;;  %v3640_v17 = vmax.f32 %v3608_v46, 0.0  ;;  %v3641_v7 = vmax.f32 %v3609_v56, 0.0  ;;  %v3571_v26 = vadd.f32 %v3493_v16, %v10679_v35  ;;  %v8079_v15 = vpop.f32.mrf.mxu0  ;;  %8294 = vmatpush3.bf16.msra.mxu0 %v9233_v63  ;;  %v9177_v5 = vld [vmem:[#allocation2 + $0x94] ss:$12 sps:$4 sm:$0xff]  }
 0x26f   : > { %v8078_v30 = vadd.f32 %v8077_v20, %v8076_v55  ;;  %v4067_v34 = vsel %vm9746_vm13, %v3856_v24, %v4066_v27  ;;  %v4227_v53 = vrot.slane %v4226_v10, 4  ;;  %8295 = vmatprep.subr.bf16.mxu0 %v9238_v4  ;;  %v10875_v55 = vpop.f32.mrf.mxu1  ;;  %5107 = vmatprep.mubr.bf16.mxu1 %v9177_v5 }
 0x270   : > { %v3859_v22 = vshrl.u32 %v7717_v43, 16  ;;  %v3862_v0 = vshll.u32 %v7717_v43, 16  ;;  %4151 = vst [vmem:[#allocation2 + $0xb8] sm:$0xf] %v7717_v43  ;;  %4068 = vst [vmem:[#allocation2 + $0xa8] sm:$0xf] %v4067_v34  ;;  %v7718_v42 = vpack.c.bf16 %v3640_v17, %v3640_v17  ;;  %v7719_v58 = vpack.c.bf16 %v3641_v7, %v3641_v7  ;;  %v8080_v13 = vpop.f32.mrf.mxu0 }
 0x271   : > { %v3610_v35 = vadd.f32 %v10729_v21, %v3571_v26  ;;  %v3496_v47 = vadd.f32 %v8078_v30, %v3495_v49  ;;  %v8081_v52 = vadd.f32 %v8080_v13, %v8079_v15 }
 0x272   : > { %v3861_v12 = vrot.slane %v3859_v22, 7  ;;  %v4228_v63 = vrot.slane %v3862_v0, 5  ;;  %v4230_v25 = vrot.slane %v3859_v22, 4  ;;  %v3867_v19 = vshrl.u32 %v7718_v42, 16  ;;  %4152 = vst [vmem:[#allocation2 + $0xc4] sm:$0xf] %v7718_v42  ;;  %v8082_v31 = vpop.f32.mrf.mxu0  ;;  %8296 = vmatpush3.bf16.msra.mxu0 %v9239_v33  ;;  %v3508_v33 = vpop.f32.mrf.mxu1 }
 0x273   : > { %v3870_v3 = vshll.u32 %v7718_v42, 16  ;;  %v3875_v27 = vshrl.u32 %v7719_v58, 16  ;;  %v3878_v36 = vshll.u32 %v7719_v58, 16  ;;  %4153 = vst [vmem:[#allocation2 + $0xd0] sm:$0xf] %v7719_v58  ;;  %v3642_v14 = vmax.f32 %v3610_v35, 0.0  ;;  %8793 = vmatprep.subr.bf16.mxu0 %v9248_v45 }
 0x274   : > { %v3864_v9 = vor.u32 %v3862_v0, %v3861_v12  ;;  %v4229_v21 = vsel %vm9735_vm12, %v4227_v53, %v4228_v63  ;;  %v4231_v4 = vor.u32 %v4230_v25, %v4228_v63  ;;  %v9175_v29 = vld [vmem:[#allocation2 + $0x90] ss:$12 sps:$4 sm:$0xff]   ;;  %v3869_v57 = vrot.slane %v3867_v19, 7  ;;  %v8083_v20 = vpop.f32.mrf.mxu0  ;;  %v4375_v58 = vld [vmem:[#allocation2 + $0xd4] sm:$0xf] }
 0x275   : > { %4370 = vst [vmem:[#allocation2 + $0xb0] sm:$0xf] %v4229_v21  ;;  %v4233_v46 = vrot.slane %v3867_v19, 4  ;;  %v4234_v56 = vrot.slane %v3870_v3, 5  ;;  %v3877_v16 = vrot.slane %v3875_v27, 7  ;;  %v4237_v10 = vrot.slane %v3878_v36, 5  ;;  %5108 = vmatmul.mubr.bf16.gmra.mxu1 %v9175_v29 }
 0x276   : > { %v3865_v60 = vsel %vm9723_vm11, %v3857_v62, %v3864_v9  ;;  %v4232_v24 = vrot.slane %v4231_v4, 4  ;;  %v4239_v43 = vrot.slane %v3875_v27, 4  ;;  %v9178_v17 = vld [vmem:[#allocation2 + $0x98] ss:$12 sps:$4 sm:$0xff]   ;;  %v3872_v7 = vor.u32 %v3870_v3, %v3869_v57  ;;  %v8085_v34 = vpop.f32.mrf.mxu0  ;;  %v10898_v3 = vpop.f32.mrf.mxu1 }
 0x277   : > { %4069 = vst [vmem:[#allocation2 + $0xb4] sm:$0xf] %v3865_v60  ;;  %v3873_v26 = vrot.slane %v3869_v57, 4  ;;  %v4235_v30 = vor.u32 %v4234_v56, %v4233_v46  ;;  %v3880_v15 = vor.u32 %v3878_v36, %v3877_v16  ;;  %v7720_v0 = vpack.c.bf16 %v3642_v14, %v3642_v14  ;;  %8722 = vmatmul.mubr.bf16.gmra.mxu0 %v9178_v17  ;;  %v4074_v19 = vld [vmem:[#allocation2 + $0xd8] sm:$0xf] }
 0x278   : > { %v4372_v53 = vsel %vm9752_vm14, %v4232_v24, %v4371_v28  ;;  %v4240_v22 = vor.u32 %v4239_v43, %v4237_v10  ;;  %v3572_v62 = vadd.f32 %v3496_v47, %v10807_v48  ;;  %v4071_v49 = vsel %vm9746_vm13, %v3872_v7, %v4070_v51  ;;  %v8086_v13 = vpop.f32.mrf.mxu0  ;;  %v10892_v48 = vld [vmem:[%s11715_s2] ss:$0 sm:$0xff]  ;;  %v9181_v16 = vld [vmem:[#allocation2 + $0xac] ss:$12 sps:$4 sm:$0xff]   ;;  %v3511_v17 = vpop.f32.mrf.mxu1 }
 0x279   : > { %4373 = vst [vmem:[#allocation2 + $0xbc] sm:$0xf] %v4372_v53  ;;  %v4236_v45 = vrot.slane %v4235_v30, 4  ;;  %v3881_v42 = vsel %vm9723_vm11, %v3873_v26, %v3880_v15  ;;  %v3501_v35 = vadd.f32 %v10844_v6, %v8081_v52  ;;  %4072 = vst [vmem:[#allocation2 + $0xc0] sm:$0xf] %v4071_v49  ;;  %v3883_v63 = vshrl.u32 %v7720_v0, 16  ;;  %5115 = vmatprep.mubr.bf16.mxu1 %v9181_v16 }
 0x27a   : > { %4073 = vst [vmem:[#allocation2 + $0xcc] sm:$0xf] %v3881_v42  ;;  %v4241_v12 = vrot.slane %v4240_v22, 4  ;;  %v3886_v25 = vshll.u32 %v7720_v0, 16  ;;  %4154 = vst [vmem:[#allocation2 + $0xdc] sm:$0xf] %v7720_v0  ;;  %v3611_v47 = vadd.f32 %v10892_v48, %v3572_v62  ;;  %v8084_v52 = vadd.f32 %v8083_v20, %v8082_v31  ;;  %v8088_v36 = vpop.f32.mrf.mxu0 }
 0x27b   : > { %v4238_v28 = vsel %vm9735_vm12, %v4236_v45, %v4237_v10  ;;  %v3573_v6 = vadd.f32 %v3501_v35, %v10674_v37  ;;  %v8087_v27 = vadd.f32 %v8086_v13, %v8085_v34  ;;  %v10902_v21 = vrot.slane %v3883_v63, 7  ;;  %v11876_v26 = vld [vmem:[#allocation45_spill] sm:$0xff] }
 0x27c   : > { %4374 = vst [vmem:[#allocation2 + $0xc8] sm:$0xf] %v4238_v28  ;;  %v4376_v9 = vsel %vm9752_vm14, %v4241_v12, %v4375_v58  ;;  %v4242_v4 = vrot.slane %v3883_v63, 4  ;;  %v4243_v51 = vrot.slane %v3886_v25, 5  ;;  %v3643_v14 = vmax.f32 %v3611_v47, 0.0  ;;  %v8089_v31 = vpop.f32.mrf.mxu0 }
 0x27d   : > { %4377 = vst [vmem:[#allocation2 + $0xd4] sm:$0xf] %v4376_v9  ;;  %v3612_v29 = vadd.f32 %v10892_v48, %v3573_v6  ;;  %v3504_v5 = vadd.f32 %v10863_v41, %v8084_v52  ;;  %v3509_v37 = vadd.f32 %v8087_v27, %v3508_v33  ;;  %v3888_v57 = vor.u32 %v3886_v25, %v10902_v21  ;;  %v9186_v42 = vld [vmem:[#allocation2 + $0xc4] ss:$12 sps:$4 sm:$0xff]   ;;  %v4379_v47 = vld [vmem:[#allocation2 + $0xec] sm:$0xf] }
 0x27e   : > { %v4244_v46 = vor.u32 %v4243_v51, %v4242_v4  ;;  %v9179_v56 = vld [vmem:[#allocation2 + $0xa8] ss:$12 sps:$4 sm:$0xff]   ;;  %v8090_v20 = vadd.f32 %v8089_v31, %v8088_v36  ;;  %v7721_v60 = vpack.c.bf16 %v3643_v14, %v3643_v14  ;;  %v8091_v7 = vpop.f32.mrf.mxu0  ;;  %v2676_v30 = vadd.f32 %v10696_v39, %v11876_v26  ;;  %v4078_v14 = vld [vmem:[#allocation2 + $0xf0] sm:$0xf] }
 0x27f   : > { %v3644_v24 = vmax.f32 %v3612_v29, 0.0  ;;  %v3574_v10 = vadd.f32 %v3504_v5, %v10681_v18  ;;  %v3575_v43 = vadd.f32 %v3509_v37, %v10691_v50  ;;  %v4075_v41 = vsel %vm9746_vm13, %v3888_v57, %v4074_v19  ;;  %5116 = vmatmul.mubr.bf16.gmra.mxu1 %v9179_v56  ;;  %v10925_v57 = vpop.f32.mrf.mxu1 }
 0x280   : > { %v4245_v15 = vrot.slane %v4244_v46, 4  ;;  %v3512_v33 = vadd.f32 %v8090_v20, %v3511_v17  ;;  %v9183_v34 = vld [vmem:[#allocation2 + $0xb0] ss:$12 sps:$4 sm:$0xff]   ;;  %4076 = vst [vmem:[#allocation2 + $0xd8] sm:$0xf] %v4075_v41  ;;  %v3891_v53 = vshrl.u32 %v7721_v60, 16  ;;  %v8092_v50 = vpop.f32.mrf.mxu0  ;;  %5123 = vmatprep.mubr.bf16.mxu1 %v9186_v42 }
 0x281   : > { %v3894_v22 = vshll.u32 %v7721_v60, 16  ;;  %4155 = vst [vmem:[#allocation2 + $0xe8] sm:$0xf] %v7721_v60  ;;  %v7722_v0 = vpack.c.bf16 %v3644_v24, %v3644_v24  ;;  %v3613_v18 = vadd.f32 %v10892_v48, %v3574_v10  ;;  %v3889_v62 = vrot.slane %v10902_v21, 4  ;;  %8725 = vmatprep.mubr.bf16.mxu0 %v9183_v34  ;;  %v9184_v25 = vld [vmem:[#allocation2 + $0xc0] ss:$12 sps:$4 sm:$0xff]  }
 0x282   : > { %v3614_v39 = vadd.f32 %v10892_v48, %v3575_v43  ;;  %v3576_v49 = vadd.f32 %v3512_v33, %v2676_v30  ;;  %v10916_v45 = vadd.f32 %v8092_v50, %v8091_v7  ;;  %v3893_v58 = vrot.slane %v3891_v53, 7  ;;  %v10918_v63 = vpop.f32.mrf.mxu0 }
 0x283   : > { %v4246_v35 = vrot.slane %v3894_v22, 5  ;;  %v4248_v13 = vrot.slane %v3891_v53, 4  ;;  %v3899_v12 = vshrl.u32 %v7722_v0, 16  ;;  %4156 = vst [vmem:[#allocation2 + $0xf4] sm:$0xf] %v7722_v0  ;;  %v3902_v28 = vshll.u32 %v7722_v0, 16  ;;  %v3524_v0 = vpop.f32.mrf.mxu1 }
 0x284   : > { %v3645_v19 = vmax.f32 %v3613_v18, 0.0  ;;  %v3646_v6 = vmax.f32 %v3614_v39, 0.0  ;;  %v3615_v52 = vadd.f32 %v10892_v48, %v3576_v49  ;;  %v3896_v27 = vor.u32 %v3894_v22, %v3893_v58  ;;  %v10923_v4 = vpop.f32.mrf.mxu0  ;;  %v9187_v51 = vld [vmem:[#allocation2 + $0xc8] ss:$12 sps:$4 sm:$0xff]   ;;  %v4383_v18 = vld [vmem:[#allocation2 + $0x104] sm:$0xf] }
 0x285   : > { %v4247_v36 = vsel %vm9735_vm12, %v4245_v15, %v4246_v35  ;;  %v4249_v9 = vor.u32 %v4248_v13, %v4246_v35  ;;  %v3901_v21 = vrot.slane %v3899_v12, 7  ;;  %v4251_v29 = vrot.slane %v3899_v12, 4  ;;  %8726 = vmatmul.mubr.bf16.gmra.mxu0 %v9187_v51  ;;  %v4082_v12 = vld [vmem:[#allocation2 + $0x108] sm:$0xf]  ;;  %v10942_v51 = vpop.f32.mrf.mxu1 }
 0x286   : > { %4378 = vst [vmem:[#allocation2 + $0xe0] sm:$0xf] %v4247_v36  ;;  %v4252_v5 = vrot.slane %v3902_v28, 5  ;;  %v7723_v37 = vpack.c.bf16 %v3645_v19, %v3645_v19  ;;  %v7724_v31 = vpack.c.bf16 %v3646_v6, %v3646_v6  ;;  %v3897_v46 = vsel %vm9723_vm11, %v3889_v62, %v3896_v27  ;;  %v8097_v60 = vpop.f32.mrf.mxu0 }
 0x287   : > { %v4250_v56 = vrot.slane %v4249_v9, 4  ;;  %v3904_v16 = vor.u32 %v3902_v28, %v3901_v21  ;;  %v3905_v20 = vrot.slane %v3901_v21, 4  ;;  %4077 = vst [vmem:[#allocation2 + $0xe4] sm:$0xf] %v3897_v46  ;;  %v3647_v41 = vmax.f32 %v3615_v52, 0.0  ;;  %5124 = vmatmul.mubr.bf16.gmra.mxu1 %v9184_v25 }
 0x288   : > { %v4253_v24 = vor.u32 %v4252_v5, %v4251_v29  ;;  %v3907_v10 = vshrl.u32 %v7723_v37, 16  ;;  %v3910_v43 = vshll.u32 %v7723_v37, 16  ;;  %4157 = vst [vmem:[#allocation2 + $0x100] sm:$0xf] %v7723_v37  ;;  %v3915_v17 = vshrl.u32 %v7724_v31, 16  ;;  %v8098_v15 = vpop.f32.mrf.mxu0 }
 0x289   : > { %4158 = vst [vmem:[#allocation2 + $0x10c] sm:$0xf] %v7724_v31  ;;  %v4380_v7 = vsel %vm9752_vm14, %v4250_v56, %v4379_v47  ;;  %v4079_v26 = vsel %vm9746_vm13, %v3904_v16, %v4078_v14  ;;  %v3918_v30 = vshll.u32 %v7724_v31, 16  ;;  %v7725_v49 = vpack.c.bf16 %v3647_v41, %v3647_v41  ;;  %v9190_v46 = vld [vmem:[#allocation2 + $0xdc] ss:$12 sps:$4 sm:$0xff]   ;;  %v3527_v41 = vpop.f32.mrf.mxu1 }
 0x28a   : > { %4381 = vst [vmem:[#allocation2 + $0xec] sm:$0xf] %v4380_v7  ;;  %v4254_v33 = vrot.slane %v4253_v24, 4  ;;  %4080 = vst [vmem:[#allocation2 + $0xf0] sm:$0xf] %v4079_v26  ;;  %v3909_v34 = vrot.slane %v3907_v10, 7  ;;  %v8100_v42 = vpop.f32.mrf.mxu0  ;;  %v3517_v25 = vadd.f32 %v10875_v55, %v10916_v45  ;;  %v2692_v47 = vadd.f32 %v10708_v2, %v10689_v32  ;;  %5131 = vmatprep.mubr.bf16.mxu1 %v9190_v46 }
 0x28b   : > { %v4255_v53 = vrot.slane %v3910_v43, 5  ;;  %v4257_v22 = vrot.slane %v3907_v10, 4  ;;  %v3917_v50 = vrot.slane %v3915_v17, 7  ;;  %v4260_v62 = vrot.slane %v3915_v17, 4  ;;  %4159 = vst [vmem:[#allocation2 + $0x118] sm:$0xf] %v7725_v49 }
 0x28c   : > { %v4261_v39 = vrot.slane %v3918_v30, 5  ;;  %v3912_v58 = vor.u32 %v3910_v43, %v3909_v34  ;;  %v3923_v6 = vshrl.u32 %v7725_v49, 16  ;;  %v8101_v52 = vpop.f32.mrf.mxu0  ;;  %v3926_v9 = vshll.u32 %v7725_v49, 16 }
 0x28d   : > { %v4256_v35 = vsel %vm9735_vm12, %v4254_v33, %v4255_v53  ;;  %v4258_v13 = vor.u32 %v4257_v22, %v4255_v53  ;;  %v3920_v28 = vor.u32 %v3918_v30, %v3917_v50  ;;  %v3577_v21 = vadd.f32 %v3517_v25, %v10687_v11 }
 0x28e   : > { %4382 = vst [vmem:[#allocation2 + $0xf8] sm:$0xf] %v4256_v35  ;;  %v4262_v19 = vor.u32 %v4261_v39, %v4260_v62  ;;  %v3913_v27 = vsel %vm9723_vm11, %v3905_v20, %v3912_v58  ;;  %v3925_v2 = vrot.slane %v3923_v6, 7  ;;  %v4266_v45 = vrot.slane %v3923_v6, 4  ;;  %v9188_v14 = vld [vmem:[#allocation2 + $0xd8] ss:$12 sps:$4 sm:$0xff]   ;;  %v8103_v29 = vpop.f32.mrf.mxu0 }
 0x28f   : > { %v4259_v36 = vrot.slane %v4258_v13, 4  ;;  %4081 = vst [vmem:[#allocation2 + $0xfc] sm:$0xf] %v3913_v27  ;;  %v4083_v55 = vsel %vm9746_vm13, %v3920_v28, %v4082_v12  ;;  %v4264_v37 = vrot.slane %v3926_v9, 5  ;;  %v3616_v31 = vadd.f32 %v10892_v48, %v3577_v21  ;;  %5132 = vmatmul.mubr.bf16.gmra.mxu1 %v9188_v14  ;;  %v10983_v14 = vpop.f32.mrf.mxu1 }
 0x290   : > { %v4263_v32 = vrot.slane %v4262_v19, 4  ;;  %4084 = vst [vmem:[#allocation2 + $0x108] sm:$0xf] %v4083_v55  ;;  %v8096_v11 = vadd.f32 %v10923_v4, %v10918_v63  ;;  %v3921_v56 = vrot.slane %v3917_v50, 4  ;;  %v3928_v16 = vor.u32 %v3926_v9, %v3925_v2  ;;  %v8104_v43 = vpop.f32.mrf.mxu0  ;;  %v4387_v4 = vld [vmem:[#allocation2 + $0x11c] sm:$0xf] }
 0x291   : > { %v4384_v5 = vsel %vm9752_vm14, %v4259_v36, %v4383_v18  ;;  %v8099_v20 = vadd.f32 %v8098_v15, %v8097_v60  ;;  %v8102_v24 = vadd.f32 %v8101_v52, %v8100_v42  ;;  %v9192_v10 = vld [vmem:[#allocation2 + $0xe0] ss:$12 sps:$4 sm:$0xff]   ;;  %v4267_v7 = vor.u32 %v4266_v45, %v4264_v37 }
 0x292   : > { %4385 = vst [vmem:[#allocation2 + $0x104] sm:$0xf] %v4384_v5  ;;  %v4265_v17 = vsel %vm9735_vm12, %v4263_v32, %v4264_v37  ;;  %v3648_v26 = vmax.f32 %v3616_v31, 0.0  ;;  %v3520_v30 = vadd.f32 %v10898_v3, %v8096_v11  ;;  %v3929_v63 = vsel %vm9723_vm11, %v3921_v56, %v3928_v16  ;;  %8729 = vmatprep.mubr.bf16.mxu0 %v9192_v10  ;;  %v8106_v15 = vpop.f32.mrf.mxu0  ;;  %v10990_v11 = vld [vmem:[#allocation2 + $0x10c] ss:$12 sps:$4 sm:$0xff]  }
 0x293   : > { %4386 = vst [vmem:[#allocation2 + $0x110] sm:$0xf] %v4265_v17  ;;  %v3525_v33 = vadd.f32 %v8099_v20, %v3524_v0  ;;  %v3528_v60 = vadd.f32 %v8102_v24, %v3527_v41  ;;  %4085 = vst [vmem:[#allocation2 + $0x114] sm:$0xf] %v3929_v63  ;;  %v4268_v34 = vrot.slane %v4267_v7, 4  ;;  %v8105_v18 = vadd.f32 %v8104_v43, %v8103_v29 }
 0x294   : > { %v7726_v53 = vpack.c.bf16 %v3648_v26, %v3648_v26  ;;  %v3578_v22 = vadd.f32 %v3520_v30, %v10693_v23  ;;  %v10959_v3 = vadd.f32 %v10719_v40, %v10711_v38  ;;  %v8107_v39 = vpop.f32.mrf.mxu0  ;;  %v4086_v23 = vld [vmem:[#allocation2 + $0x120] sm:$0xf] }
 0x295   : > { %v3579_v50 = vadd.f32 %v3525_v33, %v10703_v59  ;;  %v3580_v62 = vadd.f32 %v3528_v60, %v2692_v47  ;;  %v4388_v0 = vsel %vm9752_vm14, %v4268_v34, %v4387_v4  ;;  %v3533_v59 = vadd.f32 %v10925_v57, %v8105_v18  ;;  %v10970_v40 = vld [vmem:[#allocation2 + $0xf4] ss:$12 sps:$4 sm:$0xff]   ;;  %v3540_v33 = vpop.f32.mrf.mxu1 }
 0x296   : > { %v3931_v49 = vshrl.u32 %v7726_v53, 16  ;;  %v3934_v42 = vshll.u32 %v7726_v53, 16  ;;  %4160 = vst [vmem:[#allocation2 + $0x124] sm:$0xf] %v7726_v53  ;;  %v3617_v58 = vadd.f32 %v10892_v48, %v3578_v22  ;;  %v10965_v35 = vld [vmem:[#allocation2 + $0xf0] ss:$12 sps:$4 sm:$0xff]   ;;  %v8108_v12 = vadd.f32 %v8107_v39, %v8106_v15  ;;  %v10972_v25 = vpop.f32.mrf.mxu0  ;;  %5139 = vmatprep.mubr.bf16.mxu1 %v10970_v40 }
 0x297   : > { %4389 = vst [vmem:[#allocation2 + $0x11c] sm:$0xf] %v4388_v0  ;;  %v3618_v13 = vadd.f32 %v10892_v48, %v3579_v50  ;;  %v3619_v38 = vadd.f32 %v10892_v48, %v3580_v62  ;;  %v3581_v36 = vadd.f32 %v3533_v59, %v10698_v8  ;;  %5140 = vmatmul.mubr.bf16.gmra.mxu1 %v10965_v35  ;;  %v11877_v8 = vld [vmem:[#allocation46_spill] sm:$0xff] }
 0x298   : > { %v10974_v47 = vrot.slane %v3931_v49, 7  ;;  %v4269_v28 = vrot.slane %v3931_v49, 4  ;;  %v4270_v19 = vrot.slane %v3934_v42, 5  ;;  %v3649_v6 = vmax.f32 %v3617_v58, 0.0  ;;  %v10979_v57 = vpop.f32.mrf.mxu0  ;;  %5147 = vmatprep.mubr.bf16.mxu1 %v10990_v11  ;;  %v4090_v0 = vld [vmem:[#allocation2 + $0x138] sm:$0xf] }
 0x299   : > { %v3650_v52 = vmax.f32 %v3618_v13, 0.0  ;;  %v3651_v27 = vmax.f32 %v3619_v38, 0.0  ;;  %v3536_v9 = vadd.f32 %v10942_v51, %v8108_v12  ;;  %v9198_v21 = vld [vmem:[#allocation2 + $0xf8] ss:$12 sps:$4 sm:$0xff]   ;;  %v3620_v37 = vadd.f32 %v10892_v48, %v3581_v36 }
 0x29a   : > { %v3936_v55 = vor.u32 %v3934_v42, %v10974_v47  ;;  %v3937_v32 = vrot.slane %v10974_v47, 4  ;;  %v4271_v2 = vor.u32 %v4270_v19, %v4269_v28  ;;  %v7727_v45 = vpack.c.bf16 %v3649_v6, %v3649_v6  ;;  %v10988_v51 = vpop.f32.mrf.mxu0  ;;  %8730 = vmatmul.mubr.bf16.gmra.mxu0 %v9198_v21  ;;  %v10994_v7 = vld [vmem:[#allocation2 + $0x108] ss:$12 sps:$4 sm:$0xff]   ;;  %v8696_v6 = vpop.f32.mrf.mxu1 }
 0x29b   : > { %v7728_v29 = vpack.c.bf16 %v3650_v52, %v3650_v52  ;;  %v7729_v5 = vpack.c.bf16 %v3651_v27, %v3651_v27  ;;  %v3582_v31 = vadd.f32 %v3536_v9, %v11877_v8  ;;  %v3652_v4 = vmax.f32 %v3620_v37, 0.0  ;;  %v4391_v42 = vld [vmem:[#allocation2 + $0x134] sm:$0xf] }
 0x29c   : > { %v4087_v46 = vsel %vm9746_vm13, %v3936_v55, %v4086_v23  ;;  %v4272_v56 = vrot.slane %v4271_v2, 4  ;;  %v3939_v16 = vshrl.u32 %v7727_v45, 16  ;;  %v3942_v20 = vshll.u32 %v7727_v45, 16  ;;  %4161 = vst [vmem:[#allocation2 + $0x130] sm:$0xf] %v7727_v45  ;;  %v8113_v26 = vpop.f32.mrf.mxu0 }
 0x29d   : > { %4088 = vst [vmem:[#allocation2 + $0x120] sm:$0xf] %v4087_v46  ;;  %v3947_v24 = vshrl.u32 %v7728_v29, 16  ;;  %v3950_v10 = vshll.u32 %v7728_v29, 16  ;;  %4162 = vst [vmem:[#allocation2 + $0x13c] sm:$0xf] %v7728_v29  ;;  %v7730_v19 = vpack.c.bf16 %v3652_v4, %v3652_v4  ;;  %v3621_v9 = vadd.f32 %v10892_v48, %v3582_v31 }
 0x29e   : > { %v3955_v43 = vshrl.u32 %v7729_v5, 16  ;;  %v3958_v17 = vshll.u32 %v7729_v5, 16  ;;  %4163 = vst [vmem:[#allocation2 + $0x148] sm:$0xf] %v7729_v5  ;;  %v3941_v30 = vrot.slane %v3939_v16, 7  ;;  %v4273_v41 = vrot.slane %v3942_v20, 5  ;;  %v8115_v18 = vpop.f32.mrf.mxu0 }
 0x29f   : > { %v4275_v63 = vrot.slane %v3939_v16, 4  ;;  %v3949_v60 = vrot.slane %v3947_v24, 7  ;;  %v4278_v15 = vrot.slane %v3947_v24, 4  ;;  %v4279_v34 = vrot.slane %v3950_v10, 5  ;;  %v9205_v22 = vld [vmem:[#allocation2 + $0x110] ss:$12 sps:$4 sm:$0xff]   ;;  %5148 = vmatmul.mubr.bf16.gmra.mxu1 %v10994_v7  ;;  %v3543_v24 = vpop.f32.mrf.mxu1 }
 0x2a0   : > { %v3957_v53 = vrot.slane %v3955_v43, 7  ;;  %v3944_v50 = vor.u32 %v3942_v20, %v3941_v30  ;;  %v4274_v62 = vsel %vm9735_vm12, %v4272_v56, %v4273_v41  ;;  %v4282_v49 = vrot.slane %v3958_v17, 5  ;;  %8733 = vmatprep.mubr.bf16.mxu0 %v9205_v22  ;;  %v8116_v59 = vpop.f32.mrf.mxu0  ;;  %4164 = vst [vmem:[#allocation2 + $0x154] sm:$0xf] %v7730_v19  ;;  %v4395_v5 = vld [vmem:[#allocation2 + $0x14c] sm:$0xf] }
 0x2a1   : > { %v4276_v39 = vor.u32 %v4275_v63, %v4273_v41  ;;  %4390 = vst [vmem:[#allocation2 + $0x128] sm:$0xf] %v4274_v62  ;;  %v3952_v58 = vor.u32 %v3950_v10, %v3949_v60  ;;  %v3953_v23 = vrot.slane %v3949_v60, 4  ;;  %v4280_v13 = vor.u32 %v4279_v34, %v4278_v15  ;;  %v4094_v10 = vld [vmem:[#allocation2 + $0x150] sm:$0xf] }
 0x2a2   : > { %v3960_v38 = vor.u32 %v3958_v17, %v3957_v53  ;;  %v3945_v12 = vsel %vm9723_vm11, %v3937_v32, %v3944_v50  ;;  %v4284_v28 = vrot.slane %v3955_v43, 4  ;;  %v8118_v21 = vpop.f32.mrf.mxu0  ;;  %v3963_v2 = vshrl.u32 %v7730_v19, 16 }
 0x2a3   : > { %v4277_v47 = vrot.slane %v4276_v39, 4  ;;  %4089 = vst [vmem:[#allocation2 + $0x12c] sm:$0xf] %v3945_v12  ;;  %v4091_v52 = vsel %vm9746_vm13, %v3952_v58, %v4090_v0  ;;  %v4281_v27 = vrot.slane %v4280_v13, 4  ;;  %v3966_v45 = vshll.u32 %v7730_v19, 16 }
 0x2a4   : > { %v3961_v36 = vsel %vm9723_vm11, %v3953_v23, %v3960_v38  ;;  %4092 = vst [vmem:[#allocation2 + $0x138] sm:$0xf] %v4091_v52  ;;  %v4285_v32 = vor.u32 %v4284_v28, %v4282_v49  ;;  %v3653_v37 = vmax.f32 %v3621_v9, 0.0  ;;  %v8111_v8 = vadd.f32 %v10979_v57, %v10972_v25  ;;  %v8119_v63 = vpop.f32.mrf.mxu0  ;;  %v11023_v50 = vld [vmem:[#allocation2 + $0x124] ss:$12 sps:$4 sm:$0xff]   ;;  %v11879_v23 = vld [vmem:[#allocation48_spill] sm:$0xff] }
 0x2a5   : > { %v4392_v55 = vsel %vm9752_vm14, %v4277_v47, %v4391_v42  ;;  %4093 = vst [vmem:[#allocation2 + $0x144] sm:$0xf] %v3961_v36  ;;  %v4283_v29 = vsel %vm9735_vm12, %v4281_v27, %v4282_v49  ;;  %v8114_v31 = vadd.f32 %v8113_v26, %v10988_v51  ;;  %v3965_v56 = vrot.slane %v3963_v2, 7  ;;  %v11878_v51 = vld [vmem:[#allocation47_spill] sm:$0xff]  ;;  %5155 = vmatprep.mubr.bf16.mxu1 %v11023_v50  ;;  %v11032_v19 = vld [vmem:[#allocation2 + $0x13c] ss:$12 sps:$4 sm:$0xff]  }
 0x2a6   : > { %4393 = vst [vmem:[#allocation2 + $0x134] sm:$0xf] %v4392_v55  ;;  %v4286_v46 = vrot.slane %v4285_v32, 4  ;;  %4394 = vst [vmem:[#allocation2 + $0x140] sm:$0xf] %v4283_v29  ;;  %v4287_v16 = vrot.slane %v3963_v2, 4  ;;  %v7731_v43 = vpack.c.bf16 %v3653_v37, %v3653_v37  ;;  %v3541_v17 = vadd.f32 %v8111_v8, %v3540_v33 }
 0x2a7   : > { %v4288_v20 = vrot.slane %v3966_v45, 5  ;;  %v3544_v30 = vadd.f32 %v8114_v31, %v3543_v24  ;;  %v8117_v41 = vadd.f32 %v8116_v59, %v8115_v18  ;;  %v3968_v60 = vor.u32 %v3966_v45, %v3965_v56  ;;  %v4399_v52 = vld [vmem:[#allocation2 + $0x164] sm:$0xf]  ;;  %v11880_v9 = vld [vmem:[#allocation49_spill] sm:$0xff] }
 0x2a8   : > { %v4396_v4 = vsel %vm9752_vm14, %v4286_v46, %v4395_v5  ;;  %v3971_v25 = vshrl.u32 %v7731_v43, 16  ;;  %v3974_v57 = vshll.u32 %v7731_v43, 16  ;;  %4165 = vst [vmem:[#allocation2 + $0x160] sm:$0xf] %v7731_v43  ;;  %v3583_v26 = vadd.f32 %v3541_v17, %v11878_v51 }
 0x2a9   : > { %v4289_v15 = vor.u32 %v4288_v20, %v4287_v16  ;;  %4397 = vst [vmem:[#allocation2 + $0x14c] sm:$0xf] %v4396_v4  ;;  %v3584_v34 = vadd.f32 %v3544_v30, %v10959_v3  ;;  %v4095_v53 = vsel %vm9746_vm13, %v3968_v60, %v4094_v10  ;;  %v3549_v22 = vadd.f32 %v10983_v14, %v8117_v41 }
 0x2aa   : > { %v11021_v18 = vld [vmem:[#allocation2 + $0x120] ss:$12 sps:$4 sm:$0xff]   ;;  %v8120_v62 = vadd.f32 %v8119_v63, %v8118_v21  ;;  %4096 = vst [vmem:[#allocation2 + $0x150] sm:$0xf] %v4095_v53  ;;  %v3973_v39 = vrot.slane %v3971_v25, 7  ;;  %v4291_v0 = vrot.slane %v3974_v57, 5  ;;  %v3622_v42 = vadd.f32 %v10892_v48, %v3583_v26 }
 0x2ab   : > { %v4290_v33 = vrot.slane %v4289_v15, 4  ;;  %v4293_v49 = vrot.slane %v3971_v25, 4  ;;  %v3969_v58 = vrot.slane %v3965_v56, 4  ;;  %v3623_v3 = vadd.f32 %v10892_v48, %v3584_v34  ;;  %5156 = vmatmul.mubr.bf16.gmra.mxu1 %v11021_v18  ;;  %v4403_v34 = vld [vmem:[#allocation2 + $0x17c] sm:$0xf] }
 0x2ac   : > { %v3585_v13 = vadd.f32 %v3549_v22, %v11879_v23  ;;  %v3552_v38 = vadd.f32 %v8696_v6, %v8120_v62  ;;  %v3976_v59 = vor.u32 %v3974_v57, %v3973_v39  ;;  %v3654_v28 = vmax.f32 %v3622_v42, 0.0  ;;  %5163 = vmatprep.mubr.bf16.mxu1 %v11032_v19  ;;  %v11042_v46 = vld [vmem:[#allocation2 + $0x138] ss:$12 sps:$4 sm:$0xff]   ;;  %v4102_v39 = vld [vmem:[#allocation2 + $0x180] sm:$0xf] }
 0x2ad   : > { %v9211_v14 = vld [vmem:[#allocation2 + $0x128] ss:$12 sps:$4 sm:$0xff]   ;;  %v4292_v12 = vsel %vm9735_vm12, %v4290_v33, %v4291_v0  ;;  %v4294_v47 = vor.u32 %v4293_v49, %v4291_v0  ;;  %v3655_v27 = vmax.f32 %v3623_v3, 0.0 }
 0x2ae   : > { %4398 = vst [vmem:[#allocation2 + $0x158] sm:$0xf] %v4292_v12  ;;  %v3624_v36 = vadd.f32 %v10892_v48, %v3585_v13  ;;  %v3586_v21 = vadd.f32 %v3552_v38, %v11880_v9  ;;  %8734 = vmatmul.mubr.bf16.gmra.mxu0 %v9211_v14  ;;  %v3977_v6 = vsel %vm9723_vm11, %v3969_v58, %v3976_v59 }
 0x2af   : > { %v4295_v55 = vrot.slane %v4294_v47, 4  ;;  %v7732_v32 = vpack.c.bf16 %v3654_v28, %v3654_v28  ;;  %4097 = vst [vmem:[#allocation2 + $0x15c] sm:$0xf] %v3977_v6  ;;  %v7733_v2 = vpack.c.bf16 %v3655_v27, %v3655_v27  ;;  %v11051_v13 = vld [vmem:[#allocation2 + $0x154] ss:$12 sps:$4 sm:$0xff]  }
 0x2b0   : > { %v3656_v45 = vmax.f32 %v3624_v36, 0.0  ;;  %v3625_v29 = vadd.f32 %v10892_v48, %v3586_v21  ;;  %v9218_v5 = vld [vmem:[#allocation2 + $0x140] ss:$12 sps:$4 sm:$0xff]   ;;  %v4098_v48 = vld [vmem:[#allocation2 + $0x168] sm:$0xf] }
 0x2b1   : > { %v4400_v37 = vsel %vm9752_vm14, %v4295_v55, %v4399_v52  ;;  %v3979_v8 = vshrl.u32 %v7732_v32, 16  ;;  %v3982_v31 = vshll.u32 %v7732_v32, 16  ;;  %4166 = vst [vmem:[#allocation2 + $0x16c] sm:$0xf] %v7732_v32  ;;  %v3987_v56 = vshrl.u32 %v7733_v2, 16  ;;  %8737 = vmatprep.mubr.bf16.mxu0 %v9218_v5 }
 0x2b2   : > { %4401 = vst [vmem:[#allocation2 + $0x164] sm:$0xf] %v4400_v37  ;;  %v3990_v16 = vshll.u32 %v7733_v2, 16  ;;  %4167 = vst [vmem:[#allocation2 + $0x178] sm:$0xf] %v7733_v2  ;;  %v7734_v20 = vpack.c.bf16 %v3656_v45, %v3656_v45  ;;  %v3657_v17 = vmax.f32 %v3625_v29, 0.0 }
 0x2b3   : > { %v3981_v24 = vrot.slane %v3979_v8, 7  ;;  %v4296_v10 = vrot.slane %v3979_v8, 4  ;;  %v4297_v43 = vrot.slane %v3982_v31, 5  ;;  %v3989_v30 = vrot.slane %v3987_v56, 7  ;;  %5164 = vmatmul.mubr.bf16.gmra.mxu1 %v11042_v46 }
 0x2b4   : > { %v4300_v41 = vrot.slane %v3990_v16, 5  ;;  %v4302_v63 = vrot.slane %v3987_v56, 4  ;;  %v3995_v4 = vshrl.u32 %v7734_v20, 16  ;;  %4168 = vst [vmem:[#allocation2 + $0x184] sm:$0xf] %v7734_v20  ;;  %v3998_v57 = vshll.u32 %v7734_v20, 16  ;;  %5171 = vmatprep.mubr.bf16.mxu1 %v11051_v13 }
 0x2b5   : > { %v3984_v60 = vor.u32 %v3982_v31, %v3981_v24  ;;  %v3985_v15 = vrot.slane %v3981_v24, 4  ;;  %v4298_v25 = vor.u32 %v4297_v43, %v4296_v10  ;;  %v3992_v51 = vor.u32 %v3990_v16, %v3989_v30  ;;  %v9240_v24 = vld [vmem:[#allocation2 + $0x8] ss:$12 sps:$4 sm:$0xff]   ;;  %v9263_v10 = vld [vmem:[#allocation8 + $0x230] sm:$0xff]  }
 0x2b6   : > { %v4303_v26 = vor.u32 %v4302_v63, %v4300_v41  ;;  %v3997_v53 = vrot.slane %v3995_v4, 7  ;;  %v4305_v33 = vrot.slane %v3995_v4, 4  ;;  %v4306_v0 = vrot.slane %v3998_v57, 5  ;;  %v11049_v23 = vld [vmem:[#allocation2 + $0x150] ss:$12 sps:$4 sm:$0xff]   ;;  %v9244_v43 = vld [vmem:[#allocation8 + $0x1b8] sm:$0xff]  }
 0x2b7   : > { %v4099_v22 = vsel %vm9746_vm13, %v3984_v60, %v4098_v48  ;;  %v4299_v62 = vrot.slane %v4298_v25, 4  ;;  %v7735_v49 = vpack.c.bf16 %v3657_v17, %v3657_v17  ;;  %v3993_v42 = vsel %vm9723_vm11, %v3985_v15, %v3992_v51  ;;  %v9247_v17 = vld [vmem:[#allocation2 + $0x1c] ss:$12 sps:$4 sm:$0xff]   ;;  %v9241_v48 = vld [vmem:[#allocation2 + $0x20] ss:$12 sps:$4 sm:$0xff]  }
 0x2b8   : > { %4100 = vst [vmem:[#allocation2 + $0x168] sm:$0xf] %v4099_v22  ;;  %v4304_v58 = vrot.slane %v4303_v26, 4  ;;  %v4000_v3 = vor.u32 %v3998_v57, %v3997_v53  ;;  %4101 = vst [vmem:[#allocation2 + $0x174] sm:$0xf] %v3993_v42  ;;  %v4307_v14 = vor.u32 %v4306_v0, %v4305_v33  ;;  %v4001_v6 = vrot.slane %v3997_v53, 4 }
 0x2b9   : > { %v4301_v38 = vsel %vm9735_vm12, %v4299_v62, %v4300_v41  ;;  %v4003_v59 = vshrl.u32 %v7735_v49, 16  ;;  %v4006_v12 = vshll.u32 %v7735_v49, 16  ;;  %4169 = vst [vmem:[#allocation2 + $0x190] sm:$0xf] %v7735_v49  ;;  %v9224_v47 = vld [vmem:[#allocation2 + $0x158] ss:$12 sps:$4 sm:$0xff]   ;;  %v11073_v16 = vcombine.high %v9348_v44, %v9348_v44 }
 0x2ba   : > { %4402 = vst [vmem:[#allocation2 + $0x170] sm:$0xf] %v4301_v38  ;;  %v4404_v28 = vsel %vm9752_vm14, %v4304_v58, %v4403_v34  ;;  %v4103_v52 = vsel %vm9746_vm13, %v4000_v3, %v4102_v39  ;;  %v4308_v27 = vrot.slane %v4307_v14, 4  ;;  %8738 = vmatmul.mubr.bf16.gmra.mxu0 %v9224_v47  ;;  %v11067_v37 = vld [vmem:[#allocation2 + $0x16c] ss:$12 sps:$4 sm:$0xff]   ;;  %v9250_v30 = vld [vmem:[#allocation8 + $0x1f0] sm:$0xff]  }
 0x2bb   : > { %4405 = vst [vmem:[#allocation2 + $0x17c] sm:$0xf] %v4404_v28  ;;  %4104 = vst [vmem:[#allocation2 + $0x180] sm:$0xf] %v4103_v52  ;;  %v4005_v36 = vrot.slane %v4003_v59, 7  ;;  %v4309_v9 = vrot.slane %v4006_v12, 5  ;;  %5172 = vmatmul.mubr.bf16.gmra.mxu1 %v11049_v23 }
 0x2bc   : > { %v4311_v21 = vrot.slane %v4003_v59, 4  ;;  %5179 = vmatprep.mubr.bf16.mxu1 %v11067_v37  ;;  %v9243_v41 = vld [vmem:[#allocation2 + $0x38] ss:$12 sps:$4 sm:$0xff]   ;;  %v9349_v63 = vld [vmem:[#allocation8 + $0x238] sm:$0xff]   ;;  %v9293_v57 = vld [vmem:[#allocation8 + $0x220] sm:$0xff]  }
 0x2bd   : > { %v4008_v55 = vor.u32 %v4006_v12, %v4005_v36  ;;  %v4310_v32 = vsel %vm9735_vm12, %v4308_v27, %v4309_v9  ;;  %v9278_v4 = vld [vmem:[#allocation8 + $0x228] sm:$0xff]   ;;  %v9252_v60 = vld [vmem:[#allocation8 + $0x1b0] sm:$0xff]   ;;  %v9265_v53 = vld [vmem:[#allocation8 + $0x1e0] sm:$0xff]  }
 0x2be   : > { %v4312_v2 = vor.u32 %v4311_v21, %v4309_v9  ;;  %4406 = vst [vmem:[#allocation2 + $0x188] sm:$0xf] %v4310_v32  ;;  %v9257_v15 = vld [vmem:[#allocation8 + $0x1e8] sm:$0xff]   ;;  %v11079_v51 = vld [vmem:[#allocation2 + $0x34] ss:$12 sps:$4 sm:$0xff]   ;;  %v9303_v22 = vld [vmem:[#allocation8 + $0x218] sm:$0xff]  }
 0x2bf   : > { %v4009_v45 = vsel %vm9723_vm11, %v4001_v6, %v4008_v55  ;;  %v11065_v5 = vld [vmem:[#allocation2 + $0x168] ss:$12 sps:$4 sm:$0xff]   ;;  %v9245_v25 = vld [vmem:[#allocation2 + $0x18] ss:$12 sps:$4 sm:$0xff]   ;;  %v9249_v34 = vld [vmem:[#allocation2 + $0x50] ss:$12 sps:$4 sm:$0xff]  }
 0x2c0   : > { %v4313_v29 = vrot.slane %v4312_v2, 4  ;;  %4105 = vst [vmem:[#allocation2 + $0x18c] sm:$0xf] %v4009_v45  ;;  %v9236_v31 = vld [vmem:[#allocation2 + $0x184] ss:$12 sps:$4 sm:$0xff]   ;;  %v9259_v26 = vld [vmem:[#allocation8 + $0x1a8] sm:$0xff]  }
 0x2c1   : > { %v9251_v33 = vld [vmem:[#allocation2 + $0x68] ss:$12 sps:$4 sm:$0xff]   ;;  %v11082_v0 = vld [vmem:[#allocation2 + $0x30] ss:$12 sps:$4 sm:$0xff]   ;;  %v9304_v49 = vld [vmem:[#allocation8 + $0x210] sm:$0xff]  }
 0x2c2   : > { %v4408_v8 = vsel %vm9752_vm14, %v4313_v29, %v4407_v61  ;;  %v9231_v54 = vld [vmem:[#allocation2 + $0x170] ss:$12 sps:$4 sm:$0xff]   ;;  %v9272_v39 = vld [vmem:[#allocation8 + $0x1d8] sm:$0xff]   ;;  %v9280_v38 = vld [vmem:[#allocation8 + $0x1d0] sm:$0xff]  }
 0x2c3   : > { %4409 = vst [vmem:[#allocation2 + $0x194] sm:$0xf] %v4408_v8  ;;  %8741 = vmatprep.mubr.bf16.mxu0 %v9231_v54  ;;  %5180 = vmatmul.mubr.bf16.gmra.mxu1 %v11065_v5  ;;  %v9267_v62 = vld [vmem:[#allocation8 + $0x1a0] sm:$0xff]   ;;  %v11084_v42 = vld [vmem:[#allocation2 + $0x4c] ss:$12 sps:$4 sm:$0xff]   ;;  %v9282_v12 = vld [vmem:[#allocation8 + $0x190] sm:$0xff]  }
 0x2c4   : > { %5187 = vmatprep.mubr.bf16.mxu1 %v9236_v31  ;;  %v9274_v58 = vld [vmem:[#allocation8 + $0x198] sm:$0xff]   ;;  %v9258_v14 = vld [vmem:[#allocation2 + $0x98] ss:$12 sps:$4 sm:$0xff]   ;;  %v9306_v52 = vld [vmem:[#allocation8 + $0x200] sm:$0xff]  }
 0x2c5   : > { %v9256_v3 = vld [vmem:[#allocation2 + $0x80] ss:$12 sps:$4 sm:$0xff]   ;;  %v9305_v59 = vld [vmem:[#allocation8 + $0x208] sm:$0xff]   ;;  %v11088_v28 = vld [vmem:[#allocation2 + $0x48] ss:$12 sps:$4 sm:$0xff]  }
 0x2c6   : > { %v9287_v47 = vld [vmem:[#allocation8 + $0x1c8] sm:$0xff]   ;;  %v11090_v27 = vld [vmem:[#allocation2 + $0x64] ss:$12 sps:$4 sm:$0xff]   ;;  %v9266_v6 = vld [vmem:[#allocation2 + $0xc8] ss:$12 sps:$4 sm:$0xff]  }
 0x2c7   : > { %v9234_v56 = vld [vmem:[#allocation2 + $0x180] ss:$12 sps:$4 sm:$0xff]   ;;  %v9289_v36 = vld [vmem:[#allocation8 + $0x188] sm:$0xff]   ;;  %v9295_v21 = vld [vmem:[#allocation8 + $0x1c0] sm:$0xff]  }
 0x2c8   : > { %v9264_v9 = vld [vmem:[#allocation2 + $0xb0] ss:$12 sps:$4 sm:$0xff]   ;;  %v11094_v32 = vld [vmem:[#allocation2 + $0x60] ss:$12 sps:$4 sm:$0xff]   ;;  %v9273_v45 = vld [vmem:[#allocation2 + $0xf8] ss:$12 sps:$4 sm:$0xff]  }
 0x2c9   : > { %v9296_v55 = vld [vmem:[#allocation8 + $0x180] sm:$0xff]   ;;  %v11096_v2 = vld [vmem:[#allocation2 + $0x7c] ss:$12 sps:$4 sm:$0xff]   ;;  %v9271_v61 = vld [vmem:[#allocation2 + $0xe0] ss:$12 sps:$4 sm:$0xff]  }
 0x2ca   : > { %v9237_v20 = vld [vmem:[#allocation2 + $0x188] ss:$12 sps:$4 sm:$0xff]   ;;  %v11100_v29 = vld [vmem:[#allocation2 + $0x78] ss:$12 sps:$4 sm:$0xff]   ;;  %v9279_v54 = vld [vmem:[#allocation2 + $0x110] ss:$12 sps:$4 sm:$0xff]  }
 0x2cb   : > { %8742 = vmatmul.mubr.bf16.gmra.mxu0 %v9237_v20  ;;  %5188 = vmatmul.mubr.bf16.gmra.mxu1 %v9234_v56  ;;  %v11102_v8 = vld [vmem:[#allocation2 + $0x94] ss:$12 sps:$4 sm:$0xff]   ;;  %v11106_v56 = vld [vmem:[#allocation2 + $0x90] ss:$12 sps:$4 sm:$0xff]   ;;  %v11108_v44 = vld [vmem:[#allocation2 + $0xac] ss:$12 sps:$4 sm:$0xff]  }
 0x2cc   : > { %5789 = vmatprep.mubr.bf16.mxu0 %v11073_v16  ;;  %8761 = vmatprep.mubr.bf16.mxu1 %v9240_v24  ;;  %v9281_v31 = vld [vmem:[#allocation2 + $0x128] ss:$12 sps:$4 sm:$0xff]   ;;  %v9286_v20 = vld [vmem:[#allocation2 + $0x140] ss:$12 sps:$4 sm:$0xff]   ;;  %v9288_v24 = vld [vmem:[#allocation2 + $0x158] ss:$12 sps:$4 sm:$0xff]  }
 0x2d3   : > { %5790 = vmatmul.mubr.bf16.vlgmr.msra.gmra.mxu0 %v11076_v1  ;;  %8762 = vmatmul.mubr.bf16.vlgmr.msra.gmra.mxu1 %v9241_v48 }
 0x2d4   : > { %5797 = vmatprep.mubr.bf16.mxu0 %v9247_v17  ;;  %8794 = vmatpush3.bf16.msra.mxu0 %v9349_v63  ;;  %v9294_v17 = vld [vmem:[#allocation2 + $0x170] ss:$12 sps:$4 sm:$0xff]  }
 0x2d5   : > { %8795 = vmatprep.subr.bf16.mxu0 %v9263_v10  ;;  %8765 = vmatprep.mubr.bf16.mxu1 %v9243_v41 }
 0x2d6   : > { %8418 = vmatpush3.bf16.msra.mxu1 %v9244_v43  ;;  %v11114_v43 = vld [vmem:[#allocation2 + $0xc4] ss:$12 sps:$4 sm:$0xff]  }
 0x2d7   : > { %8419 = vmatprep.subr.bf16.mxu1 %v9250_v30 }
 0x2d8   : > { %8796 = vmatpush3.bf16.msra.mxu0 %v9263_v10  ;;  %v11112_v10 = vld [vmem:[#allocation2 + $0xa8] ss:$12 sps:$4 sm:$0xff]  }
 0x2d9   : > { %8797 = vmatprep.subr.bf16.mxu0 %v9278_v4 }
 0x2da   : > { %8420 = vmatpush3.bf16.msra.mxu1 %v9252_v60 }
 0x2db   : > { %5798 = vmatmul.mubr.bf16.gmra.mxu0 %v9245_v25  ;;  %8421 = vmatprep.subr.bf16.mxu1 %v9257_v15  ;;  %v11121_v15 = vld [vmem:[#allocation2 + $0xdc] ss:$12 sps:$4 sm:$0xff]  }
 0x2dc   : > { %5805 = vmatprep.mubr.bf16.mxu0 %v11079_v51  ;;  %8798 = vmatpush3.bf16.msra.mxu0 %v9278_v4  ;;  %v11119_v4 = vld [vmem:[#allocation2 + $0xc0] ss:$12 sps:$4 sm:$0xff]  }
 0x2dd   : > { %8766 = vmatmul.mubr.bf16.gmra.mxu1 %v9249_v34  ;;  %8799 = vmatprep.subr.bf16.mxu0 %v9293_v57 }
 0x2de   : > { %8769 = vmatprep.mubr.bf16.mxu1 %v9251_v33  ;;  %8422 = vmatpush3.bf16.msra.mxu1 %v9259_v26 }
 0x2df   : > { %8423 = vmatprep.subr.bf16.mxu1 %v9265_v53  ;;  %v11129_v53 = vld [vmem:[#allocation2 + $0xd8] ss:$12 sps:$4 sm:$0xff]  }
 0x2e0   : > { %8800 = vmatpush3.bf16.msra.mxu0 %v9293_v57 }
 0x2e1   : > { %8801 = vmatprep.subr.bf16.mxu0 %v9303_v22 }
 0x2e2   : > { %8424 = vmatpush3.bf16.msra.mxu1 %v9267_v62 }
 0x2e3   : > { %5806 = vmatmul.mubr.bf16.gmra.mxu0 %v11082_v0  ;;  %8425 = vmatprep.subr.bf16.mxu1 %v9272_v39 }
 0x2e4   : > { %5813 = vmatprep.mubr.bf16.mxu0 %v11084_v42  ;;  %8802 = vmatpush3.bf16.msra.mxu0 %v9303_v22 }
 0x2e5   : > { %8770 = vmatmul.mubr.bf16.gmra.mxu1 %v9256_v3  ;;  %8803 = vmatprep.subr.bf16.mxu0 %v9304_v49 }
 0x2e6   : > { %8773 = vmatprep.mubr.bf16.mxu1 %v9258_v14  ;;  %8426 = vmatpush3.bf16.msra.mxu1 %v9274_v58 }
 0x2e7   : > { %8427 = vmatprep.subr.bf16.mxu1 %v9280_v38 }
 0x2e8   : > { %8804 = vmatpush3.bf16.msra.mxu0 %v9304_v49 }
 0x2e9   : > { %8805 = vmatprep.subr.bf16.mxu0 %v9305_v59 }
 0x2ea   : > { %8428 = vmatpush3.bf16.msra.mxu1 %v9282_v12 }
 0x2eb   : > { %5814 = vmatmul.mubr.bf16.gmra.mxu0 %v11088_v28  ;;  %8429 = vmatprep.subr.bf16.mxu1 %v9287_v47 }
 0x2ec   : > { %5821 = vmatprep.mubr.bf16.mxu0 %v11090_v27  ;;  %8806 = vmatpush3.bf16.msra.mxu0 %v9305_v59 }
 0x2ed   : > { %8774 = vmatmul.mubr.bf16.gmra.mxu1 %v9264_v9  ;;  %8807 = vmatprep.subr.bf16.mxu0 %v9306_v52 }
 0x2ee   : > { %8777 = vmatprep.mubr.bf16.mxu1 %v9266_v6  ;;  %8430 = vmatpush3.bf16.msra.mxu1 %v9289_v36 }
 0x2ef   : > { %8431 = vmatprep.subr.bf16.mxu1 %v9295_v21 }
 0x2f0   : > { %8808 = vmatpush3.bf16.msra.mxu0 %v9306_v52 }
 0x2f2   : > { %8432 = vmatpush3.bf16.msra.mxu1 %v9296_v55 }
 0x2f3   : > { %5822 = vmatmul.mubr.bf16.gmra.mxu0 %v11094_v32 }
 0x2f4   : > { %5829 = vmatprep.mubr.bf16.mxu0 %v11096_v2 }
 0x2f5   : > { %8778 = vmatmul.mubr.bf16.gmra.mxu1 %v9271_v61 }
 0x2f6   : > { %8781 = vmatprep.mubr.bf16.mxu1 %v9273_v45 }
 0x2fb   : > { %5830 = vmatmul.mubr.bf16.gmra.mxu0 %v11100_v29 }
 0x2fc   : > { %5837 = vmatprep.mubr.bf16.mxu0 %v11102_v8 }
 0x2fd   : > { %8782 = vmatmul.mubr.bf16.gmra.mxu1 %v9279_v54 }
 0x2fe   : > { %8785 = vmatprep.mubr.bf16.mxu1 %v9281_v31 }
 0x303   : > { %5838 = vmatmul.mubr.bf16.gmra.mxu0 %v11106_v56 }
 0x304   : > { %5845 = vmatprep.mubr.bf16.mxu0 %v11108_v44 }
 0x305   : > { %8786 = vmatmul.mubr.bf16.gmra.mxu1 %v9286_v20 }
 0x306   : > { %8789 = vmatprep.mubr.bf16.mxu1 %v9288_v24 }
 0x308   : > { %v8161_v48 = vpop.f32.mrf.mxu1 }
 0x30a   : > { %v8162_v30 = vpop.f32.mrf.mxu1 }
 0x30b   : > { %5846 = vmatmul.mubr.bf16.gmra.mxu0 %v11112_v10  ;;  %v8163_v41 = vadd.f32 %v8162_v30, %v8161_v48 }
 0x30c   : > { %5853 = vmatprep.mubr.bf16.mxu0 %v11114_v43  ;;  %v8164_v63 = vpop.f32.mrf.mxu1 }
 0x30d   : > { %8790 = vmatmul.mubr.bf16.gmra.mxu1 %v9294_v17 }
 0x30e   : > { %6624 = vmatprep.mubr.bf16.mxu1 %v11079_v51  ;;  %v8165_v60 = vpop.f32.mrf.mxu1 }
 0x30f   : > { %v11123_v25 = vadd.f32 %v8165_v60, %v8164_v63 }
 0x313   : > { %5854 = vmatmul.mubr.bf16.gmra.mxu0 %v11119_v4 }
 0x314   : > { %5861 = vmatprep.mubr.bf16.mxu0 %v11121_v15  ;;  %v8167_v57 = vpop.f32.mrf.mxu1  ;;  %v8715_v26 = vpop.f32.mrf.mxu0 }
 0x315   : > { %6625 = vmatmul.mubr.bf16.vlgmr.msra.gmra.mxu1 %v11082_v0 }
 0x316   : > { %6632 = vmatprep.mubr.bf16.mxu1 %v11084_v42  ;;  %v8168_v51 = vpop.f32.mrf.mxu1  ;;  %v5230_v34 = vpop.f32.mrf.mxu0 }
 0x317   : > { %v8169_v33 = vadd.f32 %v8168_v51, %v8167_v57  ;;  %v11131_v22 = vadd.f32 %v8163_v41, %v5230_v34 }
 0x318   : > { %v8170_v62 = vpop.f32.mrf.mxu1  ;;  %v8716_v42 = vpop.f32.mrf.mxu0 }
 0x319   : > { %v11134_v39 = vadd.f32 %v8715_v26, %v8169_v33 }
 0x31a   : > { %v8171_v49 = vpop.f32.mrf.mxu1  ;;  %v11146_v47 = vpop.f32.mrf.mxu0 }
 0x31b   : > { %5862 = vmatmul.mubr.bf16.gmra.mxu0 %v11129_v53  ;;  %v8172_v0 = vadd.f32 %v8171_v49, %v8170_v62  ;;  %v9310_v62 = vld [vmem:[#allocation2 + $0x38] ss:$12 sps:$4 sm:$0xff]  }
 0x31c   : > { %5869 = vmatprep.mubr.bf16.mxu0 %v10970_v40  ;;  %v8173_v58 = vpop.f32.mrf.mxu1 }
 0x31d   : > { %6633 = vmatmul.mubr.bf16.gmra.mxu1 %v11088_v28  ;;  %v11139_v3 = vadd.f32 %v8716_v42, %v8172_v0 }
 0x31e   : > { %6640 = vmatprep.mubr.bf16.mxu1 %v11090_v27  ;;  %v8174_v38 = vpop.f32.mrf.mxu1 }
 0x31f   : > { %v8175_v14 = vadd.f32 %v8174_v38, %v8173_v58 }
 0x320   : > { %v8176_v59 = vpop.f32.mrf.mxu1 }
 0x322   : > { %v8177_v12 = vpop.f32.mrf.mxu1 }
 0x323   : > { %5870 = vmatmul.mubr.bf16.gmra.mxu0 %v10965_v35  ;;  %v11144_v40 = vadd.f32 %v8177_v12, %v8176_v59  ;;  %v9314_v12 = vld [vmem:[#allocation2 + $0x50] ss:$12 sps:$4 sm:$0xff]  }
 0x324   : > { %5877 = vmatprep.mubr.bf16.mxu0 %v10990_v11 }
 0x325   : > { %6641 = vmatmul.mubr.bf16.gmra.mxu1 %v11094_v32  ;;  %v8179_v28 = vpop.f32.mrf.mxu1 }
 0x326   : > { %6648 = vmatprep.mubr.bf16.mxu1 %v11096_v2 }
 0x327   : > { %v8719_v52 = vpop.f32.mrf.mxu0  ;;  %v8180_v27 = vpop.f32.mrf.mxu1 }
 0x328   : > { %v8181_v36 = vadd.f32 %v8180_v27, %v8179_v28 }
 0x329   : > { %v5246_v9 = vpop.f32.mrf.mxu0  ;;  %v8182_v21 = vpop.f32.mrf.mxu1 }
 0x32a   : > { %v11150_v35 = vadd.f32 %v8719_v52, %v8181_v36  ;;  %v11152_v11 = vadd.f32 %v8175_v14, %v5246_v9  ;;  %v9307_v52 = vld [vmem:[#allocation2 + $0xf0] ss:$12 sps:$4 sm:$0xff]   ;;  %v9313_v36 = vld [vmem:[#allocation2 + $0x10c] ss:$12 sps:$4 sm:$0xff]  }
 0x32b   : > { %5878 = vmatmul.mubr.bf16.gmra.mxu0 %v10994_v7  ;;  %v8183_v6 = vpop.f32.mrf.mxu1  ;;  %v8720_v32 = vpop.f32.mrf.mxu0 }
 0x32c   : > { %5885 = vmatprep.mubr.bf16.mxu0 %v11023_v50  ;;  %v8184_v55 = vadd.f32 %v8183_v6, %v8182_v21 }
 0x32d   : > { %6649 = vmatmul.mubr.bf16.gmra.mxu1 %v11100_v29  ;;  %v8185_v2 = vpop.f32.mrf.mxu1  ;;  %v11164_v29 = vpop.f32.mrf.mxu0 }
 0x32e   : > { %6656 = vmatprep.mubr.bf16.mxu1 %v11102_v8  ;;  %v11157_v61 = vadd.f32 %v8720_v32, %v8184_v55  ;;  %v9319_v55 = vld [vmem:[#allocation2 + $0x80] ss:$12 sps:$4 sm:$0xff]  }
 0x32f   : > { %v8186_v45 = vpop.f32.mrf.mxu1 }
 0x330   : > { %v8187_v54 = vadd.f32 %v8186_v45, %v8185_v2  ;;  %v9320_v2 = vld [vmem:[#allocation2 + $0x98] ss:$12 sps:$4 sm:$0xff]   ;;  %v9311_v45 = vld [vmem:[#allocation2 + $0x108] ss:$12 sps:$4 sm:$0xff]  }
 0x331   : > { %v8188_v31 = vpop.f32.mrf.mxu1 }
 0x333   : > { %5886 = vmatmul.mubr.bf16.gmra.mxu0 %v11021_v18  ;;  %v8189_v7 = vpop.f32.mrf.mxu1 }
 0x334   : > { %5893 = vmatprep.mubr.bf16.mxu0 %v11032_v19  ;;  %v11162_v50 = vadd.f32 %v8189_v7, %v8188_v31  ;;  %v9318_v7 = vld [vmem:[#allocation2 + $0x124] ss:$12 sps:$4 sm:$0xff]  }
 0x335   : > { %6657 = vmatmul.mubr.bf16.gmra.mxu1 %v11106_v56  ;;  %v8191_v8 = vpop.f32.mrf.mxu1 }
 0x336   : > { %6664 = vmatprep.mubr.bf16.mxu1 %v11108_v44 }
 0x337   : > { %v8723_v20 = vpop.f32.mrf.mxu0  ;;  %v8192_v24 = vpop.f32.mrf.mxu1 }
 0x338   : > { %v8193_v17 = vadd.f32 %v8192_v24, %v8191_v8 }
 0x339   : > { %v5262_v48 = vpop.f32.mrf.mxu0  ;;  %v8194_v18 = vpop.f32.mrf.mxu1 }
 0x33a   : > { %v11168_v30 = vadd.f32 %v8187_v54, %v5262_v48  ;;  %v11170_v19 = vadd.f32 %v8723_v20, %v8193_v17 }
 0x33b   : > { %5894 = vmatmul.mubr.bf16.gmra.mxu0 %v11042_v46  ;;  %v8195_v56 = vpop.f32.mrf.mxu1  ;;  %v8724_v41 = vpop.f32.mrf.mxu0 }
 0x33c   : > { %5901 = vmatprep.mubr.bf16.mxu0 %v11051_v13  ;;  %v8196_v44 = vadd.f32 %v8195_v56, %v8194_v18 }
 0x33d   : > { %6665 = vmatmul.mubr.bf16.gmra.mxu1 %v11112_v10  ;;  %v11179_v26 = vpop.f32.mrf.mxu0 }
 0x33e   : > { %6672 = vmatprep.mubr.bf16.mxu1 %v11114_v43  ;;  %v11175_v63 = vadd.f32 %v8724_v41, %v8196_v44  ;;  %v9324_v41 = vld [vmem:[#allocation2 + $0xb0] ss:$12 sps:$4 sm:$0xff]  }
 0x33f   : > { %v8197_v60 = vpop.f32.mrf.mxu1 }
 0x341   : > { %v8198_v46 = vpop.f32.mrf.mxu1 }
 0x342   : > { %v8199_v57 = vadd.f32 %v8198_v46, %v8197_v60 }
 0x343   : > { %5902 = vmatmul.mubr.bf16.gmra.mxu0 %v11049_v23  ;;  %v8200_v13 = vpop.f32.mrf.mxu1 }
 0x344   : > { %5909 = vmatprep.mubr.bf16.mxu0 %v11067_v37  ;;  %v9309_v37 = vld [vmem:[#allocation2 + $0xf4] ss:$12 sps:$4 sm:$0xff]  }
 0x345   : > { %6673 = vmatmul.mubr.bf16.gmra.mxu1 %v11119_v4  ;;  %v8201_v10 = vpop.f32.mrf.mxu1  ;;  %v8727_v43 = vpop.f32.mrf.mxu0 }
 0x346   : > { %6680 = vmatprep.mubr.bf16.mxu1 %v11121_v15  ;;  %v8202_v51 = vadd.f32 %v8201_v10, %v8200_v13  ;;  %v9316_v13 = vld [vmem:[#allocation2 + $0x120] ss:$12 sps:$4 sm:$0xff]  }
 0x347   : > { %v8203_v34 = vpop.f32.mrf.mxu1  ;;  %v5278_v33 = vpop.f32.mrf.mxu0 }
 0x348   : > { %v11183_v49 = vadd.f32 %v8199_v57, %v5278_v33  ;;  %v9325_v57 = vld [vmem:[#allocation2 + $0xc8] ss:$12 sps:$4 sm:$0xff]  }
 0x349   : > { %v8204_v23 = vpop.f32.mrf.mxu1  ;;  %v8728_v0 = vpop.f32.mrf.mxu0 }
 0x34a   : > { %v8205_v42 = vadd.f32 %v8204_v23, %v8203_v34  ;;  %v9323_v34 = vld [vmem:[#allocation2 + $0x13c] ss:$12 sps:$4 sm:$0xff]  }
 0x34b   : > { %5910 = vmatmul.mubr.bf16.gmra.mxu0 %v11065_v5  ;;  %v8206_v4 = vpop.f32.mrf.mxu1  ;;  %v5281_v58 = vpop.f32.mrf.mxu0  ;;  %v9315_v5 = vld [vmem:[#allocation2 + $0x68] ss:$12 sps:$4 sm:$0xff]  }
 0x34c   : > { %8809 = vmatprep.mubr.bf16.mxu0 %v9310_v62  ;;  %v11187_v15 = vadd.f32 %v8727_v43, %v8205_v42  ;;  %v11189_v38 = vadd.f32 %v8202_v51, %v5281_v58  ;;  %v9321_v58 = vld [vmem:[#allocation2 + $0x138] ss:$12 sps:$4 sm:$0xff]  }
 0x34d   : > { %6681 = vmatmul.mubr.bf16.gmra.mxu1 %v11129_v53  ;;  %v8207_v14 = vpop.f32.mrf.mxu1 }
 0x34e   : > { %6688 = vmatprep.mubr.bf16.mxu1 %v9309_v37  ;;  %v8208_v59 = vadd.f32 %v8207_v14, %v8206_v4  ;;  %v9329_v37 = vld [vmem:[#allocation2 + $0xe0] ss:$12 sps:$4 sm:$0xff]   ;;  %v9330_v4 = vld [vmem:[#allocation2 + $0xf8] ss:$12 sps:$4 sm:$0xff]  }
 0x34f   : > { %v8209_v27 = vpop.f32.mrf.mxu1  ;;  %v9328_v14 = vld [vmem:[#allocation2 + $0x154] ss:$12 sps:$4 sm:$0xff]  }
 0x350   : > { %v11191_v28 = vadd.f32 %v8728_v0, %v8208_v59 }
 0x351   : > { %v8210_v53 = vpop.f32.mrf.mxu1 }
 0x352   : > { %v8211_v9 = vadd.f32 %v8210_v53, %v8209_v27 }
 0x353   : > { %8810 = vmatmul.mubr.bf16.vlgmr.msra.gmra.mxu0 %v9314_v12  ;;  %v8212_v21 = vpop.f32.mrf.mxu1 }
 0x354   : > { %8813 = vmatprep.mubr.bf16.mxu0 %v9315_v5 }
 0x355   : > { %6689 = vmatmul.mubr.bf16.gmra.mxu1 %v9307_v52  ;;  %v8213_v6 = vpop.f32.mrf.mxu1 }
 0x356   : > { %6696 = vmatprep.mubr.bf16.mxu1 %v9313_v36  ;;  %v8214_v32 = vadd.f32 %v8213_v6, %v8212_v21 }
 0x357   : > { %v8215_v54 = vpop.f32.mrf.mxu1 }
 0x359   : > { %v8216_v8 = vpop.f32.mrf.mxu1 }
 0x35a   : > { %v8731_v31 = vpop.f32.mrf.mxu0  ;;  %v8217_v20 = vadd.f32 %v8216_v8, %v8215_v54 }
 0x35b   : > { %8814 = vmatmul.mubr.bf16.gmra.mxu0 %v9319_v55  ;;  %v8218_v48 = vpop.f32.mrf.mxu1  ;;  %v9335_v55 = vld [vmem:[#allocation2 + $0x128] ss:$12 sps:$4 sm:$0xff]  }
 0x35c   : > { %8817 = vmatprep.mubr.bf16.mxu0 %v9320_v2  ;;  %v5294_v24 = vpop.f32.mrf.mxu0  ;;  %v11195_v18 = vadd.f32 %v8731_v31, %v8217_v20  ;;  %v9333_v31 = vld [vmem:[#allocation2 + $0x16c] ss:$12 sps:$4 sm:$0xff]  }
 0x35d   : > { %6697 = vmatmul.mubr.bf16.gmra.mxu1 %v9311_v45  ;;  %v11193_v17 = vadd.f32 %v8211_v9, %v5294_v24  ;;  %v8219_v44 = vpop.f32.mrf.mxu1  ;;  %v9334_v9 = vld [vmem:[#allocation2 + $0x110] ss:$12 sps:$4 sm:$0xff]  }
 0x35e   : > { %6704 = vmatprep.mubr.bf16.mxu1 %v9318_v7  ;;  %v8732_v56 = vpop.f32.mrf.mxu0  ;;  %v8220_v60 = vadd.f32 %v8219_v44, %v8218_v48  ;;  %v9339_v44 = vld [vmem:[#allocation2 + $0x140] ss:$12 sps:$4 sm:$0xff]  }
 0x35f   : > { %v8221_v43 = vpop.f32.mrf.mxu1 }
 0x360   : > { %v5297_v46 = vpop.f32.mrf.mxu0  ;;  %v11199_v51 = vadd.f32 %v8732_v56, %v8220_v60  ;;  %v9331_v60 = vld [vmem:[#allocation2 + $0x168] ss:$12 sps:$4 sm:$0xff]  }
 0x361   : > { %v11197_v10 = vadd.f32 %v8214_v32, %v5297_v46  ;;  %v8222_v33 = vpop.f32.mrf.mxu1  ;;  %v9326_v32 = vld [vmem:[#allocation2 + $0x150] ss:$12 sps:$4 sm:$0xff]  }
 0x362   : > { %v8223_v62 = vadd.f32 %v8222_v33, %v8221_v43  ;;  %v9338_v43 = vld [vmem:[#allocation2 + $0x184] ss:$12 sps:$4 sm:$0xff]  }
 0x363   : > { %8818 = vmatmul.mubr.bf16.gmra.mxu0 %v9324_v41  ;;  %v8224_v23 = vpop.f32.mrf.mxu1  ;;  %v9340_v41 = vld [vmem:[#allocation2 + $0x158] ss:$12 sps:$4 sm:$0xff]  }
 0x364   : > { %8821 = vmatprep.mubr.bf16.mxu0 %v9325_v57 }
 0x365   : > { %6705 = vmatmul.mubr.bf16.gmra.mxu1 %v9316_v13  ;;  %v8225_v0 = vpop.f32.mrf.mxu1 }
 0x366   : > { %6712 = vmatprep.mubr.bf16.mxu1 %v9323_v34  ;;  %v8226_v42 = vadd.f32 %v8225_v0, %v8224_v23 }
 0x36b   : > { %8822 = vmatmul.mubr.bf16.gmra.mxu0 %v9329_v37  ;;  %v8227_v59 = vpop.f32.mrf.mxu1 }
 0x36c   : > { %8825 = vmatprep.mubr.bf16.mxu0 %v9330_v4 }
 0x36d   : > { %6713 = vmatmul.mubr.bf16.gmra.mxu1 %v9321_v58  ;;  %v8228_v5 = vpop.f32.mrf.mxu1  ;;  %v9341_v58 = vld [vmem:[#allocation2 + $0x170] ss:$12 sps:$4 sm:$0xff]  }
 0x36e   : > { %v8735_v12 = vpop.f32.mrf.mxu0  ;;  %6720 = vmatprep.mubr.bf16.mxu1 %v9328_v14  ;;  %v8229_v52 = vadd.f32 %v8228_v5, %v8227_v59  ;;  %v9336_v5 = vld [vmem:[#allocation2 + $0x180] ss:$12 sps:$4 sm:$0xff]  }
 0x36f   : > { %v8230_v53 = vpop.f32.mrf.mxu1 }
 0x370   : > { %v5310_v27 = vpop.f32.mrf.mxu0  ;;  %v11203_v21 = vadd.f32 %v8735_v12, %v8229_v52  ;;  %v9342_v12 = vld [vmem:[#allocation2 + $0x188] ss:$12 sps:$4 sm:$0xff]  }
 0x371   : > { %v11201_v36 = vadd.f32 %v8223_v62, %v5310_v27  ;;  %v8231_v2 = vpop.f32.mrf.mxu1 }
 0x372   : > { %v8736_v6 = vpop.f32.mrf.mxu0  ;;  %v8232_v45 = vadd.f32 %v8231_v2, %v8230_v53 }
 0x373   : > { %8826 = vmatmul.mubr.bf16.gmra.mxu0 %v9334_v9  ;;  %v8233_v8 = vpop.f32.mrf.mxu1 }
 0x374   : > { %v5313_v54 = vpop.f32.mrf.mxu0  ;;  %8829 = vmatprep.mubr.bf16.mxu0 %v9335_v55  ;;  %v11207_v20 = vadd.f32 %v8736_v6, %v8232_v45  ;;  %v9343_v55 = vld [vmem:[#allocation2 + $0x1a0] ss:$12 sps:$4 sm:$0xff]  }
 0x375   : > { %v11205_v7 = vadd.f32 %v8226_v42, %v5313_v54  ;;  %6721 = vmatmul.mubr.bf16.gmra.mxu1 %v9326_v32  ;;  %v8234_v24 = vpop.f32.mrf.mxu1 }
 0x376   : > { %6728 = vmatprep.mubr.bf16.mxu1 %v9333_v31  ;;  %v8235_v48 = vadd.f32 %v8234_v24, %v8233_v8 }
 0x377   : > { %v8236_v56 = vpop.f32.mrf.mxu1 }
 0x379   : > { %v8237_v46 = vpop.f32.mrf.mxu1 }
 0x37a   : > { %v8739_v57 = vpop.f32.mrf.mxu0  ;;  %v8238_v13 = vadd.f32 %v8237_v46, %v8236_v56 }
 0x37b   : > { %8830 = vmatmul.mubr.bf16.gmra.mxu0 %v9339_v44  ;;  %v8239_v34 = vpop.f32.mrf.mxu1 }
 0x37c   : > { %8833 = vmatprep.mubr.bf16.mxu0 %v9340_v41  ;;  %v5326_v33 = vpop.f32.mrf.mxu0 }
 0x37d   : > { %6729 = vmatmul.mubr.bf16.gmra.mxu1 %v9331_v60  ;;  %v11209_v62 = vadd.f32 %v8235_v48, %v5326_v33  ;;  %v8240_v23 = vpop.f32.mrf.mxu1 }
 0x37e   : > { %6736 = vmatprep.mubr.bf16.mxu1 %v9338_v43  ;;  %v8740_v0 = vpop.f32.mrf.mxu0  ;;  %v8241_v37 = vadd.f32 %v8240_v23, %v8239_v34 }
 0x37f   : > { %v8242_v42 = vpop.f32.mrf.mxu1 }
 0x380   : > { %v5329_v4 = vpop.f32.mrf.mxu0  ;;  %v11211_v14 = vadd.f32 %v8739_v57, %v8241_v37 }
 0x381   : > { %v11213_v59 = vadd.f32 %v8238_v13, %v5329_v4  ;;  %v8243_v52 = vpop.f32.mrf.mxu1 }
 0x382   : > { %v8244_v27 = vadd.f32 %v8243_v52, %v8242_v42 }
 0x383   : > { %8834 = vmatmul.mubr.bf16.gmra.mxu0 %v9341_v58  ;;  %v8245_v53 = vpop.f32.mrf.mxu1 }
 0x384   : > { %8837 = vmatprep.mubr.bf16.mxu0 %v9342_v12  ;;  %v11215_v9 = vadd.f32 %v8740_v0, %v8244_v27 }
 0x385   : > { %6737 = vmatmul.mubr.bf16.gmra.mxu1 %v9336_v5  ;;  %v8246_v6 = vpop.f32.mrf.mxu1  ;;  %v5234_v5 = vadd.f32 %v11123_v25, %v11146_v47 }
 0x386   : > { %6744 = vmatprep.mubr.bf16.mxu1 %v11073_v16  ;;  %v8247_v32 = vadd.f32 %v8246_v6, %v8245_v53 }
 0x387   : > { %v8248_v2 = vpop.f32.mrf.mxu1 }
 0x389   : > { %v8249_v45 = vpop.f32.mrf.mxu1 }
 0x38a   : > { %v8250_v31 = vadd.f32 %v8249_v45, %v8248_v2 }
 0x38b   : > { %v8743_v54 = vpop.f32.mrf.mxu0  ;;  %8838 = vmatmul.mubr.bf16.gmra.mxu0 %v9343_v55  ;;  %v8251_v8 = vpop.f32.mrf.mxu1 }
 0x38d   : > { %6745 = vmatmul.mubr.bf16.gmra.mxu1 %v11076_v1  ;;  %v5342_v24 = vpop.f32.mrf.mxu0  ;;  %v8252_v56 = vpop.f32.mrf.mxu1 }
 0x38e   : > { %v11219_v48 = vadd.f32 %v8247_v32, %v5342_v24  ;;  %v8253_v41 = vadd.f32 %v8252_v56, %v8251_v8 }
 0x38f   : > { %v8744_v44 = vpop.f32.mrf.mxu0  ;;  %v8254_v60 = vpop.f32.mrf.mxu1 }
 0x390   : > { %v11221_v16 = vadd.f32 %v8743_v54, %v8253_v41 }
 0x391   : > { %v5345_v46 = vpop.f32.mrf.mxu0  ;;  %v8255_v13 = vpop.f32.mrf.mxu1 }
 0x392   : > { %v11223_v57 = vadd.f32 %v8250_v31, %v5345_v46  ;;  %v8256_v34 = vadd.f32 %v8255_v13, %v8254_v60 }
 0x393   : > { %v8297_v43 = vpop.f32.mrf.mxu0  ;;  %v8763_v33 = vpop.f32.mrf.mxu1 }
 0x394   : > { %v11225_v0 = vadd.f32 %v8744_v44, %v8256_v34 }
 0x395   : > { %v8298_v23 = vpop.f32.mrf.mxu0  ;;  %v5952_v37 = vpop.f32.mrf.mxu1 }
 0x396   : > { %v8299_v1 = vadd.f32 %v8298_v23, %v8297_v43 }
 0x397   : > { %v8300_v42 = vpop.f32.mrf.mxu0  ;;  %v8764_v58 = vpop.f32.mrf.mxu1 }
 0x398   : > { %v5792_v4 = vadd.f32 %v8299_v1, %v11131_v22 }
 0x399   : > { %v8301_v12 = vpop.f32.mrf.mxu0  ;;  %v5955_v53 = vpop.f32.mrf.mxu1 }
 0x39a   : > { %v8302_v52 = vadd.f32 %v8301_v12, %v8300_v42  ;;  %v11230_v27 = vadd.f32 %v5952_v37, %v5792_v4  ;;  %v5250_v4 = vadd.f32 %v11144_v40, %v11164_v29 }
 0x39b   : > { %v8303_v6 = vpop.f32.mrf.mxu0 }
 0x39c   : > { %v5795_v55 = vadd.f32 %v8302_v52, %v5234_v5 }
 0x39d   : > { %v8767_v32 = vpop.f32.mrf.mxu1  ;;  %v8304_v2 = vpop.f32.mrf.mxu0 }
 0x39e   : > { %v8305_v45 = vadd.f32 %v8304_v2, %v8303_v6  ;;  %v11232_v54 = vadd.f32 %v5955_v53, %v5795_v55 }
 0x39f   : > { %v5968_v31 = vpop.f32.mrf.mxu1  ;;  %v8306_v8 = vpop.f32.mrf.mxu0 }
 0x3a0   : > { %v5800_v22 = vadd.f32 %v8305_v45, %v11134_v39 }
 0x3a1   : > { %v8768_v24 = vpop.f32.mrf.mxu1  ;;  %v8307_v56 = vpop.f32.mrf.mxu0 }
 0x3a2   : > { %v8308_v44 = vadd.f32 %v8307_v56, %v8306_v8  ;;  %v11235_v41 = vadd.f32 %v8763_v33, %v5800_v22 }
 0x3a3   : > { %v5971_v25 = vpop.f32.mrf.mxu1  ;;  %v8309_v47 = vpop.f32.mrf.mxu0 }
 0x3a4   : > { %v5803_v60 = vadd.f32 %v8308_v44, %v11139_v3 }
 0x3a5   : > { %v8771_v46 = vpop.f32.mrf.mxu1  ;;  %v8310_v13 = vpop.f32.mrf.mxu0 }
 0x3a6   : > { %v8311_v43 = vadd.f32 %v8310_v13, %v8309_v47  ;;  %v11238_v34 = vadd.f32 %v8764_v58, %v5803_v60 }
 0x3a7   : > { %v5984_v23 = vpop.f32.mrf.mxu1  ;;  %v8312_v1 = vpop.f32.mrf.mxu0 }
 0x3a8   : > { %v5808_v37 = vadd.f32 %v8311_v43, %v11152_v11 }
 0x3a9   : > { %v8772_v42 = vpop.f32.mrf.mxu1  ;;  %v8313_v39 = vpop.f32.mrf.mxu0 }
 0x3aa   : > { %v8314_v33 = vadd.f32 %v8313_v39, %v8312_v1  ;;  %v11243_v12 = vadd.f32 %v5968_v31, %v5808_v37 }
 0x3ab   : > { %v5987_v5 = vpop.f32.mrf.mxu1  ;;  %v8315_v52 = vpop.f32.mrf.mxu0 }
 0x3ac   : > { %v5811_v3 = vadd.f32 %v8314_v33, %v5250_v4 }
 0x3ad   : > { %v11245_v53 = vpop.f32.mrf.mxu1  ;;  %v8316_v6 = vpop.f32.mrf.mxu0 }
 0x3ae   : > { %v8317_v58 = vadd.f32 %v8316_v6, %v8315_v52  ;;  %v11247_v55 = vadd.f32 %v5971_v25, %v5811_v3 }
 0x3af   : > { %v6000_v2 = vpop.f32.mrf.mxu1  ;;  %v8318_v45 = vpop.f32.mrf.mxu0 }
 0x3b0   : > { %v5816_v11 = vadd.f32 %v8317_v58, %v11150_v35 }
 0x3b1   : > { %v11250_v8 = vpop.f32.mrf.mxu1  ;;  %v8319_v22 = vpop.f32.mrf.mxu0 }
 0x3b2   : > { %v8320_v40 = vadd.f32 %v8319_v22, %v8318_v45  ;;  %v11252_v29 = vadd.f32 %v8767_v32, %v5816_v11  ;;  %v5266_v32 = vadd.f32 %v11162_v50, %v11179_v26 }
 0x3b3   : > { %v6003_v31 = vpop.f32.mrf.mxu1  ;;  %v8321_v56 = vpop.f32.mrf.mxu0 }
 0x3b4   : > { %v5819_v44 = vadd.f32 %v8320_v40, %v11157_v61 }
 0x3b5   : > { %v11255_v47 = vpop.f32.mrf.mxu1  ;;  %v8322_v60 = vpop.f32.mrf.mxu0 }
 0x3b6   : > { %v8323_v13 = vadd.f32 %v8322_v60, %v8321_v56  ;;  %v11257_v25 = vadd.f32 %v8768_v24, %v5819_v44 }
 0x3b7   : > { %v11259_v43 = vpop.f32.mrf.mxu1  ;;  %v8324_v1 = vpop.f32.mrf.mxu0 }
 0x3b8   : > { %v5824_v35 = vadd.f32 %v8323_v13, %v11168_v30 }
 0x3b9   : > { %v11262_v37 = vpop.f32.mrf.mxu1  ;;  %v8325_v39 = vpop.f32.mrf.mxu0 }
 0x3ba   : > { %v8326_v4 = vadd.f32 %v8325_v39, %v8324_v1  ;;  %v11266_v33 = vadd.f32 %v5984_v23, %v5824_v35 }
 0x3bb   : > { %v6019_v61 = vpop.f32.mrf.mxu1  ;;  %v8327_v52 = vpop.f32.mrf.mxu0 }
 0x3bc   : > { %v5827_v3 = vadd.f32 %v8326_v4, %v5266_v32 }
 0x3bd   : > { %v11268_v6 = vpop.f32.mrf.mxu1  ;;  %v8328_v24 = vpop.f32.mrf.mxu0 }
 0x3be   : > { %v8329_v58 = vadd.f32 %v8328_v24, %v8327_v52  ;;  %v11270_v45 = vadd.f32 %v5987_v5, %v5827_v3 }
 0x3bf   : > { %v11272_v11 = vpop.f32.mrf.mxu1  ;;  %v8330_v30 = vpop.f32.mrf.mxu0 }
 0x3c0   : > { %v5832_v22 = vadd.f32 %v8329_v58, %v11170_v19 }
 0x3c1   : > { %v11275_v40 = vpop.f32.mrf.mxu1  ;;  %v8331_v50 = vpop.f32.mrf.mxu0 }
 0x3c2   : > { %v8332_v26 = vadd.f32 %v8331_v50, %v8330_v30  ;;  %v11277_v23 = vadd.f32 %v8771_v46, %v5832_v22 }
 0x3c3   : > { %v11279_v56 = vpop.f32.mrf.mxu1  ;;  %v8333_v44 = vpop.f32.mrf.mxu0 }
 0x3c4   : > { %v5835_v60 = vadd.f32 %v8332_v26, %v11175_v63 }
 0x3c5   : > { %v11282_v13 = vpop.f32.mrf.mxu1  ;;  %v8334_v5 = vpop.f32.mrf.mxu0 }
 0x3c6   : > { %v8335_v1 = vadd.f32 %v8334_v5, %v8333_v44  ;;  %v11284_v35 = vadd.f32 %v8772_v42, %v5835_v60 }
 0x3c7   : > { %v11286_v39 = vpop.f32.mrf.mxu1  ;;  %v8336_v19 = vpop.f32.mrf.mxu0 }
 0x3c8   : > { %v5840_v32 = vadd.f32 %v8335_v1, %v11183_v49 }
 0x3c9   : > { %v11289_v4 = vpop.f32.mrf.mxu1  ;;  %v8337_v46 = vpop.f32.mrf.mxu0 }
 0x3ca   : > { %v8338_v52 = vadd.f32 %v8337_v46, %v8336_v19  ;;  %v11291_v3 = vadd.f32 %v6000_v2, %v5840_v32 }
 0x3cb   : > { %v11293_v24 = vpop.f32.mrf.mxu1  ;;  %v8339_v63 = vpop.f32.mrf.mxu0 }
 0x3cc   : > { %v5843_v58 = vadd.f32 %v8338_v52, %v11189_v38 }
 0x3cd   : > { %v11296_v30 = vpop.f32.mrf.mxu1  ;;  %v8340_v42 = vpop.f32.mrf.mxu0 }
 0x3ce   : > { %11881 = vst [vmem:[#allocation45_spill] sm:$0xff] %v11296_v30  ;;  %v8341_v22 = vadd.f32 %v8340_v42, %v8339_v63  ;;  %v11298_v50 = vadd.f32 %v6003_v31, %v5843_v58 }
 0x3cf   : > { %v11300_v26 = vpop.f32.mrf.mxu1  ;;  %v8342_v49 = vpop.f32.mrf.mxu0 }
 0x3d0   : > { %v5848_v44 = vadd.f32 %v8341_v22, %v11187_v15 }
 0x3d1   : > { %v11303_v60 = vpop.f32.mrf.mxu1  ;;  %v8343_v2 = vpop.f32.mrf.mxu0 }
 0x3d2   : > { %11882 = vst [vmem:[#allocation46_spill] sm:$0xff] %v11303_v60  ;;  %v8344_v5 = vadd.f32 %v8343_v2, %v8342_v49  ;;  %v11306_v1 = vadd.f32 %v11245_v53, %v5848_v44 }
 0x3d3   : > { %v11308_v19 = vpop.f32.mrf.mxu1  ;;  %v8345_v38 = vpop.f32.mrf.mxu0 }
 0x3d4   : > { %v5851_v32 = vadd.f32 %v8344_v5, %v11191_v28 }
 0x3d5   : > { %v11311_v46 = vpop.f32.mrf.mxu1  ;;  %v8346_v31 = vpop.f32.mrf.mxu0 }
 0x3d6   : > { %v8347_v52 = vadd.f32 %v8346_v31, %v8345_v38  ;;  %v11314_v63 = vadd.f32 %v11250_v8, %v5851_v32 }
 0x3d7   : > { %v11316_v15 = vpop.f32.mrf.mxu1  ;;  %v8348_v58 = vpop.f32.mrf.mxu0 }
 0x3d8   : > { %v5856_v42 = vadd.f32 %v8347_v52, %v11193_v17 }
 0x3d9   : > { %v11319_v22 = vpop.f32.mrf.mxu1  ;;  %v8349_v53 = vpop.f32.mrf.mxu0 }
 0x3da   : > { %v8350_v49 = vadd.f32 %v8349_v53, %v8348_v58  ;;  %v11322_v44 = vadd.f32 %v11259_v43, %v5856_v42 }
 0x3db   : > { %v11324_v28 = vpop.f32.mrf.mxu1  ;;  %v8351_v2 = vpop.f32.mrf.mxu0 }
 0x3dc   : > { %v5859_v5 = vadd.f32 %v8350_v49, %v11197_v10 }
 0x3dd   : > { %v11327_v38 = vpop.f32.mrf.mxu1  ;;  %v8352_v8 = vpop.f32.mrf.mxu0 }
 0x3de   : > { %v8353_v32 = vadd.f32 %v8352_v8, %v8351_v2  ;;  %v11329_v31 = vadd.f32 %v6019_v61, %v5859_v5 }
 0x3df   : > { %v11331_v60 = vpop.f32.mrf.mxu1  ;;  %v8354_v17 = vpop.f32.mrf.mxu0 }
 0x3e0   : > { %11883 = vst [vmem:[#allocation47_spill] sm:$0xff] %v11329_v31  ;;  %v5864_v52 = vadd.f32 %v8353_v32, %v11195_v18 }
 0x3e1   : > { %v11334_v58 = vpop.f32.mrf.mxu1  ;;  %v8355_v43 = vpop.f32.mrf.mxu0 }
 0x3e2   : > { %v8356_v42 = vadd.f32 %v8355_v43, %v8354_v17  ;;  %v11337_v53 = vadd.f32 %v11255_v47, %v5864_v52 }
 0x3e3   : > { %v11339_v30 = vpop.f32.mrf.mxu1  ;;  %v8357_v10 = vpop.f32.mrf.mxu0 }
 0x3e4   : > { %v5867_v49 = vadd.f32 %v8356_v42, %v11199_v51 }
 0x3e5   : > { %v11342_v2 = vpop.f32.mrf.mxu1  ;;  %v8358_v61 = vpop.f32.mrf.mxu0 }
 0x3e6   : > { %v8359_v5 = vadd.f32 %v8358_v61, %v8357_v10  ;;  %v11345_v8 = vadd.f32 %v11262_v37, %v5867_v49 }
 0x3e7   : > { %v11347_v18 = vpop.f32.mrf.mxu1  ;;  %v8360_v32 = vpop.f32.mrf.mxu0 }
 0x3e8   : > { %11884 = vst [vmem:[#allocation48_spill] sm:$0xff] %v11345_v8  ;;  %v5872_v17 = vadd.f32 %v8359_v5, %v11201_v36 }
 0x3e9   : > { %v11350_v43 = vpop.f32.mrf.mxu1  ;;  %v8361_v47 = vpop.f32.mrf.mxu0 }
 0x3ea   : > { %v8362_v52 = vadd.f32 %v8361_v47, %v8360_v32  ;;  %v11353_v31 = vadd.f32 %v11272_v11, %v5872_v17 }
 0x3eb   : > { %v11355_v51 = vpop.f32.mrf.mxu1  ;;  %v8363_v42 = vpop.f32.mrf.mxu0 }
 0x3ec   : > { %11885 = vst [vmem:[#allocation49_spill] sm:$0xff] %v11353_v31  ;;  %v5875_v10 = vadd.f32 %v8362_v52, %v11205_v7 }
 0x3ed   : > { %v11358_v61 = vpop.f32.mrf.mxu1  ;;  %v8364_v37 = vpop.f32.mrf.mxu0 }
 0x3ee   : > { %v8365_v49 = vadd.f32 %v8364_v37, %v8363_v42  ;;  %v11361_v8 = vadd.f32 %v11279_v56, %v5875_v10 }
 0x3ef   : > { %v11363_v36 = vpop.f32.mrf.mxu1  ;;  %v8366_v5 = vpop.f32.mrf.mxu0 }
 0x3f0   : > { %11886 = vst [vmem:[#allocation50_spill] sm:$0xff] %v11361_v8  ;;  %v5880_v32 = vadd.f32 %v8365_v49, %v11203_v21 }
 0x3f1   : > { %v11366_v47 = vpop.f32.mrf.mxu1  ;;  %v8367_v11 = vpop.f32.mrf.mxu0 }
 0x3f2   : > { %v8368_v17 = vadd.f32 %v8367_v11, %v8366_v5  ;;  %v11369_v31 = vadd.f32 %v11268_v6, %v5880_v32 }
 0x3f3   : > { %v11371_v7 = vpop.f32.mrf.mxu1  ;;  %v8369_v52 = vpop.f32.mrf.mxu0 }
 0x3f4   : > { %11887 = vst [vmem:[#allocation51_spill] sm:$0xff] %v11369_v31  ;;  %v5883_v42 = vadd.f32 %v8368_v17, %v11207_v20 }
 0x3f5   : > { %v11374_v37 = vpop.f32.mrf.mxu1  ;;  %v8370_v56 = vpop.f32.mrf.mxu0 }
 0x3f6   : > { %v8371_v10 = vadd.f32 %v8370_v56, %v8369_v52  ;;  %v11377_v8 = vadd.f32 %v11275_v40, %v5883_v42 }
 0x3f7   : > { %v11379_v21 = vpop.f32.mrf.mxu1  ;;  %v8372_v49 = vpop.f32.mrf.mxu0 }
 0x3f8   : > { %11888 = vst [vmem:[#allocation52_spill] sm:$0xff] %v11377_v8  ;;  %v5888_v5 = vadd.f32 %v8371_v10, %v11209_v62 }
 0x3f9   : > { %v11382_v11 = vpop.f32.mrf.mxu1  ;;  %v8373_v6 = vpop.f32.mrf.mxu0 }
 0x3fa   : > { %v8374_v32 = vadd.f32 %v8373_v6, %v8372_v49  ;;  %v11385_v31 = vadd.f32 %v11286_v39, %v5888_v5 }
 0x3fb   : > { %v11387_v20 = vpop.f32.mrf.mxu1  ;;  %v8375_v17 = vpop.f32.mrf.mxu0 }
 0x3fc   : > { %11889 = vst [vmem:[#allocation53_spill] sm:$0xff] %v11385_v31  ;;  %v5891_v52 = vadd.f32 %v8374_v32, %v11213_v59 }
 0x3fd   : > { %v11390_v56 = vpop.f32.mrf.mxu1  ;;  %v8376_v40 = vpop.f32.mrf.mxu0 }
 0x3fe   : > { %v8377_v42 = vadd.f32 %v8376_v40, %v8375_v17  ;;  %v11393_v8 = vadd.f32 %v11293_v24, %v5891_v52 }
 0x3ff   : > { %v11395_v62 = vpop.f32.mrf.mxu1  ;;  %v8378_v10 = vpop.f32.mrf.mxu0 }
 0x400   : > { %11890 = vst [vmem:[#allocation54_spill] sm:$0xff] %v11393_v8  ;;  %v5896_v49 = vadd.f32 %v8377_v42, %v11211_v14 }
 0x401   : > { %v11398_v6 = vpop.f32.mrf.mxu1  ;;  %v8379_v39 = vpop.f32.mrf.mxu0 }
 0x402   : > { %v8380_v5 = vadd.f32 %v8379_v39, %v8378_v10  ;;  %v11401_v31 = vadd.f32 %v11282_v13, %v5896_v49 }
 0x403   : > { %v11403_v59 = vpop.f32.mrf.mxu1  ;;  %v8381_v32 = vpop.f32.mrf.mxu0 }
 0x404   : > { %11891 = vst [vmem:[#allocation55_spill] sm:$0xff] %v11401_v31  ;;  %v5899_v17 = vadd.f32 %v8380_v5, %v11215_v9 }
 0x405   : > { %v11406_v40 = vpop.f32.mrf.mxu1  ;;  %v8382_v24 = vpop.f32.mrf.mxu0 }
 0x406   : > { %v8383_v52 = vadd.f32 %v8382_v24, %v8381_v32  ;;  %v11409_v8 = vadd.f32 %v11289_v4, %v5899_v17 }
 0x407   : > { %v11411_v14 = vpop.f32.mrf.mxu1  ;;  %v8384_v42 = vpop.f32.mrf.mxu0 }
 0x408   : > { %11892 = vst [vmem:[#allocation56_spill] sm:$0xff] %v11409_v8  ;;  %v5904_v10 = vadd.f32 %v8383_v52, %v11219_v48 }
 0x409   : > { %v11414_v39 = vpop.f32.mrf.mxu1  ;;  %v8385_v13 = vpop.f32.mrf.mxu0 }
 0x40a   : > { %v8386_v49 = vadd.f32 %v8385_v13, %v8384_v42  ;;  %v11417_v31 = vadd.f32 %v11300_v26, %v5904_v10  ;;  %v8441_v13 = vadd.f32 %v11331_v60, %v11327_v38  ;;  %v8444_v38 = vadd.f32 %v11339_v30, %v11334_v58 }
 0x40b   : > { %v11419_v9 = vpop.f32.mrf.mxu1  ;;  %v8387_v5 = vpop.f32.mrf.mxu0 }
 0x40c   : > { %11893 = vst [vmem:[#allocation57_spill] sm:$0xff] %v11417_v31  ;;  %v5907_v32 = vadd.f32 %v8386_v49, %v11223_v57 }
 0x40d   : > { %v11422_v24 = vpop.f32.mrf.mxu1  ;;  %v8388_v4 = vpop.f32.mrf.mxu0 }
 0x40e   : > { %v8389_v17 = vadd.f32 %v8388_v4, %v8387_v5  ;;  %v11425_v8 = vadd.f32 %v11308_v19, %v5907_v32  ;;  %v8435_v19 = vadd.f32 %v11316_v15, %v11311_v46 }
 0x40f   : > { %v11427_v48 = vpop.f32.mrf.mxu1  ;;  %v8390_v52 = vpop.f32.mrf.mxu0 }
 0x410   : > { %11894 = vst [vmem:[#allocation58_spill] sm:$0xff] %v11425_v8  ;;  %v11430_v42 = vadd.f32 %v8389_v17, %v11221_v16  ;;  %v11448_v17 = vld [vmem:[%s11717_s4] ss:$0 sm:$0xff] }
 0x411   : > { %v11432_v26 = vpop.f32.mrf.mxu1  ;;  %v8391_v10 = vpop.f32.mrf.mxu0 }
 0x412   : > { %11895 = vst [vmem:[#allocation59_spill] sm:$0xff] %v11430_v42  ;;  %v8392_v57 = vadd.f32 %v8391_v10, %v8390_v52  ;;  %v11897_v10 = vld [vmem:[#allocation15_spill] sm:$0xff] }
 0x413   : > { %v11436_v49 = vpop.f32.mrf.mxu1  ;;  %v8811_v5 = vpop.f32.mrf.mxu0  ;;  %v6987_v8 = vunpack.c.l.bf16 %v11897_v10 }
 0x414   : > { %v11441_v32 = vadd.f32 %v8392_v57, %v11225_v0  ;;  %v6796_v4 = vadd.f32 %v8811_v5, %v8441_v13  ;;  %v11898_v0 = vld [vmem:[#allocation13_spill] sm:$0xff]  ;;  %v8438_v5 = vadd.f32 %v11324_v28, %v11319_v22  ;;  %v8453_v22 = vadd.f32 %v11363_v36, %v11358_v61 }
 0x415   : > { %v11443_v16 = vpop.f32.mrf.mxu1  ;;  %v6787_v60 = vpop.f32.mrf.mxu0  ;;  %v6985_v13 = vunpack.c.l.bf16 %v11898_v0  ;;  %v8456_v61 = vadd.f32 %v11371_v7, %v11366_v47  ;;  %v8450_v7 = vadd.f32 %v11355_v51, %v11350_v43  ;;  %v8465_v51 = vadd.f32 %v11395_v62, %v11390_v56 }
 0x416   : > { %11896 = vst [vmem:[#allocation60_spill] sm:$0xff] %v11441_v32  ;;  %v6916_v52 = vadd.f32 %v6796_v4, %v11235_v41  ;;  %v6788_v46 = vadd.f32 %v8435_v19, %v6787_v60  ;;  %v11899_v41 = vld [vmem:[#allocation16_spill] sm:$0xff] }
 0x417   : > { %v11454_v15 = vpop.f32.mrf.mxu1  ;;  %v8812_v57 = vpop.f32.mrf.mxu0  ;;  %v6988_v58 = vunpack.c.l.bf16 %v11899_v41 }
 0x418   : > { %v6955_v32 = vadd.f32 %v11448_v17, %v6916_v52  ;;  %v6914_v42 = vadd.f32 %v6788_v46, %v11230_v27  ;;  %v6799_v31 = vadd.f32 %v8812_v57, %v8444_v38  ;;  %v8447_v27 = vadd.f32 %v11347_v18, %v11342_v2 }
 0x419   : > { %v11462_v30 = vpop.f32.mrf.mxu1  ;;  %v6790_v4 = vpop.f32.mrf.mxu0 }
 0x41a   : > { %v7019_v19 = vadd.f32 %v6987_v8, %v6955_v32  ;;  %v6953_v60 = vadd.f32 %v11448_v17, %v6914_v42  ;;  %v6917_v10 = vadd.f32 %v6799_v31, %v11238_v34  ;;  %v6791_v0 = vadd.f32 %v8438_v5, %v6790_v4  ;;  %v11900_v32 = vld [vmem:[#allocation14_spill] sm:$0xff]  ;;  %v11901_v5 = vld [vmem:[#allocation19_spill] sm:$0xff] }
 0x41b   : > { %v11469_v28 = vpop.f32.mrf.mxu1  ;;  %v8815_v52 = vpop.f32.mrf.mxu0  ;;  %v6986_v42 = vunpack.c.l.bf16 %v11900_v32  ;;  %v6991_v4 = vunpack.c.l.bf16 %v11901_v5 }
 0x41c   : > { %v7051_v38 = vmax.f32 %v7019_v19, 0.0  ;;  %v7017_v46 = vadd.f32 %v6985_v13, %v6953_v60  ;;  %v6956_v57 = vadd.f32 %v11448_v17, %v6917_v10  ;;  %v6915_v8 = vadd.f32 %v6791_v0, %v11232_v54  ;;  %v11902_v60 = vld [vmem:[#allocation17_spill] sm:$0xff] }
 0x41d   : > { %v11476_v41 = vpop.f32.mrf.mxu1  ;;  %v6812_v34 = vadd.f32 %v8815_v52, %v8453_v22  ;;  %v6803_v31 = vpop.f32.mrf.mxu0  ;;  %v6989_v10 = vunpack.c.l.bf16 %v11902_v60 }
 0x41e   : > { %7083 = vst [vmem:[%s11480_s7 + $0x10] sm:$0xff] %v7051_v38  ;;  %v7049_v2 = vmax.f32 %v7017_v46, 0.0  ;;  %v7020_v18 = vadd.f32 %v6988_v58, %v6956_v57  ;;  %v6804_v36 = vadd.f32 %v8447_v27, %v6803_v31  ;;  %v6954_v54 = vadd.f32 %v11448_v17, %v6915_v8  ;;  %v11903_v8 = vld [vmem:[#allocation20_spill] sm:$0xff]  ;;  %v11904_v31 = vld [vmem:[#allocation18_spill] sm:$0xff] }
 0x41f   : > { %v6920_v13 = vadd.f32 %v6812_v34, %v11252_v29  ;;  %v11486_v19 = vpop.f32.mrf.mxu1  ;;  %v8816_v47 = vpop.f32.mrf.mxu0  ;;  %v6992_v32 = vunpack.c.l.bf16 %v11903_v8 }
 0x420   : > { %7081 = vst [vmem:[%s11480_s7] sm:$0xff] %v7049_v2  ;;  %v7052_v0 = vmax.f32 %v7020_v18, 0.0  ;;  %v6918_v58 = vadd.f32 %v6804_v36, %v11243_v12  ;;  %v6815_v22 = vadd.f32 %v8816_v47, %v8456_v61  ;;  %v7018_v52 = vadd.f32 %v6986_v42, %v6954_v54 }
 0x421   : > { %v6959_v27 = vadd.f32 %v11448_v17, %v6920_v13  ;;  %v11494_v38 = vpop.f32.mrf.mxu1  ;;  %v6806_v29 = vpop.f32.mrf.mxu0  ;;  %v6990_v61 = vunpack.c.l.bf16 %v11904_v31  ;;  %v8459_v18 = vadd.f32 %v11379_v21, %v11374_v37  ;;  %v8468_v37 = vadd.f32 %v11403_v59, %v11398_v6 }
 0x422   : > { %7084 = vst [vmem:[%s11480_s7 + $0x18] sm:$0xff] %v7052_v0  ;;  %v6957_v46 = vadd.f32 %v11448_v17, %v6918_v58  ;;  %v6921_v57 = vadd.f32 %v6815_v22, %v11257_v25  ;;  %v6807_v43 = vadd.f32 %v8450_v7, %v6806_v29  ;;  %v7050_v12 = vmax.f32 %v7018_v52, 0.0  ;;  %v11906_v58 = vld [vmem:[#allocation21_spill] sm:$0xff] }
 0x423   : > { %v7023_v34 = vadd.f32 %v6991_v4, %v6959_v27  ;;  %v11502_v42 = vpop.f32.mrf.mxu1  ;;  %v8819_v2 = vpop.f32.mrf.mxu0  ;;  %v6993_v22 = vunpack.c.l.bf16 %v11906_v58  ;;  %v8462_v27 = vadd.f32 %v11387_v20, %v11382_v11  ;;  %v8474_v58 = vadd.f32 %v11419_v9, %v11414_v39 }
 0x424   : > { %v7021_v36 = vadd.f32 %v6989_v10, %v6957_v46  ;;  %v6960_v25 = vadd.f32 %v11448_v17, %v6921_v57  ;;  %v6919_v54 = vadd.f32 %v6807_v43, %v11247_v55  ;;  %7082 = vst [vmem:[%s11480_s7 + $0x8] sm:$0xff] %v7050_v12  ;;  %v6828_v62 = vadd.f32 %v8819_v2, %v8465_v51  ;;  %v11905_v55 = vld [vmem:[#allocation23_spill] sm:$0xff] }
 0x425   : > { %v7055_v13 = vmax.f32 %v7023_v34, 0.0  ;;  %v11510_v56 = vpop.f32.mrf.mxu1  ;;  %v6819_v5 = vpop.f32.mrf.mxu0  ;;  %v6995_v10 = vunpack.c.l.bf16 %v11905_v55  ;;  %v11907_v34 = vld [vmem:[#allocation24_spill] sm:$0xff]  ;;  %v8489_v39 = vadd.f32 %v11486_v19, %v11476_v41 }
 0x426   : > { %v7053_v4 = vmax.f32 %v7021_v36, 0.0  ;;  %v7024_v60 = vadd.f32 %v6992_v32, %v6960_v25  ;;  %v6958_v47 = vadd.f32 %v11448_v17, %v6919_v54  ;;  %v6820_v7 = vadd.f32 %v8459_v18, %v6819_v5 }
 0x427   : > { %7087 = vst [vmem:[%s11480_s7 + $0x30] sm:$0xff] %v7055_v13  ;;  %v6924_v21 = vadd.f32 %v6828_v62, %v11277_v23  ;;  %v11518_v0 = vpop.f32.mrf.mxu1  ;;  %v8820_v52 = vpop.f32.mrf.mxu0  ;;  %v8477_v32 = vadd.f32 %v11427_v48, %v11422_v24  ;;  %v8471_v36 = vadd.f32 %v11411_v14, %v11406_v40  ;;  %v11909_v62 = vld [vmem:[#allocation27_spill] sm:$0xff]  ;;  %v8480_v14 = vadd.f32 %v11436_v49, %v11432_v26 }
 0x428   : > { %7085 = vst [vmem:[%s11480_s7 + $0x20] sm:$0xff] %v7053_v4  ;;  %v7056_v29 = vmax.f32 %v7024_v60, 0.0  ;;  %v7022_v46 = vadd.f32 %v6990_v61, %v6958_v47  ;;  %v6922_v57 = vadd.f32 %v6820_v7, %v11266_v33  ;;  %v6831_v23 = vadd.f32 %v8820_v52, %v8468_v37  ;;  %v11908_v61 = vld [vmem:[#allocation22_spill] sm:$0xff] }
 0x429   : > { %v6963_v6 = vadd.f32 %v11448_v17, %v6924_v21  ;;  %v11526_v59 = vpop.f32.mrf.mxu1  ;;  %v6822_v8 = vpop.f32.mrf.mxu0  ;;  %v6996_v33 = vunpack.c.l.bf16 %v11907_v34  ;;  %v6994_v2 = vunpack.c.l.bf16 %v11908_v61  ;;  %v6999_v5 = vunpack.c.l.bf16 %v11909_v62  ;;  %v11910_v21 = vld [vmem:[#allocation25_spill] sm:$0xff] }
 0x42a   : > { %7088 = vst [vmem:[%s11480_s7 + $0x38] sm:$0xff] %v7056_v29  ;;  %v7054_v43 = vmax.f32 %v7022_v46, 0.0  ;;  %v6961_v51 = vadd.f32 %v11448_v17, %v6922_v57  ;;  %v6823_v11 = vadd.f32 %v8462_v27, %v6822_v8  ;;  %v6925_v12 = vadd.f32 %v6831_v23, %v11284_v35  ;;  %v11911_v8 = vld [vmem:[#allocation28_spill] sm:$0xff] }
 0x42b   : > { %v7027_v20 = vadd.f32 %v6995_v10, %v6963_v6  ;;  %v11534_v31 = vpop.f32.mrf.mxu1  ;;  %v8823_v18 = vpop.f32.mrf.mxu0  ;;  %v6997_v55 = vunpack.c.l.bf16 %v11910_v21 }
 0x42c   : > { %7086 = vst [vmem:[%s11480_s7 + $0x28] sm:$0xff] %v7054_v43  ;;  %v7025_v24 = vadd.f32 %v6993_v22, %v6961_v51  ;;  %v6923_v48 = vadd.f32 %v6823_v11, %v11270_v45  ;;  %v6844_v25 = vadd.f32 %v8823_v18, %v8477_v32  ;;  %v6964_v35 = vadd.f32 %v11448_v17, %v6925_v12  ;;  %v11912_v43 = vld [vmem:[#allocation26_spill] sm:$0xff] }
 0x42d   : > { %v7059_v54 = vmax.f32 %v7027_v20, 0.0  ;;  %v11542_v13 = vpop.f32.mrf.mxu1  ;;  %v6835_v4 = vpop.f32.mrf.mxu0  ;;  %v6998_v51 = vunpack.c.l.bf16 %v11912_v43  ;;  %v8483_v20 = vadd.f32 %v11454_v15, %v11443_v16 }
 0x42e   : > { %v7057_v60 = vmax.f32 %v7025_v24, 0.0  ;;  %v6962_v47 = vadd.f32 %v11448_v17, %v6923_v48  ;;  %v6928_v7 = vadd.f32 %v6844_v25, %v11306_v1  ;;  %v6836_v40 = vadd.f32 %v8471_v36, %v6835_v4  ;;  %v11913_v48 = vld [vmem:[#allocation31_spill] sm:$0xff] }
 0x42f   : > { %7091 = vst [vmem:[%s11480_s7 + $0x50] sm:$0xff] %v7059_v54  ;;  %v7028_v45 = vadd.f32 %v6996_v33, %v6964_v35  ;;  %v8500_v37 = vpop.f32.mrf.mxu1  ;;  %v8824_v10 = vpop.f32.mrf.mxu0  ;;  %v11914_v54 = vld [vmem:[#allocation29_spill] sm:$0xff] }
 0x430   : > { %7089 = vst [vmem:[%s11480_s7 + $0x40] sm:$0xff] %v7057_v60  ;;  %v7026_v22 = vadd.f32 %v6994_v2, %v6962_v47  ;;  %v6967_v52 = vadd.f32 %v11448_v17, %v6928_v7  ;;  %v6926_v1 = vadd.f32 %v6836_v40, %v11291_v3  ;;  %v6847_v26 = vadd.f32 %v8824_v10, %v8480_v14  ;;  %v11915_v7 = vld [vmem:[#allocation32_spill] sm:$0xff] }
 0x431   : > { %v7060_v27 = vmax.f32 %v7028_v45, 0.0  ;;  %v11556_v29 = vpop.f32.mrf.mxu1  ;;  %v6838_v49 = vpop.f32.mrf.mxu0  ;;  %v7000_v3 = vunpack.c.l.bf16 %v11911_v8  ;;  %v8492_v2 = vadd.f32 %v11502_v42, %v11494_v38  ;;  %v7001_v35 = vunpack.c.l.bf16 %v11914_v54 }
 0x432   : > { %v7058_v46 = vmax.f32 %v7026_v22, 0.0  ;;  %v7031_v57 = vadd.f32 %v6999_v5, %v6967_v52  ;;  %v6965_v6 = vadd.f32 %v11448_v17, %v6926_v1  ;;  %v6839_v23 = vadd.f32 %v8474_v58, %v6838_v49  ;;  %v11917_v22 = vld [vmem:[#allocation30_spill] sm:$0xff] }
 0x433   : > { %7092 = vst [vmem:[%s11480_s7 + $0x58] sm:$0xff] %v7060_v27  ;;  %v6929_v9 = vadd.f32 %v6847_v26, %v11314_v63  ;;  %v8503_v32 = vpop.f32.mrf.mxu1  ;;  %v8827_v11 = vpop.f32.mrf.mxu0  ;;  %v8486_v5 = vadd.f32 %v11469_v28, %v11462_v30  ;;  %v7004_v40 = vunpack.c.l.bf16 %v11915_v7  ;;  %v8501_v28 = vadd.f32 %v8500_v37, %v11542_v13  ;;  %v11926_v7 = vld [vmem:[#allocation50_spill] sm:$0xff] }
 0x434   : > { %7090 = vst [vmem:[%s11480_s7 + $0x48] sm:$0xff] %v7058_v46  ;;  %v7063_v12 = vmax.f32 %v7031_v57, 0.0  ;;  %v7029_v34 = vadd.f32 %v6997_v55, %v6965_v6  ;;  %v6927_v33 = vadd.f32 %v6839_v23, %v11298_v50  ;;  %v6860_v63 = vadd.f32 %v8827_v11, %v8489_v39  ;;  %v11916_v55 = vld [vmem:[#allocation48_spill] sm:$0xff]  ;;  %v11918_v46 = vld [vmem:[#allocation47_spill] sm:$0xff] }
 0x435   : > { %v6968_v41 = vadd.f32 %v11448_v17, %v6929_v9  ;;  %v11570_v19 = vpop.f32.mrf.mxu1  ;;  %v6851_v61 = vpop.f32.mrf.mxu0  ;;  %v7003_v50 = vunpack.c.l.bf16 %v11913_v48  ;;  %v7002_v52 = vunpack.c.l.bf16 %v11917_v22  ;;  %v8495_v27 = vadd.f32 %v11518_v0, %v11510_v56  ;;  %v11919_v56 = vld [vmem:[#allocation51_spill] sm:$0xff] }
 0x436   : > { %7095 = vst [vmem:[%s11480_s7 + $0x70] sm:$0xff] %v7063_v12  ;;  %v7061_v18 = vmax.f32 %v7029_v34, 0.0  ;;  %v6966_v36 = vadd.f32 %v11448_v17, %v6927_v33  ;;  %v6852_v16 = vadd.f32 %v8483_v20, %v6851_v61  ;;  %v6932_v24 = vadd.f32 %v6860_v63, %v11337_v53  ;;  %v11921_v12 = vld [vmem:[#allocation33_spill] sm:$0xff] }
 0x437   : > { %v7032_v15 = vadd.f32 %v7000_v3, %v6968_v41  ;;  %v11578_v25 = vpop.f32.mrf.mxu1  ;;  %v8828_v62 = vpop.f32.mrf.mxu0  ;;  %v8504_v43 = vadd.f32 %v8503_v32, %v11556_v29  ;;  %v7005_v34 = vunpack.c.l.bf16 %v11921_v12  ;;  %v8498_v41 = vadd.f32 %v11534_v31, %v11526_v59  ;;  %v11924_v31 = vld [vmem:[#allocation36_spill] sm:$0xff] }
 0x438   : > { %7093 = vst [vmem:[%s11480_s7 + $0x60] sm:$0xff] %v7061_v18  ;;  %v7030_v38 = vadd.f32 %v6998_v51, %v6966_v36  ;;  %v6930_v42 = vadd.f32 %v6852_v16, %v11322_v44  ;;  %v6863_v4 = vadd.f32 %v8828_v62, %v8492_v2  ;;  %v6971_v53 = vadd.f32 %v11448_v17, %v6932_v24  ;;  %v11920_v51 = vld [vmem:[#allocation35_spill] sm:$0xff]  ;;  %v11922_v2 = vld [vmem:[#allocation49_spill] sm:$0xff] }
 0x439   : > { %v7064_v60 = vmax.f32 %v7032_v15, 0.0  ;;  %v11586_v47 = vpop.f32.mrf.mxu1  ;;  %v6854_v14 = vpop.f32.mrf.mxu0  ;;  %v7007_v11 = vunpack.c.l.bf16 %v11920_v51  ;;  %v7008_v62 = vunpack.c.l.bf16 %v11924_v31 }
 0x43a   : > { %v7062_v45 = vmax.f32 %v7030_v38, 0.0  ;;  %v6969_v21 = vadd.f32 %v11448_v17, %v6930_v42  ;;  %v6933_v10 = vadd.f32 %v6863_v4, %v11916_v55  ;;  %v6855_v30 = vadd.f32 %v8486_v5, %v6854_v14  ;;  %v11925_v38 = vld [vmem:[#allocation34_spill] sm:$0xff] }
 0x43b   : > { %7096 = vst [vmem:[%s11480_s7 + $0x78] sm:$0xff] %v7064_v60  ;;  %v7035_v44 = vadd.f32 %v7003_v50, %v6971_v53  ;;  %v11593_v58 = vpop.f32.mrf.mxu1  ;;  %v8831_v1 = vpop.f32.mrf.mxu0  ;;  %v7006_v42 = vunpack.c.l.bf16 %v11925_v38  ;;  %v8507_v60 = vadd.f32 %v11578_v25, %v11570_v19 }
 0x43c   : > { %7094 = vst [vmem:[%s11480_s7 + $0x68] sm:$0xff] %v7062_v45  ;;  %v7033_v26 = vadd.f32 %v7001_v35, %v6969_v21  ;;  %v6972_v49 = vadd.f32 %v11448_v17, %v6933_v10  ;;  %v6931_v57 = vadd.f32 %v6855_v30, %v11918_v46  ;;  %v6876_v37 = vadd.f32 %v8831_v1, %v8501_v28  ;;  %v11923_v35 = vld [vmem:[#allocation52_spill] sm:$0xff]  ;;  %v11927_v10 = vld [vmem:[#allocation39_spill] sm:$0xff] }
 0x43d   : > { %v7067_v6 = vmax.f32 %v7035_v44, 0.0  ;;  %v8511_v13 = vpop.f32.mrf.mxu1  ;;  %v6867_v23 = vpop.f32.mrf.mxu0  ;;  %v7011_v30 = vunpack.c.l.bf16 %v11927_v10 }
 0x43e   : > { %v7065_v39 = vmax.f32 %v7033_v26, 0.0  ;;  %v7036_v9 = vadd.f32 %v7004_v40, %v6972_v49  ;;  %v6970_v8 = vadd.f32 %v11448_v17, %v6931_v57  ;;  %v6868_v3 = vadd.f32 %v8495_v27, %v6867_v23  ;;  %v11929_v49 = vld [vmem:[#allocation37_spill] sm:$0xff] }
 0x43f   : > { %7099 = vst [vmem:[%s11480_s7 + $0x90] sm:$0xff] %v7067_v6  ;;  %v6936_v0 = vadd.f32 %v6876_v37, %v11919_v56  ;;  %v8512_v20 = vpop.f32.mrf.mxu1  ;;  %v8832_v33 = vpop.f32.mrf.mxu0  ;;  %v7009_v46 = vunpack.c.l.bf16 %v11929_v49  ;;  %v8510_v6 = vadd.f32 %v11593_v58, %v11586_v47  ;;  %v11930_v23 = vld [vmem:[#allocation53_spill] sm:$0xff]  ;;  %v11932_v58 = vld [vmem:[#allocation40_spill] sm:$0xff]  ;;  %v11941_v49 = vld [vmem:[#allocation58_spill] sm:$0xff] }
 0x440   : > { %7097 = vst [vmem:[%s11480_s7 + $0x80] sm:$0xff] %v7065_v39  ;;  %v7068_v63 = vmax.f32 %v7036_v9, 0.0  ;;  %v7034_v61 = vadd.f32 %v7002_v52, %v6970_v8  ;;  %v6934_v18 = vadd.f32 %v6868_v3, %v11922_v2  ;;  %v6879_v36 = vadd.f32 %v8832_v33, %v8504_v43  ;;  %v11928_v52 = vld [vmem:[#allocation55_spill] sm:$0xff]  ;;  %v11933_v33 = vld [vmem:[#allocation38_spill] sm:$0xff] }
 0x441   : > { %v6975_v29 = vadd.f32 %v11448_v17, %v6936_v0  ;;  %v8514_v32 = vpop.f32.mrf.mxu1  ;;  %v6870_v16 = vpop.f32.mrf.mxu0  ;;  %v8513_v24 = vadd.f32 %v8512_v20, %v8511_v13  ;;  %v11931_v20 = vld [vmem:[#allocation56_spill] sm:$0xff]  ;;  %v7012_v12 = vunpack.c.l.bf16 %v11932_v58 }
 0x442   : > { %7100 = vst [vmem:[%s11480_s7 + $0x98] sm:$0xff] %v7068_v63  ;;  %v7066_v15 = vmax.f32 %v7034_v61, 0.0  ;;  %v6973_v48 = vadd.f32 %v11448_v17, %v6934_v18  ;;  %v6871_v50 = vadd.f32 %v8498_v41, %v6870_v16  ;;  %v6937_v59 = vadd.f32 %v6879_v36, %v11923_v35 }
 0x443   : > { %v7039_v54 = vadd.f32 %v7007_v11, %v6975_v29  ;;  %v8515_v5 = vpop.f32.mrf.mxu1  ;;  %v8835_v4 = vpop.f32.mrf.mxu0  ;;  %v7010_v41 = vunpack.c.l.bf16 %v11933_v33  ;;  %v11934_v29 = vld [vmem:[#allocation54_spill] sm:$0xff] }
 0x444   : > { %7098 = vst [vmem:[%s11480_s7 + $0x88] sm:$0xff] %v7066_v15  ;;  %v7037_v53 = vadd.f32 %v7005_v34, %v6973_v48  ;;  %v6935_v40 = vadd.f32 %v6871_v50, %v11926_v7  ;;  %v6892_v14 = vadd.f32 %v8835_v4, %v8513_v24  ;;  %v6976_v21 = vadd.f32 %v11448_v17, %v6937_v59  ;;  %v11935_v59 = vld [vmem:[#allocation41_spill] sm:$0xff] }
 0x445   : > { %v7071_v45 = vmax.f32 %v7039_v54, 0.0  ;;  %v8517_v55 = vpop.f32.mrf.mxu1  ;;  %v6883_v28 = vpop.f32.mrf.mxu0  ;;  %v8516_v25 = vadd.f32 %v8515_v5, %v8514_v32  ;;  %v7013_v31 = vunpack.c.l.bf16 %v11935_v59  ;;  %v11936_v4 = vld [vmem:[#allocation57_spill] sm:$0xff] }
 0x446   : > { %v7069_v44 = vmax.f32 %v7037_v53, 0.0  ;;  %v6974_v22 = vadd.f32 %v11448_v17, %v6935_v40  ;;  %v6940_v1 = vadd.f32 %v6892_v14, %v11928_v52  ;;  %v6884_v27 = vadd.f32 %v8507_v60, %v6883_v28  ;;  %v11937_v53 = vld [vmem:[#allocation59_spill] sm:$0xff]  ;;  %v11938_v7 = vld [vmem:[#allocation45_spill] sm:$0xff] }
 0x447   : > { %7103 = vst [vmem:[%s11480_s7 + $0xb0] sm:$0xff] %v7071_v45  ;;  %v7040_v19 = vadd.f32 %v7008_v62, %v6976_v21  ;;  %v8518_v26 = vpop.f32.mrf.mxu1  ;;  %v8836_v57 = vpop.f32.mrf.mxu0  ;;  %v6073_v40 = vadd.f32 %v11938_v7, %v11937_v53 }
 0x448   : > { %7101 = vst [vmem:[%s11480_s7 + $0xa0] sm:$0xff] %v7069_v44  ;;  %v7038_v13 = vadd.f32 %v7006_v42, %v6974_v22  ;;  %v6979_v37 = vadd.f32 %v11448_v17, %v6940_v1  ;;  %v6938_v39 = vadd.f32 %v6884_v27, %v11930_v23  ;;  %v6895_v3 = vadd.f32 %v8836_v57, %v8516_v25  ;;  %v11939_v44 = vld [vmem:[#allocation43_spill] sm:$0xff]  ;;  %v11940_v1 = vld [vmem:[#allocation42_spill] sm:$0xff]  ;;  %v11942_v57 = vld [vmem:[#allocation60_spill] sm:$0xff] }
 0x449   : > { %v7072_v9 = vmax.f32 %v7040_v19, 0.0  ;;  %v8520_v8 = vpop.f32.mrf.mxu1  ;;  %v6886_v43 = vpop.f32.mrf.mxu0  ;;  %v8519_v2 = vadd.f32 %v8518_v26, %v8517_v55  ;;  %v7015_v22 = vunpack.c.l.bf16 %v11939_v44  ;;  %v7014_v27 = vunpack.c.l.bf16 %v11940_v1 }
 0x44a   : > { %v7070_v56 = vmax.f32 %v7038_v13, 0.0  ;;  %v7043_v0 = vadd.f32 %v7011_v30, %v6979_v37  ;;  %v6977_v51 = vadd.f32 %v11448_v17, %v6938_v39  ;;  %v6887_v11 = vadd.f32 %v8510_v6, %v6886_v43  ;;  %v11943_v6 = vld [vmem:[#allocation46_spill] sm:$0xff]  ;;  %v11944_v43 = vld [vmem:[#allocation44_spill] sm:$0xff] }
 0x44b   : > { %7104 = vst [vmem:[%s11480_s7 + $0xb8] sm:$0xff] %v7072_v9  ;;  %v6941_v47 = vadd.f32 %v6895_v3, %v11931_v20  ;;  %v8521_v34 = vpop.f32.mrf.mxu1  ;;  %v8839_v63 = vpop.f32.mrf.mxu0  ;;  %v6076_v13 = vadd.f32 %v11943_v6, %v11942_v57 }
 0x44c   : > { %7102 = vst [vmem:[%s11480_s7 + $0xa8] sm:$0xff] %v7070_v56  ;;  %v7075_v61 = vmax.f32 %v7043_v0, 0.0  ;;  %v7041_v18 = vadd.f32 %v7009_v46, %v6977_v51  ;;  %v6939_v32 = vadd.f32 %v6887_v11, %v11934_v29  ;;  %v8522_v5 = vadd.f32 %v8521_v34, %v8520_v8 }
 0x44d   : > { %v6980_v36 = vadd.f32 %v11448_v17, %v6941_v47  ;;  %v8523_v16 = vpop.f32.mrf.mxu1  ;;  %v6899_v15 = vpop.f32.mrf.mxu0  ;;  %v7016_v56 = vunpack.c.l.bf16 %v11944_v43 }
 0x44e   : > { %7107 = vst [vmem:[%s11480_s7 + $0xd0] sm:$0xff] %v7075_v61  ;;  %v7073_v24 = vmax.f32 %v7041_v18, 0.0  ;;  %v6978_v48 = vadd.f32 %v11448_v17, %v6939_v32  ;;  %v6900_v50 = vadd.f32 %v8519_v2, %v6899_v15 }
 0x44f   : > { %v7044_v54 = vadd.f32 %v7012_v12, %v6980_v36  ;;  %v8524_v35 = vpop.f32.mrf.mxu1  ;;  %v8840_v62 = vpop.f32.mrf.mxu0 }
 0x450   : > { %7105 = vst [vmem:[%s11480_s7 + $0xc0] sm:$0xff] %v7073_v24  ;;  %v7042_v38 = vadd.f32 %v7010_v41, %v6978_v48  ;;  %v8525_v42 = vadd.f32 %v8524_v35, %v8523_v16  ;;  %v6942_v60 = vadd.f32 %v6900_v50, %v11936_v4 }
 0x451   : > { %v7076_v14 = vmax.f32 %v7044_v54, 0.0  ;;  %v8526_v45 = vpop.f32.mrf.mxu1  ;;  %v6902_v21 = vpop.f32.mrf.mxu0 }
 0x452   : > { %v7074_v55 = vmax.f32 %v7042_v38, 0.0  ;;  %v6908_v10 = vadd.f32 %v8839_v63, %v8525_v42  ;;  %v6981_v30 = vadd.f32 %v11448_v17, %v6942_v60  ;;  %v6903_v28 = vadd.f32 %v8522_v5, %v6902_v21 }
 0x453   : > { %7108 = vst [vmem:[%s11480_s7 + $0xd8] sm:$0xff] %v7076_v14  ;;  %v8527_v52 = vpop.f32.mrf.mxu1 }
 0x454   : > { %7106 = vst [vmem:[%s11480_s7 + $0xc8] sm:$0xff] %v7074_v55  ;;  %v6944_v19 = vadd.f32 %v6908_v10, %v6073_v40  ;;  %v7045_v25 = vadd.f32 %v7013_v31, %v6981_v30  ;;  %v8528_v26 = vadd.f32 %v8527_v52, %v8526_v45  ;;  %v6943_v46 = vadd.f32 %v6903_v28, %v11941_v49 }
 0x456   : > { %v6983_v37 = vadd.f32 %v11448_v17, %v6944_v19  ;;  %v7077_v23 = vmax.f32 %v7045_v25, 0.0  ;;  %v6911_v39 = vadd.f32 %v8840_v62, %v8528_v26  ;;  %v6982_v9 = vadd.f32 %v11448_v17, %v6943_v46 }
 0x458   : > { %v7047_v8 = vadd.f32 %v7015_v22, %v6983_v37  ;;  %7109 = vst [vmem:[%s11480_s7 + $0xe0] sm:$0xff] %v7077_v23  ;;  %v6945_v3 = vadd.f32 %v6911_v39, %v6076_v13  ;;  %v7046_v0 = vadd.f32 %v7014_v27, %v6982_v9 }
 0x45a   : > { %v7079_v51 = vmax.f32 %v7047_v8, 0.0  ;;  %v6984_v11 = vadd.f32 %v11448_v17, %v6945_v3  ;;  %v7078_v20 = vmax.f32 %v7046_v0, 0.0 }
 0x45c   : > { %7111 = vst [vmem:[%s11480_s7 + $0xf0] sm:$0xff] %v7079_v51  ;;  %v7048_v47 = vadd.f32 %v7016_v56, %v6984_v11  ;;  %7110 = vst [vmem:[%s11480_s7 + $0xe8] sm:$0xff] %v7078_v20 }
 0x45e   : > { %v7080_v58 = vmax.f32 %v7048_v47, 0.0 }
 0x460   : > { %7112 = vst [vmem:[%s11480_s7 + $0xf8] sm:$0xff] %v7080_v58 }
 0x461   : > { %9443 = shalt.err (!%p9440_p3)
}
 0x462   : > { %s9444_s9 = scalar_lea.hbm %s11667_s8, 4096  ;;  %s9448_s13 = scalar_lea.hbm %s11718_s5, 8192 }
 0x463   : > { %p9445_p11 = scmp.ne.s32.totalorder %s11667_s8, %s9444_s9  ;;  %p9449_p4 = scmp.lt.s32.totalorder %s11667_s8, %s11718_s5 }
 0x464   : > { %p9450_p6 = scmp.lt.s32.totalorder %s9448_s13, %s9444_s9 }
 0x465   : > { %p9446_p9 = pnand %p9445_p11, %p11945_p2 }
 0x466   : > { %p9451_p8 = por %p9450_p6, %p9449_p4 }
 0x467   : > { %p9447_p1 = pneg %p9446_p9 }
 0x469   : > { %p9452_p5 = pnand %p9451_p8, %p9447_p1 }
 0x46b   : > { %9455 = shalt.err (!%p9452_p5)
}
 0x46c   : > { %s9507_s28 = smov 128   ;;  %s9508_s17 = smov 8  }
 0x46d   : > { %8851 = dma.vmem_to_hbm [thread:$0]  (%p11945_p2), %s11669_s11, 4096, %s11667_s8, %s7114_s29, %s9507_s28, %s9507_s28, %s9508_s17  }
 0x46e PF: > { %s7142_s16 = sand.u32 1, %s9486_s18   ;;  %p11946_p7 = scmp.ne.s32.totalorder %s11787_s25, 0 }
 0x46f   : > { %p11947_p12 = scmp.ge.s32.totalorder %s9498_s21, 2  ;;  %s7143_s6 = scalar_lea.sflag [#allocation5], %s7142_s16 }
 0x471   : > { %p8865_p13 = pnand %p11947_p12, %p11946_p7 }
 0x473   : > { %p8866_p0 = pneg %p8865_p13 }
 0x475   : > { %9481 = dma.done.wait (%p8866_p0), %s7143_s6, 4096  }
 0x476   : > { %9483 = vsyncadd (%p8866_p0), %s7143_s6, 4294963200  ;;  %p19_p10 = scmp.ge.s32.totalorder %s9617_s15, 4   ;;  %s11948_s18 = smov %s9490_s19 }
 0x477   : > { %s11949_s19 = smov %s9494_s20  ;;  %s11950_s20 = smov %s9633_s27 }
 0x478   : > { %s11951_s21 = smov %s9617_s15  ;;  %21 = sbr.rel (!%p19_p10) target bundleno = 6 (0x6), region = 100 }
 0x47d   :  { %7148 = vsyncpa [#allocation4], 1 }
 0x47e   :  { %7150 = vsyncpa [#allocation4 + $0x1], 1 }
 0x47f   :  { %7151 = vsyncpa [#allocation7], 1 }
 0x480   :  { %7152 = vsyncpa [#allocation5], 1 }
 0x481   :  { %7154 = vsyncpa [#allocation5 + $0x1], 1 }

</bundles_post_ra>
